<compile_context>
chip_gen: v7x
topology: tpu7x:2x2x1
jax: 0.10.0
libtpu: 0.0.40
codegen_flags: <defaults>
</compile_context>

<pallas_src>
import functools

import jax
import jax.numpy as jnp
from jax.experimental import pallas as pl
from jax.experimental.pallas import tpu as pltpu

_BN_EPS = 1e-5
_VMEM_LIMIT = 32 * 1024 * 1024  # safe on v5e/v6e/v7x; each layer uses < 1 MiB


def _full_spec(shape):
    # Whole-array block (the grid has a single step).
    return pl.BlockSpec(shape, lambda i: (0,) * len(shape))


# ----------------------------------------------------------------------------
# Fused layer kernels (single grid step, everything resident in VMEM).
# ----------------------------------------------------------------------------
def _fused_bn_layer_kernel(p_ref, w_ref, gamma_ref, beta_ref, o_ref, *,
                           nphase, cout, inv_count):
    # p_ref: (Mp, K) bf16 patches; w_ref: (K, nphase*cout) bf16 weights.
    conv = jnp.dot(p_ref[...], w_ref[...], preferred_element_type=jnp.float32)

    # Per-column batch sums; columns are ordered phase-major (phase*cout + c),
    # so fold the nphase column groups to get per-channel statistics.
    # Zero-padded rows produce zero conv rows and contribute nothing.
    csum = jnp.sum(conv, axis=0, keepdims=True)           # (1, nphase*cout)
    csq = jnp.sum(conv * conv, axis=0, keepdims=True)     # (1, nphase*cout)
    s_c = csum[:, 0:cout]
    q_c = csq[:, 0:cout]
    for p in range(1, nphase):
        s_c = s_c + csum[:, p * cout:(p + 1) * cout]
        q_c = q_c + csq[:, p * cout:(p + 1) * cout]

    mean = s_c * inv_count
    var = jnp.maximum(q_c * inv_count - mean * mean, 0.0)    # clamp E[x^2]-m^2
    scale_c = gamma_ref[...] * jax.lax.rsqrt(var + _BN_EPS)  # (1, cout)
    shift_c = beta_ref[...] - mean * scale_c                 # (1, cout)

    if nphase > 1:
        scale = jnp.concatenate([scale_c] * nphase, axis=1)  # (1, nphase*cout)
        shift = jnp.concatenate([shift_c] * nphase, axis=1)
    else:
        scale, shift = scale_c, shift_c

    y = jnp.maximum(conv * scale + shift, 0.0)   # fused BN affine + ReLU
    o_ref[...] = y.astype(o_ref.dtype)


def _fused_tanh_layer_kernel(p_ref, w_ref, o_ref):
    conv = jnp.dot(p_ref[...], w_ref[...], preferred_element_type=jnp.float32)
    o_ref[...] = jnp.tanh(conv).astype(o_ref.dtype)


def _call_bn_layer(p_mat, w_mat, gamma, beta, *, nphase, cout, m_true, out_dtype):
    mp, k = p_mat.shape
    c = nphase * cout
    kernel = functools.partial(
        _fused_bn_layer_kernel, nphase=nphase, cout=cout,
        inv_count=1.0 / float(m_true * nphase))
    return pl.pallas_call(
        kernel,
        out_shape=jax.ShapeDtypeStruct((mp, c), out_dtype),
        grid_spec=pltpu.PrefetchScalarGridSpec(
            num_scalar_prefetch=0,
            grid=(1,),
            in_specs=[
                _full_spec((mp, k)),
                _full_spec((k, c)),
                _full_spec((1, cout)),
                _full_spec((1, cout)),
            ],
            out_specs=_full_spec((mp, c)),
        ),
        compiler_params=pltpu.CompilerParams(
            dimension_semantics=("arbitrary",),
            vmem_limit_bytes=_VMEM_LIMIT,
        ),
    )(p_mat.astype(jnp.bfloat16), w_mat.astype(jnp.bfloat16),
      gamma.reshape(1, cout).astype(jnp.float32),
      beta.reshape(1, cout).astype(jnp.float32))


def _call_tanh_layer(p_mat, w_mat, *, c):
    mp, k = p_mat.shape
    return pl.pallas_call(
        _fused_tanh_layer_kernel,
        out_shape=jax.ShapeDtypeStruct((mp, c), jnp.float32),
        grid_spec=pltpu.PrefetchScalarGridSpec(
            num_scalar_prefetch=0,
            grid=(1,),
            in_specs=[_full_spec((mp, k)), _full_spec((k, c))],
            out_specs=_full_spec((mp, c)),
        ),
        compiler_params=pltpu.CompilerParams(
            dimension_semantics=("arbitrary",),
            vmem_limit_bytes=_VMEM_LIMIT,
        ),
    )(p_mat.astype(jnp.bfloat16), w_mat.astype(jnp.bfloat16))


# ----------------------------------------------------------------------------
# XLA-side layout glue (pure data movement; all compute runs in the kernels).
# ----------------------------------------------------------------------------
def _layer1(x, w, gamma, beta):
    # ConvTranspose2d(nz, cout, k=4, s=1, p=0) on a 1x1 input is a dense matmul:
    # out[n, co, ky, kx] = sum_ci x[n, ci] * w[ci, co, ky, kx].
    n = x.shape[0]
    cin, cout = w.shape[0], w.shape[1]
    x2d = x.reshape(n, cin)
    n_pad = -(-n // 8) * 8                      # pad rows to the 8-sublane multiple
    x2d = jnp.pad(x2d, ((0, n_pad - n), (0, 0)))
    # Columns ordered (ky*4+kx)*cout + co -> 16*cout lanes (lane-dense output).
    w_mat = w.transpose(0, 2, 3, 1).reshape(cin, 16 * cout)
    y = _call_bn_layer(x2d, w_mat, gamma, beta, nphase=16, cout=cout,
                       m_true=n, out_dtype=jnp.bfloat16)
    return y[:n].reshape(n, 4, 4, cout).transpose(0, 3, 1, 2)   # NCHW


def _subpixel_weight(w):
    # ConvTranspose2d(cin, cout, 4, 2, 1) == stride-1 3x3 conv that emits the 4
    # output phases (py, px) followed by a pixel shuffle.
    #   phase_out[y, x, ph, co] = sum_{dy,dx,ci} x[y+dy, x+dx, ci]
    #                              * w[ci, co, py+1-2*dy, px+1-2*dx]   (0 if OOB)
    # Built with a pad + strided slices (no per-tap update chain).
    # Row index    = ci*9 + (dy+1)*3 + (dx+1)
    # Column index = (py*2 + px)*cout + co
    cin, cout = w.shape[0], w.shape[1]
    wp = jnp.pad(w, ((0, 0), (0, 0), (1, 1), (1, 1)))       # (cin, cout, 6, 6)
    phases = []
    for py in range(2):
        for px in range(2):
            # padded index py + 4 - 2*jy == ky + 1  (jy = dy+1)
            sub = wp[:, :, py::2, px::2][:, :, ::-1, ::-1]   # (cin, cout, 3, 3)
            phases.append(sub)
    wm = jnp.stack(phases, axis=2)                           # (cin, cout, 4, 3, 3)
    wm = wm.transpose(0, 3, 4, 2, 1)                         # (cin, 3, 3, 4, cout)
    return wm.reshape(cin * 9, 4 * cout)


def _patches_3x3(x):
    # x: (N, Cin, H, W) -> (N*H*W, Cin*9); row = n*H*W + y*W + x_col,
    # K index = ci*9 + jy*3 + jx (matches _subpixel_weight rows).
    n, cin, h, w = x.shape
    xp = jnp.pad(x, ((0, 0), (0, 0), (1, 1), (1, 1)))
    cols = [xp[:, :, jy:jy + h, jx:jx + w] for jy in range(3) for jx in range(3)]
    p = jnp.stack(cols, axis=2)                       # (N, Cin, 9, H, W)
    return p.transpose(0, 3, 4, 1, 2).reshape(n * h * w, cin * 9)


def _pixel_shuffle(y, n, h, w, cout):
    # y: (N*H*W, 4*cout), column = (py*2+px)*cout + co  ->  (N, cout, 2H, 2W)
    y = y.reshape(n, h, w, 2, 2, cout)
    y = y.transpose(0, 5, 1, 3, 2, 4)                 # (N, cout, H, py, W, px)
    return y.reshape(n, cout, 2 * h, 2 * w)


def _stride2_bn_layer(x, w, gamma, beta):
    n, _, h, wsp = x.shape
    cout = w.shape[1]
    y = _call_bn_layer(_patches_3x3(x), _subpixel_weight(w), gamma, beta,
                       nphase=4, cout=cout, m_true=n * h * wsp,
                       out_dtype=jnp.bfloat16)
    return _pixel_shuffle(y, n, h, wsp, cout)


def _stride2_tanh_layer(x, w):
    n, _, h, wsp = x.shape
    cout = w.shape[1]
    y = _call_tanh_layer(_patches_3x3(x), _subpixel_weight(w), c=4 * cout)
    return _pixel_shuffle(y, n, h, wsp, cout)


def generator_forward(x, params):
    x = _layer1(x, params["w1"], params["g1"], params["b1"])               # (N, 8*ngf, 4, 4)
    x = _stride2_bn_layer(x, params["w2"], params["g2"], params["b2"])     # (N, 4*ngf, 8, 8)
    x = _stride2_bn_layer(x, params["w3"], params["g3"], params["b3"])     # (N, 2*ngf, 16, 16)
    x = _stride2_bn_layer(x, params["w4"], params["g4"], params["b4"])     # (N, ngf, 32, 32)
    x = _stride2_tanh_layer(x, params["w5"])                               # (N, nc, 64, 64)
    return x


def init_params(key, nz, ngf, nc):
    ks = jax.random.split(key, 5)

    def tconv_w(k, cin, cout):
        return 0.02 * jax.random.normal(k, (cin, cout, 4, 4), jnp.float32)

    p = {
        "w1": tconv_w(ks[0], nz, ngf * 8),
        "w2": tconv_w(ks[1], ngf * 8, ngf * 4),
        "w3": tconv_w(ks[2], ngf * 4, ngf * 2),
        "w4": tconv_w(ks[3], ngf * 2, ngf),
        "w5": tconv_w(ks[4], ngf, nc),
    }
    for i, c in zip(range(1, 5), (ngf * 8, ngf * 4, ngf * 2, ngf)):
        p[f"g{i}"] = jnp.ones((c,), jnp.float32)   # BatchNorm weight init
        p[f"b{i}"] = jnp.zeros((c,), jnp.float32)  # BatchNorm bias init
    return p


if __name__ == "__main__":
    nz, ngf, nc, batch = 16, 8, 3, 2
    key = jax.random.PRNGKey(0)
    kx, kp = jax.random.split(key)
    x = jax.random.normal(kx, (batch, nz, 1, 1), jnp.float32)  # DCGAN latent input
    params = init_params(kp, nz, ngf, nc)

    out = jax.jit(generator_forward)(x, params)
    out = jax.block_until_ready(out)

    assert out.shape == (batch, nc, 64, 64), out.shape
    assert bool(jnp.all(jnp.isfinite(out)))
    assert bool(jnp.all(jnp.abs(out) <= 1.0))  # tanh range
    print("KERNEL_OK")
</pallas_src>

<mosaic_0001>
module attributes {stable_mosaic.version = 11 : i64} {
  func.func @_fused_bn_layer_kernel(%arg0: i32, %arg1: memref<8x16xbf16, #tpu.memory_space<vmem>>, %arg2: memref<16x1024xbf16, #tpu.memory_space<vmem>>, %arg3: memref<1x64xf32, #tpu.memory_space<vmem>>, %arg4: memref<1x64xf32, #tpu.memory_space<vmem>>, %arg5: memref<8x1024xbf16, #tpu.memory_space<vmem>>) attributes {dimension_semantics = [#tpu.dimension_semantics<arbitrary>], iteration_bounds = array<i64: 1>, scalar_prefetch = 0 : i64, scratch_operands = 0 : i64, tpu.core_type = #tpu.core_type<tc>, window_params = [{pipeline_mode = #tpu.pipeline_mode<synchronous>, transform_indices = @transform_0, window_bounds = array<i64: 8, 16>}, {pipeline_mode = #tpu.pipeline_mode<synchronous>, transform_indices = @transform_1, window_bounds = array<i64: 16, 1024>}, {pipeline_mode = #tpu.pipeline_mode<synchronous>, transform_indices = @transform_2, window_bounds = array<i64: 1, 64>}, {pipeline_mode = #tpu.pipeline_mode<synchronous>, transform_indices = @transform_3, window_bounds = array<i64: 1, 64>}, {pipeline_mode = #tpu.pipeline_mode<synchronous>, transform_indices = @transform_4, window_bounds = array<i64: 8, 1024>}]} {
    %c0 = arith.constant 0 : index
    %c0_0 = arith.constant 0 : index
    %0 = vector.load %arg1[%c0, %c0_0] : memref<8x16xbf16, #tpu.memory_space<vmem>>, vector<8x16xbf16>
    %c0_1 = arith.constant 0 : index
    %c0_2 = arith.constant 0 : index
    %1 = vector.load %arg2[%c0_1, %c0_2] : memref<16x1024xbf16, #tpu.memory_space<vmem>>, vector<16x1024xbf16>
    %cst = arith.constant dense<0.000000e+00> : vector<8x1024xf32>
    %2 = tpu.matmul %0, %1, %cst {dimension_numbers = #tpu.dot_dimension_numbers<[1], [0], [0], [1], [0, 0, 1, 1], [], []>} : vector<8x16xbf16>, vector<16x1024xbf16>, vector<8x1024xf32> -> vector<8x1024xf32>
    %cst_3 = arith.constant dense<0.000000e+00> : vector<1024xf32>
    %3 = vector.multi_reduction <add>, %2, %cst_3 [0] : vector<8x1024xf32> to vector<1024xf32>
    %4 = vector.shape_cast %3 : vector<1024xf32> to vector<1x1024xf32>
    %5 = arith.mulf %2, %2 : vector<8x1024xf32>
    %cst_4 = arith.constant dense<0.000000e+00> : vector<1024xf32>
    %6 = vector.multi_reduction <add>, %5, %cst_4 [0] : vector<8x1024xf32> to vector<1024xf32>
    %7 = vector.shape_cast %6 : vector<1024xf32> to vector<1x1024xf32>
    %8 = vector.extract_strided_slice %4 {offsets = [0, 0], sizes = [1, 64], strides = [1, 1]} : vector<1x1024xf32> to vector<1x64xf32>
    %9 = vector.extract_strided_slice %7 {offsets = [0, 0], sizes = [1, 64], strides = [1, 1]} : vector<1x1024xf32> to vector<1x64xf32>
    %10 = vector.extract_strided_slice %4 {offsets = [0, 64], sizes = [1, 64], strides = [1, 1]} : vector<1x1024xf32> to vector<1x64xf32>
    %11 = arith.addf %8, %10 : vector<1x64xf32>
    %12 = vector.extract_strided_slice %7 {offsets = [0, 64], sizes = [1, 64], strides = [1, 1]} : vector<1x1024xf32> to vector<1x64xf32>
    %13 = arith.addf %9, %12 : vector<1x64xf32>
    %14 = vector.extract_strided_slice %4 {offsets = [0, 128], sizes = [1, 64], strides = [1, 1]} : vector<1x1024xf32> to vector<1x64xf32>
    %15 = arith.addf %11, %14 : vector<1x64xf32>
    %16 = vector.extract_strided_slice %7 {offsets = [0, 128], sizes = [1, 64], strides = [1, 1]} : vector<1x1024xf32> to vector<1x64xf32>
    %17 = arith.addf %13, %16 : vector<1x64xf32>
    %18 = vector.extract_strided_slice %4 {offsets = [0, 192], sizes = [1, 64], strides = [1, 1]} : vector<1x1024xf32> to vector<1x64xf32>
    %19 = arith.addf %15, %18 : vector<1x64xf32>
    %20 = vector.extract_strided_slice %7 {offsets = [0, 192], sizes = [1, 64], strides = [1, 1]} : vector<1x1024xf32> to vector<1x64xf32>
    %21 = arith.addf %17, %20 : vector<1x64xf32>
    %22 = vector.extract_strided_slice %4 {offsets = [0, 256], sizes = [1, 64], strides = [1, 1]} : vector<1x1024xf32> to vector<1x64xf32>
    %23 = arith.addf %19, %22 : vector<1x64xf32>
    %24 = vector.extract_strided_slice %7 {offsets = [0, 256], sizes = [1, 64], strides = [1, 1]} : vector<1x1024xf32> to vector<1x64xf32>
    %25 = arith.addf %21, %24 : vector<1x64xf32>
    %26 = vector.extract_strided_slice %4 {offsets = [0, 320], sizes = [1, 64], strides = [1, 1]} : vector<1x1024xf32> to vector<1x64xf32>
    %27 = arith.addf %23, %26 : vector<1x64xf32>
    %28 = vector.extract_strided_slice %7 {offsets = [0, 320], sizes = [1, 64], strides = [1, 1]} : vector<1x1024xf32> to vector<1x64xf32>
    %29 = arith.addf %25, %28 : vector<1x64xf32>
    %30 = vector.extract_strided_slice %4 {offsets = [0, 384], sizes = [1, 64], strides = [1, 1]} : vector<1x1024xf32> to vector<1x64xf32>
    %31 = arith.addf %27, %30 : vector<1x64xf32>
    %32 = vector.extract_strided_slice %7 {offsets = [0, 384], sizes = [1, 64], strides = [1, 1]} : vector<1x1024xf32> to vector<1x64xf32>
    %33 = arith.addf %29, %32 : vector<1x64xf32>
    %34 = vector.extract_strided_slice %4 {offsets = [0, 448], sizes = [1, 64], strides = [1, 1]} : vector<1x1024xf32> to vector<1x64xf32>
    %35 = arith.addf %31, %34 : vector<1x64xf32>
    %36 = vector.extract_strided_slice %7 {offsets = [0, 448], sizes = [1, 64], strides = [1, 1]} : vector<1x1024xf32> to vector<1x64xf32>
    %37 = arith.addf %33, %36 : vector<1x64xf32>
    %38 = vector.extract_strided_slice %4 {offsets = [0, 512], sizes = [1, 64], strides = [1, 1]} : vector<1x1024xf32> to vector<1x64xf32>
    %39 = arith.addf %35, %38 : vector<1x64xf32>
    %40 = vector.extract_strided_slice %7 {offsets = [0, 512], sizes = [1, 64], strides = [1, 1]} : vector<1x1024xf32> to vector<1x64xf32>
    %41 = arith.addf %37, %40 : vector<1x64xf32>
    %42 = vector.extract_strided_slice %4 {offsets = [0, 576], sizes = [1, 64], strides = [1, 1]} : vector<1x1024xf32> to vector<1x64xf32>
    %43 = arith.addf %39, %42 : vector<1x64xf32>
    %44 = vector.extract_strided_slice %7 {offsets = [0, 576], sizes = [1, 64], strides = [1, 1]} : vector<1x1024xf32> to vector<1x64xf32>
    %45 = arith.addf %41, %44 : vector<1x64xf32>
    %46 = vector.extract_strided_slice %4 {offsets = [0, 640], sizes = [1, 64], strides = [1, 1]} : vector<1x1024xf32> to vector<1x64xf32>
    %47 = arith.addf %43, %46 : vector<1x64xf32>
    %48 = vector.extract_strided_slice %7 {offsets = [0, 640], sizes = [1, 64], strides = [1, 1]} : vector<1x1024xf32> to vector<1x64xf32>
    %49 = arith.addf %45, %48 : vector<1x64xf32>
    %50 = vector.extract_strided_slice %4 {offsets = [0, 704], sizes = [1, 64], strides = [1, 1]} : vector<1x1024xf32> to vector<1x64xf32>
    %51 = arith.addf %47, %50 : vector<1x64xf32>
    %52 = vector.extract_strided_slice %7 {offsets = [0, 704], sizes = [1, 64], strides = [1, 1]} : vector<1x1024xf32> to vector<1x64xf32>
    %53 = arith.addf %49, %52 : vector<1x64xf32>
    %54 = vector.extract_strided_slice %4 {offsets = [0, 768], sizes = [1, 64], strides = [1, 1]} : vector<1x1024xf32> to vector<1x64xf32>
    %55 = arith.addf %51, %54 : vector<1x64xf32>
    %56 = vector.extract_strided_slice %7 {offsets = [0, 768], sizes = [1, 64], strides = [1, 1]} : vector<1x1024xf32> to vector<1x64xf32>
    %57 = arith.addf %53, %56 : vector<1x64xf32>
    %58 = vector.extract_strided_slice %4 {offsets = [0, 832], sizes = [1, 64], strides = [1, 1]} : vector<1x1024xf32> to vector<1x64xf32>
    %59 = arith.addf %55, %58 : vector<1x64xf32>
    %60 = vector.extract_strided_slice %7 {offsets = [0, 832], sizes = [1, 64], strides = [1, 1]} : vector<1x1024xf32> to vector<1x64xf32>
    %61 = arith.addf %57, %60 : vector<1x64xf32>
    %62 = vector.extract_strided_slice %4 {offsets = [0, 896], sizes = [1, 64], strides = [1, 1]} : vector<1x1024xf32> to vector<1x64xf32>
    %63 = arith.addf %59, %62 : vector<1x64xf32>
    %64 = vector.extract_strided_slice %7 {offsets = [0, 896], sizes = [1, 64], strides = [1, 1]} : vector<1x1024xf32> to vector<1x64xf32>
    %65 = arith.addf %61, %64 : vector<1x64xf32>
    %66 = vector.extract_strided_slice %4 {offsets = [0, 960], sizes = [1, 64], strides = [1, 1]} : vector<1x1024xf32> to vector<1x64xf32>
    %67 = arith.addf %63, %66 : vector<1x64xf32>
    %68 = vector.extract_strided_slice %7 {offsets = [0, 960], sizes = [1, 64], strides = [1, 1]} : vector<1x1024xf32> to vector<1x64xf32>
    %69 = arith.addf %65, %68 : vector<1x64xf32>
    %cst_5 = arith.constant 3.125000e-02 : f32
    %70 = vector.broadcast %cst_5 : f32 to vector<1x64xf32>
    %71 = arith.mulf %67, %70 : vector<1x64xf32>
    %cst_6 = arith.constant 3.125000e-02 : f32
    %72 = vector.broadcast %cst_6 : f32 to vector<1x64xf32>
    %73 = arith.mulf %69, %72 : vector<1x64xf32>
    %74 = arith.mulf %71, %71 : vector<1x64xf32>
    %75 = arith.subf %73, %74 : vector<1x64xf32>
    %cst_7 = arith.constant 0.000000e+00 : f32
    %76 = vector.broadcast %cst_7 : f32 to vector<1x64xf32>
    %77 = arith.maximumf %75, %76 : vector<1x64xf32>
    %c0_8 = arith.constant 0 : index
    %c0_9 = arith.constant 0 : index
    %78 = vector.load %arg3[%c0_8, %c0_9] : memref<1x64xf32, #tpu.memory_space<vmem>>, vector<1x64xf32>
    %cst_10 = arith.constant 9.99999974E-6 : f32
    %79 = vector.broadcast %cst_10 : f32 to vector<1x64xf32>
    %80 = arith.addf %77, %79 : vector<1x64xf32>
    %81 = math.rsqrt %80 : vector<1x64xf32>
    %82 = arith.mulf %78, %81 : vector<1x64xf32>
    %c0_11 = arith.constant 0 : index
    %c0_12 = arith.constant 0 : index
    %83 = vector.load %arg4[%c0_11, %c0_12] : memref<1x64xf32, #tpu.memory_space<vmem>>, vector<1x64xf32>
    %84 = arith.mulf %71, %82 : vector<1x64xf32>
    %85 = arith.subf %83, %84 : vector<1x64xf32>
    %86 = tpu.concatenate %82, %82, %82, %82, %82, %82, %82, %82, %82, %82, %82, %82, %82, %82, %82, %82 in 1 : vector<1x64xf32>, vector<1x64xf32>, vector<1x64xf32>, vector<1x64xf32>, vector<1x64xf32>, vector<1x64xf32>, vector<1x64xf32>, vector<1x64xf32>, vector<1x64xf32>, vector<1x64xf32>, vector<1x64xf32>, vector<1x64xf32>, vector<1x64xf32>, vector<1x64xf32>, vector<1x64xf32>, vector<1x64xf32> -> vector<1x1024xf32>
    %87 = tpu.concatenate %85, %85, %85, %85, %85, %85, %85, %85, %85, %85, %85, %85, %85, %85, %85, %85 in 1 : vector<1x64xf32>, vector<1x64xf32>, vector<1x64xf32>, vector<1x64xf32>, vector<1x64xf32>, vector<1x64xf32>, vector<1x64xf32>, vector<1x64xf32>, vector<1x64xf32>, vector<1x64xf32>, vector<1x64xf32>, vector<1x64xf32>, vector<1x64xf32>, vector<1x64xf32>, vector<1x64xf32>, vector<1x64xf32> -> vector<1x1024xf32>
    %88 = vector.broadcast %86 : vector<1x1024xf32> to vector<8x1024xf32>
    %89 = arith.mulf %2, %88 : vector<8x1024xf32>
    %90 = vector.broadcast %87 : vector<1x1024xf32> to vector<8x1024xf32>
    %91 = arith.addf %89, %90 : vector<8x1024xf32>
    %cst_13 = arith.constant 0.000000e+00 : f32
    %92 = vector.broadcast %cst_13 : f32 to vector<8x1024xf32>
    %93 = arith.maximumf %91, %92 : vector<8x1024xf32>
    %94 = arith.truncf %93 : vector<8x1024xf32> to vector<8x1024xbf16>
    %c0_14 = arith.constant 0 : index
    %c0_15 = arith.constant 0 : index
    %95 = vector.load %arg5[%c0_14, %c0_15] : memref<8x1024xbf16, #tpu.memory_space<vmem>>, vector<8x1024xbf16>
    tpu.vector_store %arg5[%c0_14, %c0_15], %94 {strides = array<i32>} : memref<8x1024xbf16, #tpu.memory_space<vmem>>, vector<8x1024xbf16>,
    return
  }
  func.func @transform_0(%arg0: i32) -> (i32, i32) {
    %c0_i32 = arith.constant 0 : i32
    %c0_i32_0 = arith.constant 0 : i32
    %c0_i32_1 = arith.constant 0 : i32
    return %c0_i32, %c0_i32_0 : i32, i32
  }
  func.func @transform_1(%arg0: i32) -> (i32, i32) {
    %c0_i32 = arith.constant 0 : i32
    %c0_i32_0 = arith.constant 0 : i32
    %c0_i32_1 = arith.constant 0 : i32
    return %c0_i32, %c0_i32_0 : i32, i32
  }
  func.func @transform_2(%arg0: i32) -> (i32, i32) {
    %c0_i32 = arith.constant 0 : i32
    %c0_i32_0 = arith.constant 0 : i32
    %c0_i32_1 = arith.constant 0 : i32
    return %c0_i32, %c0_i32_0 : i32, i32
  }
  func.func @transform_3(%arg0: i32) -> (i32, i32) {
    %c0_i32 = arith.constant 0 : i32
    %c0_i32_0 = arith.constant 0 : i32
    %c0_i32_1 = arith.constant 0 : i32
    return %c0_i32, %c0_i32_0 : i32, i32
  }
  func.func @transform_4(%arg0: i32) -> (i32, i32) {
    %c0_i32 = arith.constant 0 : i32
    %c0_i32_0 = arith.constant 0 : i32
    %c0_i32_1 = arith.constant 0 : i32
    return %c0_i32, %c0_i32_0 : i32, i32
  }
}

module attributes {stable_mosaic.version = 11 : i64} {
  func.func @_fused_bn_layer_kernel(%arg0: i32, %arg1: memref<32x576xbf16, #tpu.memory_space<vmem>>, %arg2: memref<576x128xbf16, #tpu.memory_space<vmem>>, %arg3: memref<1x32xf32, #tpu.memory_space<vmem>>, %arg4: memref<1x32xf32, #tpu.memory_space<vmem>>, %arg5: memref<32x128xbf16, #tpu.memory_space<vmem>>) attributes {dimension_semantics = [#tpu.dimension_semantics<arbitrary>], iteration_bounds = array<i64: 1>, scalar_prefetch = 0 : i64, scratch_operands = 0 : i64, tpu.core_type = #tpu.core_type<tc>, window_params = [{pipeline_mode = #tpu.pipeline_mode<synchronous>, transform_indices = @transform_0, window_bounds = array<i64: 32, 576>}, {pipeline_mode = #tpu.pipeline_mode<synchronous>, transform_indices = @transform_1, window_bounds = array<i64: 576, 128>}, {pipeline_mode = #tpu.pipeline_mode<synchronous>, transform_indices = @transform_2, window_bounds = array<i64: 1, 32>}, {pipeline_mode = #tpu.pipeline_mode<synchronous>, transform_indices = @transform_3, window_bounds = array<i64: 1, 32>}, {pipeline_mode = #tpu.pipeline_mode<synchronous>, transform_indices = @transform_4, window_bounds = array<i64: 32, 128>}]} {
    %c0 = arith.constant 0 : index
    %c0_0 = arith.constant 0 : index
    %0 = vector.load %arg1[%c0, %c0_0] : memref<32x576xbf16, #tpu.memory_space<vmem>>, vector<32x576xbf16>
    %c0_1 = arith.constant 0 : index
    %c0_2 = arith.constant 0 : index
    %1 = vector.load %arg2[%c0_1, %c0_2] : memref<576x128xbf16, #tpu.memory_space<vmem>>, vector<576x128xbf16>
    %cst = arith.constant dense<0.000000e+00> : vector<32x128xf32>
    %2 = tpu.matmul %0, %1, %cst {dimension_numbers = #tpu.dot_dimension_numbers<[1], [0], [0], [1], [0, 0, 1, 1], [], []>} : vector<32x576xbf16>, vector<576x128xbf16>, vector<32x128xf32> -> vector<32x128xf32>
    %cst_3 = arith.constant dense<0.000000e+00> : vector<128xf32>
    %3 = vector.multi_reduction <add>, %2, %cst_3 [0] : vector<32x128xf32> to vector<128xf32>
    %4 = vector.shape_cast %3 : vector<128xf32> to vector<1x128xf32>
    %5 = arith.mulf %2, %2 : vector<32x128xf32>
    %cst_4 = arith.constant dense<0.000000e+00> : vector<128xf32>
    %6 = vector.multi_reduction <add>, %5, %cst_4 [0] : vector<32x128xf32> to vector<128xf32>
    %7 = vector.shape_cast %6 : vector<128xf32> to vector<1x128xf32>
    %8 = vector.extract_strided_slice %4 {offsets = [0, 0], sizes = [1, 32], strides = [1, 1]} : vector<1x128xf32> to vector<1x32xf32>
    %9 = vector.extract_strided_slice %7 {offsets = [0, 0], sizes = [1, 32], strides = [1, 1]} : vector<1x128xf32> to vector<1x32xf32>
    %10 = vector.extract_strided_slice %4 {offsets = [0, 32], sizes = [1, 32], strides = [1, 1]} : vector<1x128xf32> to vector<1x32xf32>
    %11 = arith.addf %8, %10 : vector<1x32xf32>
    %12 = vector.extract_strided_slice %7 {offsets = [0, 32], sizes = [1, 32], strides = [1, 1]} : vector<1x128xf32> to vector<1x32xf32>
    %13 = arith.addf %9, %12 : vector<1x32xf32>
    %14 = vector.extract_strided_slice %4 {offsets = [0, 64], sizes = [1, 32], strides = [1, 1]} : vector<1x128xf32> to vector<1x32xf32>
    %15 = arith.addf %11, %14 : vector<1x32xf32>
    %16 = vector.extract_strided_slice %7 {offsets = [0, 64], sizes = [1, 32], strides = [1, 1]} : vector<1x128xf32> to vector<1x32xf32>
    %17 = arith.addf %13, %16 : vector<1x32xf32>
    %18 = vector.extract_strided_slice %4 {offsets = [0, 96], sizes = [1, 32], strides = [1, 1]} : vector<1x128xf32> to vector<1x32xf32>
    %19 = arith.addf %15, %18 : vector<1x32xf32>
    %20 = vector.extract_strided_slice %7 {offsets = [0, 96], sizes = [1, 32], strides = [1, 1]} : vector<1x128xf32> to vector<1x32xf32>
    %21 = arith.addf %17, %20 : vector<1x32xf32>
    %cst_5 = arith.constant 7.812500e-03 : f32
    %22 = vector.broadcast %cst_5 : f32 to vector<1x32xf32>
    %23 = arith.mulf %19, %22 : vector<1x32xf32>
    %cst_6 = arith.constant 7.812500e-03 : f32
    %24 = vector.broadcast %cst_6 : f32 to vector<1x32xf32>
    %25 = arith.mulf %21, %24 : vector<1x32xf32>
    %26 = arith.mulf %23, %23 : vector<1x32xf32>
    %27 = arith.subf %25, %26 : vector<1x32xf32>
    %cst_7 = arith.constant 0.000000e+00 : f32
    %28 = vector.broadcast %cst_7 : f32 to vector<1x32xf32>
    %29 = arith.maximumf %27, %28 : vector<1x32xf32>
    %c0_8 = arith.constant 0 : index
    %c0_9 = arith.constant 0 : index
    %30 = vector.load %arg3[%c0_8, %c0_9] : memref<1x32xf32, #tpu.memory_space<vmem>>, vector<1x32xf32>
    %cst_10 = arith.constant 9.99999974E-6 : f32
    %31 = vector.broadcast %cst_10 : f32 to vector<1x32xf32>
    %32 = arith.addf %29, %31 : vector<1x32xf32>
    %33 = math.rsqrt %32 : vector<1x32xf32>
    %34 = arith.mulf %30, %33 : vector<1x32xf32>
    %c0_11 = arith.constant 0 : index
    %c0_12 = arith.constant 0 : index
    %35 = vector.load %arg4[%c0_11, %c0_12] : memref<1x32xf32, #tpu.memory_space<vmem>>, vector<1x32xf32>
    %36 = arith.mulf %23, %34 : vector<1x32xf32>
    %37 = arith.subf %35, %36 : vector<1x32xf32>
    %38 = tpu.concatenate %34, %34, %34, %34 in 1 : vector<1x32xf32>, vector<1x32xf32>, vector<1x32xf32>, vector<1x32xf32> -> vector<1x128xf32>
    %39 = tpu.concatenate %37, %37, %37, %37 in 1 : vector<1x32xf32>, vector<1x32xf32>, vector<1x32xf32>, vector<1x32xf32> -> vector<1x128xf32>
    %40 = vector.broadcast %38 : vector<1x128xf32> to vector<32x128xf32>
    %41 = arith.mulf %2, %40 : vector<32x128xf32>
    %42 = vector.broadcast %39 : vector<1x128xf32> to vector<32x128xf32>
    %43 = arith.addf %41, %42 : vector<32x128xf32>
    %cst_13 = arith.constant 0.000000e+00 : f32
    %44 = vector.broadcast %cst_13 : f32 to vector<32x128xf32>
    %45 = arith.maximumf %43, %44 : vector<32x128xf32>
    %46 = arith.truncf %45 : vector<32x128xf32> to vector<32x128xbf16>
    %c0_14 = arith.constant 0 : index
    %c0_15 = arith.constant 0 : index
    %47 = vector.load %arg5[%c0_14, %c0_15] : memref<32x128xbf16, #tpu.memory_space<vmem>>, vector<32x128xbf16>
    tpu.vector_store %arg5[%c0_14, %c0_15], %46 {strides = array<i32>} : memref<32x128xbf16, #tpu.memory_space<vmem>>, vector<32x128xbf16>,
    return
  }
  func.func @transform_0(%arg0: i32) -> (i32, i32) {
    %c0_i32 = arith.constant 0 : i32
    %c0_i32_0 = arith.constant 0 : i32
    %c0_i32_1 = arith.constant 0 : i32
    return %c0_i32, %c0_i32_0 : i32, i32
  }
  func.func @transform_1(%arg0: i32) -> (i32, i32) {
    %c0_i32 = arith.constant 0 : i32
    %c0_i32_0 = arith.constant 0 : i32
    %c0_i32_1 = arith.constant 0 : i32
    return %c0_i32, %c0_i32_0 : i32, i32
  }
  func.func @transform_2(%arg0: i32) -> (i32, i32) {
    %c0_i32 = arith.constant 0 : i32
    %c0_i32_0 = arith.constant 0 : i32
    %c0_i32_1 = arith.constant 0 : i32
    return %c0_i32, %c0_i32_0 : i32, i32
  }
  func.func @transform_3(%arg0: i32) -> (i32, i32) {
    %c0_i32 = arith.constant 0 : i32
    %c0_i32_0 = arith.constant 0 : i32
    %c0_i32_1 = arith.constant 0 : i32
    return %c0_i32, %c0_i32_0 : i32, i32
  }
  func.func @transform_4(%arg0: i32) -> (i32, i32) {
    %c0_i32 = arith.constant 0 : i32
    %c0_i32_0 = arith.constant 0 : i32
    %c0_i32_1 = arith.constant 0 : i32
    return %c0_i32, %c0_i32_0 : i32, i32
  }
}

module attributes {stable_mosaic.version = 11 : i64} {
  func.func @_fused_bn_layer_kernel(%arg0: i32, %arg1: memref<128x288xbf16, #tpu.memory_space<vmem>>, %arg2: memref<288x64xbf16, #tpu.memory_space<vmem>>, %arg3: memref<1x16xf32, #tpu.memory_space<vmem>>, %arg4: memref<1x16xf32, #tpu.memory_space<vmem>>, %arg5: memref<128x64xbf16, #tpu.memory_space<vmem>>) attributes {dimension_semantics = [#tpu.dimension_semantics<arbitrary>], iteration_bounds = array<i64: 1>, scalar_prefetch = 0 : i64, scratch_operands = 0 : i64, tpu.core_type = #tpu.core_type<tc>, window_params = [{pipeline_mode = #tpu.pipeline_mode<synchronous>, transform_indices = @transform_0, window_bounds = array<i64: 128, 288>}, {pipeline_mode = #tpu.pipeline_mode<synchronous>, transform_indices = @transform_1, window_bounds = array<i64: 288, 64>}, {pipeline_mode = #tpu.pipeline_mode<synchronous>, transform_indices = @transform_2, window_bounds = array<i64: 1, 16>}, {pipeline_mode = #tpu.pipeline_mode<synchronous>, transform_indices = @transform_3, window_bounds = array<i64: 1, 16>}, {pipeline_mode = #tpu.pipeline_mode<synchronous>, transform_indices = @transform_4, window_bounds = array<i64: 128, 64>}]} {
    %c0 = arith.constant 0 : index
    %c0_0 = arith.constant 0 : index
    %0 = vector.load %arg1[%c0, %c0_0] : memref<128x288xbf16, #tpu.memory_space<vmem>>, vector<128x288xbf16>
    %c0_1 = arith.constant 0 : index
    %c0_2 = arith.constant 0 : index
    %1 = vector.load %arg2[%c0_1, %c0_2] : memref<288x64xbf16, #tpu.memory_space<vmem>>, vector<288x64xbf16>
    %cst = arith.constant dense<0.000000e+00> : vector<128x64xf32>
    %2 = tpu.matmul %0, %1, %cst {dimension_numbers = #tpu.dot_dimension_numbers<[1], [0], [0], [1], [0, 0, 1, 1], [], []>} : vector<128x288xbf16>, vector<288x64xbf16>, vector<128x64xf32> -> vector<128x64xf32>
    %cst_3 = arith.constant dense<0.000000e+00> : vector<64xf32>
    %3 = vector.multi_reduction <add>, %2, %cst_3 [0] : vector<128x64xf32> to vector<64xf32>
    %4 = vector.shape_cast %3 : vector<64xf32> to vector<1x64xf32>
    %5 = arith.mulf %2, %2 : vector<128x64xf32>
    %cst_4 = arith.constant dense<0.000000e+00> : vector<64xf32>
    %6 = vector.multi_reduction <add>, %5, %cst_4 [0] : vector<128x64xf32> to vector<64xf32>
    %7 = vector.shape_cast %6 : vector<64xf32> to vector<1x64xf32>
    %8 = vector.extract_strided_slice %4 {offsets = [0, 0], sizes = [1, 16], strides = [1, 1]} : vector<1x64xf32> to vector<1x16xf32>
    %9 = vector.extract_strided_slice %7 {offsets = [0, 0], sizes = [1, 16], strides = [1, 1]} : vector<1x64xf32> to vector<1x16xf32>
    %10 = vector.extract_strided_slice %4 {offsets = [0, 16], sizes = [1, 16], strides = [1, 1]} : vector<1x64xf32> to vector<1x16xf32>
    %11 = arith.addf %8, %10 : vector<1x16xf32>
    %12 = vector.extract_strided_slice %7 {offsets = [0, 16], sizes = [1, 16], strides = [1, 1]} : vector<1x64xf32> to vector<1x16xf32>
    %13 = arith.addf %9, %12 : vector<1x16xf32>
    %14 = vector.extract_strided_slice %4 {offsets = [0, 32], sizes = [1, 16], strides = [1, 1]} : vector<1x64xf32> to vector<1x16xf32>
    %15 = arith.addf %11, %14 : vector<1x16xf32>
    %16 = vector.extract_strided_slice %7 {offsets = [0, 32], sizes = [1, 16], strides = [1, 1]} : vector<1x64xf32> to vector<1x16xf32>
    %17 = arith.addf %13, %16 : vector<1x16xf32>
    %18 = vector.extract_strided_slice %4 {offsets = [0, 48], sizes = [1, 16], strides = [1, 1]} : vector<1x64xf32> to vector<1x16xf32>
    %19 = arith.addf %15, %18 : vector<1x16xf32>
    %20 = vector.extract_strided_slice %7 {offsets = [0, 48], sizes = [1, 16], strides = [1, 1]} : vector<1x64xf32> to vector<1x16xf32>
    %21 = arith.addf %17, %20 : vector<1x16xf32>
    %cst_5 = arith.constant 0.001953125 : f32
    %22 = vector.broadcast %cst_5 : f32 to vector<1x16xf32>
    %23 = arith.mulf %19, %22 : vector<1x16xf32>
    %cst_6 = arith.constant 0.001953125 : f32
    %24 = vector.broadcast %cst_6 : f32 to vector<1x16xf32>
    %25 = arith.mulf %21, %24 : vector<1x16xf32>
    %26 = arith.mulf %23, %23 : vector<1x16xf32>
    %27 = arith.subf %25, %26 : vector<1x16xf32>
    %cst_7 = arith.constant 0.000000e+00 : f32
    %28 = vector.broadcast %cst_7 : f32 to vector<1x16xf32>
    %29 = arith.maximumf %27, %28 : vector<1x16xf32>
    %c0_8 = arith.constant 0 : index
    %c0_9 = arith.constant 0 : index
    %30 = vector.load %arg3[%c0_8, %c0_9] : memref<1x16xf32, #tpu.memory_space<vmem>>, vector<1x16xf32>
    %cst_10 = arith.constant 9.99999974E-6 : f32
    %31 = vector.broadcast %cst_10 : f32 to vector<1x16xf32>
    %32 = arith.addf %29, %31 : vector<1x16xf32>
    %33 = math.rsqrt %32 : vector<1x16xf32>
    %34 = arith.mulf %30, %33 : vector<1x16xf32>
    %c0_11 = arith.constant 0 : index
    %c0_12 = arith.constant 0 : index
    %35 = vector.load %arg4[%c0_11, %c0_12] : memref<1x16xf32, #tpu.memory_space<vmem>>, vector<1x16xf32>
    %36 = arith.mulf %23, %34 : vector<1x16xf32>
    %37 = arith.subf %35, %36 : vector<1x16xf32>
    %38 = tpu.concatenate %34, %34, %34, %34 in 1 : vector<1x16xf32>, vector<1x16xf32>, vector<1x16xf32>, vector<1x16xf32> -> vector<1x64xf32>
    %39 = tpu.concatenate %37, %37, %37, %37 in 1 : vector<1x16xf32>, vector<1x16xf32>, vector<1x16xf32>, vector<1x16xf32> -> vector<1x64xf32>
    %40 = vector.broadcast %38 : vector<1x64xf32> to vector<128x64xf32>
    %41 = arith.mulf %2, %40 : vector<128x64xf32>
    %42 = vector.broadcast %39 : vector<1x64xf32> to vector<128x64xf32>
    %43 = arith.addf %41, %42 : vector<128x64xf32>
    %cst_13 = arith.constant 0.000000e+00 : f32
    %44 = vector.broadcast %cst_13 : f32 to vector<128x64xf32>
    %45 = arith.maximumf %43, %44 : vector<128x64xf32>
    %46 = arith.truncf %45 : vector<128x64xf32> to vector<128x64xbf16>
    %c0_14 = arith.constant 0 : index
    %c0_15 = arith.constant 0 : index
    %47 = vector.load %arg5[%c0_14, %c0_15] : memref<128x64xbf16, #tpu.memory_space<vmem>>, vector<128x64xbf16>
    tpu.vector_store %arg5[%c0_14, %c0_15], %46 {strides = array<i32>} : memref<128x64xbf16, #tpu.memory_space<vmem>>, vector<128x64xbf16>,
    return
  }
  func.func @transform_0(%arg0: i32) -> (i32, i32) {
    %c0_i32 = arith.constant 0 : i32
    %c0_i32_0 = arith.constant 0 : i32
    %c0_i32_1 = arith.constant 0 : i32
    return %c0_i32, %c0_i32_0 : i32, i32
  }
  func.func @transform_1(%arg0: i32) -> (i32, i32) {
    %c0_i32 = arith.constant 0 : i32
    %c0_i32_0 = arith.constant 0 : i32
    %c0_i32_1 = arith.constant 0 : i32
    return %c0_i32, %c0_i32_0 : i32, i32
  }
  func.func @transform_2(%arg0: i32) -> (i32, i32) {
    %c0_i32 = arith.constant 0 : i32
    %c0_i32_0 = arith.constant 0 : i32
    %c0_i32_1 = arith.constant 0 : i32
    return %c0_i32, %c0_i32_0 : i32, i32
  }
  func.func @transform_3(%arg0: i32) -> (i32, i32) {
    %c0_i32 = arith.constant 0 : i32
    %c0_i32_0 = arith.constant 0 : i32
    %c0_i32_1 = arith.constant 0 : i32
    return %c0_i32, %c0_i32_0 : i32, i32
  }
  func.func @transform_4(%arg0: i32) -> (i32, i32) {
    %c0_i32 = arith.constant 0 : i32
    %c0_i32_0 = arith.constant 0 : i32
    %c0_i32_1 = arith.constant 0 : i32
    return %c0_i32, %c0_i32_0 : i32, i32
  }
}

module attributes {stable_mosaic.version = 11 : i64} {
  func.func @_fused_bn_layer_kernel(%arg0: i32, %arg1: memref<512x144xbf16, #tpu.memory_space<vmem>>, %arg2: memref<144x32xbf16, #tpu.memory_space<vmem>>, %arg3: memref<1x8xf32, #tpu.memory_space<vmem>>, %arg4: memref<1x8xf32, #tpu.memory_space<vmem>>, %arg5: memref<512x32xbf16, #tpu.memory_space<vmem>>) attributes {dimension_semantics = [#tpu.dimension_semantics<arbitrary>], iteration_bounds = array<i64: 1>, scalar_prefetch = 0 : i64, scratch_operands = 0 : i64, tpu.core_type = #tpu.core_type<tc>, window_params = [{pipeline_mode = #tpu.pipeline_mode<synchronous>, transform_indices = @transform_0, window_bounds = array<i64: 512, 144>}, {pipeline_mode = #tpu.pipeline_mode<synchronous>, transform_indices = @transform_1, window_bounds = array<i64: 144, 32>}, {pipeline_mode = #tpu.pipeline_mode<synchronous>, transform_indices = @transform_2, window_bounds = array<i64: 1, 8>}, {pipeline_mode = #tpu.pipeline_mode<synchronous>, transform_indices = @transform_3, window_bounds = array<i64: 1, 8>}, {pipeline_mode = #tpu.pipeline_mode<synchronous>, transform_indices = @transform_4, window_bounds = array<i64: 512, 32>}]} {
    %c0 = arith.constant 0 : index
    %c0_0 = arith.constant 0 : index
    %0 = vector.load %arg1[%c0, %c0_0] : memref<512x144xbf16, #tpu.memory_space<vmem>>, vector<512x144xbf16>
    %c0_1 = arith.constant 0 : index
    %c0_2 = arith.constant 0 : index
    %1 = vector.load %arg2[%c0_1, %c0_2] : memref<144x32xbf16, #tpu.memory_space<vmem>>, vector<144x32xbf16>
    %cst = arith.constant dense<0.000000e+00> : vector<512x32xf32>
    %2 = tpu.matmul %0, %1, %cst {dimension_numbers = #tpu.dot_dimension_numbers<[1], [0], [0], [1], [0, 0, 1, 1], [], []>} : vector<512x144xbf16>, vector<144x32xbf16>, vector<512x32xf32> -> vector<512x32xf32>
    %cst_3 = arith.constant dense<0.000000e+00> : vector<32xf32>
    %3 = vector.multi_reduction <add>, %2, %cst_3 [0] : vector<512x32xf32> to vector<32xf32>
    %4 = vector.shape_cast %3 : vector<32xf32> to vector<1x32xf32>
    %5 = arith.mulf %2, %2 : vector<512x32xf32>
    %cst_4 = arith.constant dense<0.000000e+00> : vector<32xf32>
    %6 = vector.multi_reduction <add>, %5, %cst_4 [0] : vector<512x32xf32> to vector<32xf32>
    %7 = vector.shape_cast %6 : vector<32xf32> to vector<1x32xf32>
    %8 = vector.extract_strided_slice %4 {offsets = [0, 0], sizes = [1, 8], strides = [1, 1]} : vector<1x32xf32> to vector<1x8xf32>
    %9 = vector.extract_strided_slice %7 {offsets = [0, 0], sizes = [1, 8], strides = [1, 1]} : vector<1x32xf32> to vector<1x8xf32>
    %10 = vector.extract_strided_slice %4 {offsets = [0, 8], sizes = [1, 8], strides = [1, 1]} : vector<1x32xf32> to vector<1x8xf32>
    %11 = arith.addf %8, %10 : vector<1x8xf32>
    %12 = vector.extract_strided_slice %7 {offsets = [0, 8], sizes = [1, 8], strides = [1, 1]} : vector<1x32xf32> to vector<1x8xf32>
    %13 = arith.addf %9, %12 : vector<1x8xf32>
    %14 = vector.extract_strided_slice %4 {offsets = [0, 16], sizes = [1, 8], strides = [1, 1]} : vector<1x32xf32> to vector<1x8xf32>
    %15 = arith.addf %11, %14 : vector<1x8xf32>
    %16 = vector.extract_strided_slice %7 {offsets = [0, 16], sizes = [1, 8], strides = [1, 1]} : vector<1x32xf32> to vector<1x8xf32>
    %17 = arith.addf %13, %16 : vector<1x8xf32>
    %18 = vector.extract_strided_slice %4 {offsets = [0, 24], sizes = [1, 8], strides = [1, 1]} : vector<1x32xf32> to vector<1x8xf32>
    %19 = arith.addf %15, %18 : vector<1x8xf32>
    %20 = vector.extract_strided_slice %7 {offsets = [0, 24], sizes = [1, 8], strides = [1, 1]} : vector<1x32xf32> to vector<1x8xf32>
    %21 = arith.addf %17, %20 : vector<1x8xf32>
    %cst_5 = arith.constant 4.8828125E-4 : f32
    %22 = vector.broadcast %cst_5 : f32 to vector<1x8xf32>
    %23 = arith.mulf %19, %22 : vector<1x8xf32>
    %cst_6 = arith.constant 4.8828125E-4 : f32
    %24 = vector.broadcast %cst_6 : f32 to vector<1x8xf32>
    %25 = arith.mulf %21, %24 : vector<1x8xf32>
    %26 = arith.mulf %23, %23 : vector<1x8xf32>
    %27 = arith.subf %25, %26 : vector<1x8xf32>
    %cst_7 = arith.constant 0.000000e+00 : f32
    %28 = vector.broadcast %cst_7 : f32 to vector<1x8xf32>
    %29 = arith.maximumf %27, %28 : vector<1x8xf32>
    %c0_8 = arith.constant 0 : index
    %c0_9 = arith.constant 0 : index
    %30 = vector.load %arg3[%c0_8, %c0_9] : memref<1x8xf32, #tpu.memory_space<vmem>>, vector<1x8xf32>
    %cst_10 = arith.constant 9.99999974E-6 : f32
    %31 = vector.broadcast %cst_10 : f32 to vector<1x8xf32>
    %32 = arith.addf %29, %31 : vector<1x8xf32>
    %33 = math.rsqrt %32 : vector<1x8xf32>
    %34 = arith.mulf %30, %33 : vector<1x8xf32>
    %c0_11 = arith.constant 0 : index
    %c0_12 = arith.constant 0 : index
    %35 = vector.load %arg4[%c0_11, %c0_12] : memref<1x8xf32, #tpu.memory_space<vmem>>, vector<1x8xf32>
    %36 = arith.mulf %23, %34 : vector<1x8xf32>
    %37 = arith.subf %35, %36 : vector<1x8xf32>
    %38 = tpu.concatenate %34, %34, %34, %34 in 1 : vector<1x8xf32>, vector<1x8xf32>, vector<1x8xf32>, vector<1x8xf32> -> vector<1x32xf32>
    %39 = tpu.concatenate %37, %37, %37, %37 in 1 : vector<1x8xf32>, vector<1x8xf32>, vector<1x8xf32>, vector<1x8xf32> -> vector<1x32xf32>
    %40 = vector.broadcast %38 : vector<1x32xf32> to vector<512x32xf32>
    %41 = arith.mulf %2, %40 : vector<512x32xf32>
    %42 = vector.broadcast %39 : vector<1x32xf32> to vector<512x32xf32>
    %43 = arith.addf %41, %42 : vector<512x32xf32>
    %cst_13 = arith.constant 0.000000e+00 : f32
    %44 = vector.broadcast %cst_13 : f32 to vector<512x32xf32>
    %45 = arith.maximumf %43, %44 : vector<512x32xf32>
    %46 = arith.truncf %45 : vector<512x32xf32> to vector<512x32xbf16>
    %c0_14 = arith.constant 0 : index
    %c0_15 = arith.constant 0 : index
    %47 = vector.load %arg5[%c0_14, %c0_15] : memref<512x32xbf16, #tpu.memory_space<vmem>>, vector<512x32xbf16>
    tpu.vector_store %arg5[%c0_14, %c0_15], %46 {strides = array<i32>} : memref<512x32xbf16, #tpu.memory_space<vmem>>, vector<512x32xbf16>,
    return
  }
  func.func @transform_0(%arg0: i32) -> (i32, i32) {
    %c0_i32 = arith.constant 0 : i32
    %c0_i32_0 = arith.constant 0 : i32
    %c0_i32_1 = arith.constant 0 : i32
    return %c0_i32, %c0_i32_0 : i32, i32
  }
  func.func @transform_1(%arg0: i32) -> (i32, i32) {
    %c0_i32 = arith.constant 0 : i32
    %c0_i32_0 = arith.constant 0 : i32
    %c0_i32_1 = arith.constant 0 : i32
    return %c0_i32, %c0_i32_0 : i32, i32
  }
  func.func @transform_2(%arg0: i32) -> (i32, i32) {
    %c0_i32 = arith.constant 0 : i32
    %c0_i32_0 = arith.constant 0 : i32
    %c0_i32_1 = arith.constant 0 : i32
    return %c0_i32, %c0_i32_0 : i32, i32
  }
  func.func @transform_3(%arg0: i32) -> (i32, i32) {
    %c0_i32 = arith.constant 0 : i32
    %c0_i32_0 = arith.constant 0 : i32
    %c0_i32_1 = arith.constant 0 : i32
    return %c0_i32, %c0_i32_0 : i32, i32
  }
  func.func @transform_4(%arg0: i32) -> (i32, i32) {
    %c0_i32 = arith.constant 0 : i32
    %c0_i32_0 = arith.constant 0 : i32
    %c0_i32_1 = arith.constant 0 : i32
    return %c0_i32, %c0_i32_0 : i32, i32
  }
}

module attributes {stable_mosaic.version = 11 : i64} {
  func.func @_fused_tanh_layer_kernel(%arg0: i32, %arg1: memref<2048x72xbf16, #tpu.memory_space<vmem>>, %arg2: memref<72x12xbf16, #tpu.memory_space<vmem>>, %arg3: memref<2048x12xf32, #tpu.memory_space<vmem>>) attributes {dimension_semantics = [#tpu.dimension_semantics<arbitrary>], iteration_bounds = array<i64: 1>, scalar_prefetch = 0 : i64, scratch_operands = 0 : i64, tpu.core_type = #tpu.core_type<tc>, window_params = [{pipeline_mode = #tpu.pipeline_mode<synchronous>, transform_indices = @transform_0, window_bounds = array<i64: 2048, 72>}, {pipeline_mode = #tpu.pipeline_mode<synchronous>, transform_indices = @transform_1, window_bounds = array<i64: 72, 12>}, {pipeline_mode = #tpu.pipeline_mode<synchronous>, transform_indices = @transform_2, window_bounds = array<i64: 2048, 12>}]} {
    %c0 = arith.constant 0 : index
    %c0_0 = arith.constant 0 : index
    %0 = vector.load %arg1[%c0, %c0_0] : memref<2048x72xbf16, #tpu.memory_space<vmem>>, vector<2048x72xbf16>
    %c0_1 = arith.constant 0 : index
    %c0_2 = arith.constant 0 : index
    %1 = vector.load %arg2[%c0_1, %c0_2] : memref<72x12xbf16, #tpu.memory_space<vmem>>, vector<72x12xbf16>
    %cst = arith.constant dense<0.000000e+00> : vector<2048x12xf32>
    %2 = tpu.matmul %0, %1, %cst {dimension_numbers = #tpu.dot_dimension_numbers<[1], [0], [0], [1], [0, 0, 1, 1], [], []>} : vector<2048x72xbf16>, vector<72x12xbf16>, vector<2048x12xf32> -> vector<2048x12xf32>
    %3 = math.tanh %2 : vector<2048x12xf32>
    %c0_3 = arith.constant 0 : index
    %c0_4 = arith.constant 0 : index
    %4 = vector.load %arg3[%c0_3, %c0_4] : memref<2048x12xf32, #tpu.memory_space<vmem>>, vector<2048x12xf32>
    tpu.vector_store %arg3[%c0_3, %c0_4], %3 {strides = array<i32>} : memref<2048x12xf32, #tpu.memory_space<vmem>>, vector<2048x12xf32>,
    return
  }
  func.func @transform_0(%arg0: i32) -> (i32, i32) {
    %c0_i32 = arith.constant 0 : i32
    %c0_i32_0 = arith.constant 0 : i32
    %c0_i32_1 = arith.constant 0 : i32
    return %c0_i32, %c0_i32_0 : i32, i32
  }
  func.func @transform_1(%arg0: i32) -> (i32, i32) {
    %c0_i32 = arith.constant 0 : i32
    %c0_i32_0 = arith.constant 0 : i32
    %c0_i32_1 = arith.constant 0 : i32
    return %c0_i32, %c0_i32_0 : i32, i32
  }
  func.func @transform_2(%arg0: i32) -> (i32, i32) {
    %c0_i32 = arith.constant 0 : i32
    %c0_i32_0 = arith.constant 0 : i32
    %c0_i32_1 = arith.constant 0 : i32
    return %c0_i32, %c0_i32_0 : i32, i32
  }
}

</mosaic_0001>

<bundles_post_ra>
// kernel: generator_forward.5
= control target key start
LH: loop header
LB: loop body
LE: loop exit
PB: predicated region body
PF: predicated region fallthrough
CT: control target
= control target key end

     0   :  { %9 = vsyncpa [#allocation3], 0  ;;  %s818_s0 = inlined_call_operand.vmem [shape: bf16[8,16], index: 0, kind: input, shape index: {}]   ;;  %s819_s1 = inlined_call_operand.vmem [shape: bf16[16,1024], index: 1, kind: input, shape index: {}]   ;;  %s820_s2 = inlined_call_operand.hbm [shape: f32[1,64], index: 2, kind: input, shape index: {}]   ;;  %s821_s3 = inlined_call_operand.hbm [shape: f32[1,64], index: 3, kind: input, shape index: {}]   ;;  %s822_s4 = inlined_call_operand.vmem [shape: bf16[8,1024], index: 4, kind: output, shape index: {}]  }
   0x1   :  { %10 = vsyncpa [#allocation5], 0  ;;  %s636_s15 = smov [#allocation2]   ;;  %s637_s17 = smov [#allocation4]  }
   0x2   :  { %s21_s16 = sshll.u32 %s636_s15, 4  ;;  %s31_s18 = sshll.u32 %s637_s17, 4  ;;  %s22_s16 = int_to_ptr.vmem [resolvable:$true] %s21_s16  ;;  %s32_s18 = int_to_ptr.vmem [resolvable:$true] %s31_s18 }
   0x3   :  { %s588_s21 = scalar_lea.hbm %s820_s2, 16 }
   0x4   :  { %p589_p0 = scmp.ne.s32.totalorder %s820_s2, %s588_s21  ;;  %p592_p1 = scmp.lt.u32.totalorder %s588_s21, %s820_s2 }
   0x6   :  { %p594_p2 = pnand %p592_p1, %p589_p0 }
   0x8   :  { %597 = shalt.err (!%p594_p2)
}
   0x9   :  { %s598_s26 = scalar_lea.vmem %s22_s16, 16  ;;  %s602_s27 = scalar_lea.vmem %s22_s16, 32 }
   0xa   :  { %p599_p3 = scmp.ne.s32.totalorder %s22_s16, %s598_s26  ;;  %p603_p4 = scmp.lt.s32.totalorder %s22_s16, %s22_s16 }
   0xb   :  { %p604_p5 = scmp.lt.s32.totalorder %s602_s27, %s598_s26 }
   0xd   :  { %p605_p6 = por %p604_p5, %p603_p4 }
   0xf   :  { %p606_p7 = pnand %p605_p6, %p599_p3 }
  0x11   :  { %609 = shalt.err (!%p606_p7)
}
  0x12   :  { %24 = dma.hbm_to_vmem [thread:$0]  %s820_s2, 16, %s22_s16, [#allocation3]  }
  0x13   :  { %s610_s6 = scalar_lea.hbm %s821_s3, 16 }
  0x14   :  { %p611_p8 = scmp.ne.s32.totalorder %s821_s3, %s610_s6  ;;  %p614_p9 = scmp.lt.u32.totalorder %s610_s6, %s821_s3 }
  0x16   :  { %p616_p10 = pnand %p614_p9, %p611_p8 }
  0x18   :  { %619 = shalt.err (!%p616_p10)
}
  0x19   :  { %s620_s11 = scalar_lea.vmem %s32_s18, 16  ;;  %s624_s12 = scalar_lea.vmem %s32_s18, 32 }
  0x1a   :  { %p621_p11 = scmp.ne.s32.totalorder %s32_s18, %s620_s11  ;;  %p625_p12 = scmp.lt.s32.totalorder %s32_s18, %s32_s18 }
  0x1b   :  { %p626_p13 = scmp.lt.s32.totalorder %s624_s12, %s620_s11 }
  0x1d   :  { %p627_p0 = por %p626_p13, %p625_p12 }
  0x1f   :  { %p628_p1 = pnand %p627_p0, %p621_p11 }
  0x21   :  { %631 = shalt.err (!%p628_p1)
}
  0x22   :  { %34 = dma.hbm_to_vmem [thread:$0]  %s821_s3, 16, %s32_s18, [#allocation5]  }
  0x23   :  { %632 = dma.done.wait [#allocation3], 16  }
  0x24   :  { %633 = vsyncadd [#allocation3], 4294967280 }
  0x25   :  { %634 = dma.done.wait [#allocation5], 16  }
  0x26   :  { %635 = vsyncadd [#allocation5], 4294967280  ;;  %v638_v0 = vmov 0   ;;  %v43_v1 = vld [vmem:[%s819_s1] sm:$0xff]  ;;  %v44_v3 = vld [vmem:[%s819_s1 + $0x8] sm:$0xff]  ;;  %vm91_vm0 = vcmask 130048  }
  0x27   :  { %127 = vmatprep.mubr.bf16.mxu0 %v638_v0  ;;  %168 = vmatprep.mubr.bf16.mxu1 %v638_v0  ;;  %v47_v2 = vld [vmem:[%s819_s1 + $0x20] sm:$0xff]  ;;  %v48_v6 = vld [vmem:[%s819_s1 + $0x28] sm:$0xff]  ;;  %v45_v7 = vld [vmem:[%s819_s1 + $0x10] sm:$0xff]  ;;  %vm477_vm1 = vcmask 523264  }
  0x28   :  { %v563_v4 = vcombine.high %v43_v1, %v47_v2  ;;  %v562_v5 = vcombine.low %v43_v1, %v47_v2  ;;  %v565_v8 = vcombine.high %v44_v3, %v48_v6  ;;  %v564_v9 = vcombine.low %v44_v3, %v48_v6  ;;  %v49_v10 = vld [vmem:[%s819_s1 + $0x30] sm:$0xff]  ;;  %v46_v11 = vld [vmem:[%s819_s1 + $0x18] sm:$0xff]  ;;  %v42_v15 = vld [vmem:[%s818_s0] sm:$0xf]  ;;  %s639_s0 = smov 64  }
  0x29   :  { %v50_v12 = vld [vmem:[%s819_s1 + $0x38] sm:$0xff]  ;;  %v567_v13 = vcombine.high %v45_v7, %v49_v10  ;;  %v566_v16 = vcombine.low %v45_v7, %v49_v10 }
  0x2a   :  { %95 = vmatprep.subr.bf16.mxu0 %v563_v4  ;;  %v569_v14 = vcombine.high %v46_v11, %v50_v12  ;;  %136 = vmatprep.subr.bf16.mxu1 %v565_v8  ;;  %v568_v17 = vcombine.low %v46_v11, %v50_v12 }
  0x2b   :  { %96 = vmatpush1.bf16.msra.mxu0 %v562_v5  ;;  %137 = vmatpush1.bf16.msra.mxu1 %v564_v9 }
  0x2c   :  { %177 = vmatprep.subr.bf16.mxu0 %v567_v13  ;;  %218 = vmatprep.subr.bf16.mxu1 %v569_v14 }
  0x2e   :  { %570 = vmatmul.mubr.msk.bf16.vlgmr.msra.gmra.mrb[0].mxu0 %vm91_vm0, %v42_v15  ;;  %571 = vmatmul.mubr.msk.bf16.vlgmr.msra.gmra.mrb[0].mxu1 %vm91_vm0, %v42_v15 }
  0x2f   :  { %178 = vmatpush1.bf16.msra.mxu0 %v566_v16  ;;  %209 = vmatprep.mubr.bf16.mxu0 %v638_v0 }
  0x30   :  { %219 = vmatpush1.bf16.msra.mxu1 %v568_v17  ;;  %250 = vmatprep.mubr.bf16.mxu1 %v638_v0 }
  0x36   :  { %572 = vmatmul.mubr.msk.bf16.vlgmr.msra.gmra.mrb[4].mxu0 %vm91_vm0, %v42_v15  ;;  %573 = vmatmul.mubr.msk.bf16.vlgmr.msra.gmra.mrb[4].mxu1 %vm91_vm0, %v42_v15 }
 0x101   :  { %v716_v18 = vpop.f32.mrb[0].mxu0  ;;  %v723_v22 = vpop.f32.mrb[0].mxu1 }
 0x102   :  { %v259_v19 = vrot.slane %v716_v18, 4  ;;  %v307_v20 = vmul.f32 %v716_v18, %v716_v18  ;;  %v721_v21 = vpop.f32.mrb[1].mxu0  ;;  %v271_v26 = vrot.slane %v723_v22, 4  ;;  %v309_v27 = vmul.f32 %v723_v22, %v723_v22  ;;  %v731_v28 = vpop.f32.mrb[1].mxu1 }
 0x103   :  { %v265_v23 = vrot.slane %v721_v21, 4  ;;  %v308_v24 = vmul.f32 %v721_v21, %v721_v21  ;;  %v133_v25 = vpop.f32.mrb[2].mxu0  ;;  %v277_v31 = vrot.slane %v731_v28, 4  ;;  %v310_v32 = vmul.f32 %v731_v28, %v731_v28  ;;  %v174_v33 = vpop.f32.mrb[2].mxu1 }
 0x104   :  { %v315_v29 = vrot.slane %v307_v20, 4  ;;  %v134_v30 = vpop.f32.mrb[3].mxu0  ;;  %v260_v34 = vadd.f32 %v259_v19, %v716_v18  ;;  %v272_v36 = vadd.f32 %v271_v26, %v723_v22  ;;  %v327_v37 = vrot.slane %v309_v27, 4  ;;  %v175_v38 = vpop.f32.mrb[3].mxu1 }
 0x105   :  { %v321_v35 = vrot.slane %v308_v24, 4  ;;  %v266_v39 = vadd.f32 %v265_v23, %v721_v21  ;;  %v278_v41 = vadd.f32 %v277_v31, %v731_v28  ;;  %v333_v47 = vrot.slane %v310_v32, 4 }
 0x106   :  { %v316_v40 = vadd.f32 %v315_v29, %v307_v20  ;;  %v261_v42 = vrot.slane %v260_v34, 2  ;;  %v273_v44 = vrot.slane %v272_v36, 2  ;;  %v328_v46 = vadd.f32 %v327_v37, %v309_v27 }
 0x107   :  { %v322_v43 = vadd.f32 %v321_v35, %v308_v24  ;;  %v267_v45 = vrot.slane %v266_v39, 2  ;;  %v279_v50 = vrot.slane %v278_v41, 2  ;;  %v334_v9 = vadd.f32 %v333_v47, %v310_v32 }
 0x108   :  { %v262_v48 = vadd.f32 %v261_v42, %v260_v34  ;;  %v317_v49 = vrot.slane %v316_v40, 2  ;;  %v274_v54 = vadd.f32 %v273_v44, %v272_v36  ;;  %v329_v12 = vrot.slane %v328_v46, 2 }
 0x109   :  { %v740_v51 = vpop.f32.mrb[4].mxu0  ;;  %v268_v52 = vadd.f32 %v267_v45, %v266_v39  ;;  %v323_v53 = vrot.slane %v322_v43, 2  ;;  %v747_v60 = vpop.f32.mrb[4].mxu1  ;;  %v280_v30 = vadd.f32 %v279_v50, %v278_v41  ;;  %v335_v31 = vrot.slane %v334_v9, 2 }
 0x10a   :  { %v283_v55 = vrot.slane %v740_v51, 4  ;;  %v311_v56 = vmul.f32 %v740_v51, %v740_v51  ;;  %v745_v57 = vpop.f32.mrb[5].mxu0  ;;  %v263_v58 = vrot.slane %v262_v48, 1  ;;  %v318_v59 = vadd.f32 %v317_v49, %v316_v40  ;;  %v752_v2 = vpop.f32.mrb[5].mxu1 }
 0x10b   :  { %v289_v61 = vrot.slane %v745_v57, 4  ;;  %v312_v62 = vmul.f32 %v745_v57, %v745_v57  ;;  %v269_v63 = vrot.slane %v268_v52, 1  ;;  %v215_v0 = vpop.f32.mrb[6].mxu0  ;;  %v324_v1 = vadd.f32 %v323_v53, %v322_v43  ;;  %v256_v8 = vpop.f32.mrb[6].mxu1 }
 0x10c   :  { %v284_v3 = vadd.f32 %v283_v55, %v740_v51  ;;  %v339_v4 = vrot.slane %v311_v56, 4  ;;  %v755_v5 = vadd.f32 %v263_v58, %v262_v48  ;;  %v319_v6 = vrot.slane %v318_v59, 1  ;;  %v216_v7 = vpop.f32.mrb[7].mxu0  ;;  %v257_v13 = vpop.f32.mrb[7].mxu1 }
 0x10d   :  { %v757_v10 = vadd.f32 %v269_v63, %v268_v52  ;;  %v325_v11 = vrot.slane %v324_v1, 1  ;;  %v290_v14 = vadd.f32 %v289_v61, %v745_v57  ;;  %v345_v15 = vrot.slane %v312_v62, 4 }
 0x10e   :  { %364 = vrot.lane.b32.xlu0 %v755_v5, %s639_s0  ;;  %v295_v16 = vrot.slane %v747_v60, 4  ;;  %v285_v17 = vrot.slane %v284_v3, 2  ;;  %v340_v19 = vadd.f32 %v339_v4, %v311_v56  ;;  %v313_v20 = vmul.f32 %v747_v60, %v747_v60 }
 0x10f   :  { %376 = vrot.lane.b32.xlu1 %v757_v10, %s639_s0  ;;  %v767_v23 = vadd.f32 %v319_v6, %v318_v59  ;;  %v769_v24 = vadd.f32 %v325_v11, %v324_v1  ;;  %v314_v25 = vmul.f32 %v752_v2, %v752_v2  ;;  %v275_v26 = vrot.slane %v274_v54, 1 }
 0x110   :  { %v351_v27 = vrot.slane %v313_v20, 4  ;;  %v330_v29 = vadd.f32 %v329_v12, %v328_v46  ;;  %v291_v32 = vrot.slane %v290_v14, 2  ;;  %v346_v33 = vadd.f32 %v345_v15, %v312_v62 }
 0x111   :  { %v296_v34 = vadd.f32 %v295_v16, %v747_v60  ;;  %v301_v35 = vrot.slane %v752_v2, 4  ;;  %v357_v36 = vrot.slane %v314_v25, 4  ;;  %v336_v38 = vadd.f32 %v335_v31, %v334_v9 }
 0x112   :  { %369 = vrot.lane.b32.xlu0 %v767_v23, %s639_s0  ;;  %v331_v37 = vrot.slane %v330_v29, 1  ;;  %v276_v39 = vadd.f32 %v275_v26, %v274_v54  ;;  %v281_v40 = vrot.slane %v280_v30, 1  ;;  %v286_v42 = vadd.f32 %v285_v17, %v284_v3 }
 0x113   :  { %381 = vrot.lane.b32.xlu1 %v769_v24, %s639_s0  ;;  %v341_v41 = vrot.slane %v340_v19, 2  ;;  %v352_v43 = vadd.f32 %v351_v27, %v313_v20  ;;  %v337_v45 = vrot.slane %v336_v38, 1  ;;  %v347_v47 = vrot.slane %v346_v33, 2 }
 0x114   :  { %v332_v44 = vadd.f32 %v331_v37, %v330_v29  ;;  %v297_v48 = vrot.slane %v296_v34, 2  ;;  %v302_v49 = vadd.f32 %v301_v35, %v752_v2  ;;  %v358_v50 = vadd.f32 %v357_v36, %v314_v25 }
 0x115   :  { %v342_v46 = vadd.f32 %v341_v41, %v340_v19  ;;  %v282_v52 = vadd.f32 %v281_v40, %v280_v30  ;;  %v287_v53 = vrot.slane %v286_v42, 1  ;;  %v292_v55 = vadd.f32 %v291_v32, %v290_v14 }
 0x116   :  { %388 = vrot.lane.b32.xlu0 %v276_v39, %s639_s0  ;;  %v338_v54 = vadd.f32 %v337_v45, %v336_v38  ;;  %v348_v58 = vadd.f32 %v347_v47, %v346_v33  ;;  %v353_v59 = vrot.slane %v352_v43, 2  ;;  %v303_v61 = vrot.slane %v302_v49, 2 }
 0x117   :  { %393 = vrot.lane.b32.xlu1 %v332_v44, %s639_s0  ;;  %v343_v56 = vrot.slane %v342_v46, 1  ;;  %v288_v62 = vadd.f32 %v287_v53, %v286_v42  ;;  %v293_v63 = vrot.slane %v292_v55, 1  ;;  %v298_v0 = vadd.f32 %v297_v48, %v296_v34 }
 0x118   :  { %v349_v3 = vrot.slane %v348_v58, 1  ;;  %v354_v4 = vadd.f32 %v353_v59, %v352_v43  ;;  %v359_v6 = vrot.slane %v358_v50, 2  ;;  %v304_v9 = vadd.f32 %v303_v61, %v302_v49 }
 0x119   :  { %v344_v1 = vadd.f32 %v343_v56, %v342_v46  ;;  %v294_v7 = vadd.f32 %v293_v63, %v292_v55  ;;  %v299_v8 = vrot.slane %v298_v0, 1 }
 0x11a   :  { %400 = vrot.lane.b32.xlu0 %v282_v52, %s639_s0  ;;  %v350_v11 = vadd.f32 %v349_v3, %v348_v58  ;;  %v355_v12 = vrot.slane %v354_v4, 1  ;;  %v360_v13 = vadd.f32 %v359_v6, %v358_v50  ;;  %v305_v15 = vrot.slane %v304_v9, 1 }
 0x11b   :  { %405 = vrot.lane.b32.xlu1 %v338_v54, %s639_s0  ;;  %v300_v14 = vadd.f32 %v299_v8, %v298_v0 }
 0x11c   :  { %v356_v16 = vadd.f32 %v355_v12, %v354_v4  ;;  %v361_v17 = vrot.slane %v360_v13, 1  ;;  %v306_v19 = vadd.f32 %v305_v15, %v304_v9 }
 0x11e   :  { %412 = vrot.lane.b32.xlu0 %v288_v62, %s639_s0  ;;  %v362_v20 = vadd.f32 %v361_v17, %v360_v13 }
 0x11f   :  { %417 = vrot.lane.b32.xlu1 %v344_v1, %s639_s0 }
 0x122   :  { %424 = vrot.lane.b32.xlu0 %v294_v7, %s639_s0 }
 0x123   :  { %429 = vrot.lane.b32.xlu1 %v350_v11, %s639_s0 }
 0x126   :  { %436 = vrot.lane.b32.xlu0 %v300_v14, %s639_s0 }
 0x127   :  { %441 = vrot.lane.b32.xlu1 %v356_v16, %s639_s0 }
 0x12a   :  { %448 = vrot.lane.b32.xlu0 %v306_v19, %s639_s0 }
 0x12b   :  { %453 = vrot.lane.b32.xlu1 %v362_v20, %s639_s0 }
 0x180   :  { %v365_v25 = vpop.permute.xlu0 %364 }
 0x181   :  { %v367_v26 = vadd.f32 %v365_v25, %v755_v5  ;;  %v377_v27 = vpop.permute.xlu1 %376 }
 0x183   :  { %v373_v29 = vadd.f32 %v367_v26, %v757_v10  ;;  %v462_v26 = vld [vmem:[#allocation2] sm:$0x1] }
 0x184   :  { %v370_v30 = vpop.permute.xlu0 %369 }
 0x185   :  { %v379_v31 = vadd.f32 %v377_v27, %v373_v29  ;;  %v372_v32 = vadd.f32 %v370_v30, %v767_v23  ;;  %v382_v33 = vpop.permute.xlu1 %381 }
 0x187   :  { %v374_v34 = vadd.f32 %v372_v32, %v769_v24  ;;  %v385_v35 = vadd.f32 %v379_v31, %v276_v39 }
 0x188   :  { %v389_v36 = vpop.permute.xlu0 %388 }
 0x189   :  { %v384_v37 = vadd.f32 %v382_v33, %v374_v34  ;;  %v391_v38 = vadd.f32 %v389_v36, %v385_v35  ;;  %v394_v40 = vpop.permute.xlu1 %393 }
 0x18b   :  { %v386_v42 = vadd.f32 %v384_v37, %v332_v44  ;;  %v397_v41 = vadd.f32 %v391_v38, %v282_v52 }
 0x18c   :  { %v401_v43 = vpop.permute.xlu0 %400 }
 0x18d   :  { %v396_v45 = vadd.f32 %v394_v40, %v386_v42  ;;  %v403_v5 = vadd.f32 %v401_v43, %v397_v41  ;;  %v406_v46 = vpop.permute.xlu1 %405 }
 0x18f   :  { %v398_v47 = vadd.f32 %v396_v45, %v338_v54  ;;  %v409_v10 = vadd.f32 %v403_v5, %v288_v62 }
 0x190   :  { %v413_v48 = vpop.permute.xlu0 %412 }
 0x191   :  { %v408_v49 = vadd.f32 %v406_v46, %v398_v47  ;;  %v415_v50 = vadd.f32 %v413_v48, %v409_v10  ;;  %v418_v23 = vpop.permute.xlu1 %417 }
 0x193   :  { %v410_v53 = vadd.f32 %v408_v49, %v344_v1  ;;  %v421_v55 = vadd.f32 %v415_v50, %v294_v7 }
 0x194   :  { %v425_v24 = vpop.permute.xlu0 %424 }
 0x195   :  { %v420_v39 = vadd.f32 %v418_v23, %v410_v53  ;;  %v427_v56 = vadd.f32 %v425_v24, %v421_v55  ;;  %v430_v58 = vpop.permute.xlu1 %429 }
 0x197   :  { %v422_v59 = vadd.f32 %v420_v39, %v350_v11  ;;  %v433_v61 = vadd.f32 %v427_v56, %v300_v14  ;;  %v470_v11 = vlaneseq }
 0x198   :  { %v437_v44 = vpop.permute.xlu0 %436 }
 0x199   :  { %v432_v52 = vadd.f32 %v430_v58, %v422_v59  ;;  %v439_v63 = vadd.f32 %v437_v44, %v433_v61  ;;  %v442_v0 = vpop.permute.xlu1 %441  ;;  %v471_v14 = vshrl.u32 %v470_v11, 7 }
 0x19b   :  { %v434_v3 = vadd.f32 %v432_v52, %v356_v16  ;;  %v445_v4 = vadd.f32 %v439_v63, %v306_v19  ;;  %v472_v27 = vsub.s32 0, %v471_v14  ;;  %v466_v19 = vld [vmem:[#allocation4] sm:$0x1] }
 0x19c   :  { %v449_v54 = vpop.permute.xlu0 %448 }
 0x19d   :  { %v444_v62 = vadd.f32 %v442_v0, %v434_v3  ;;  %v451_v6 = vadd.f32 %v449_v54, %v445_v4  ;;  %v454_v12 = vpop.permute.xlu1 %453 }
 0x19f   :  { %v457_v8 = vmul.f32 0.03125, %v451_v6  ;;  %v446_v9 = vadd.f32 %v444_v62, %v362_v20 }
 0x1a1   :  { %v456_v1 = vadd.f32 %v454_v12, %v446_v9  ;;  %v459_v7 = vmul.f32 %v457_v8, %v457_v8 }
 0x1a3   :  { %v458_v13 = vmul.f32 0.03125, %v456_v1 }
 0x1a5   :  { %v460_v15 = vsub.f32 %v458_v13, %v459_v7 }
 0x1a7   :  { %v461_v17 = vmax.f32 %v460_v15, 0.0 }
 0x1a9   :  { %v463_v25 = vadd.f32 1e-05, %v461_v17 }
 0x1ab   :  { %586 = vrsqrt.f32 %v463_v25 }
 0x1b5   :  { %v587_v29 = vpop.eup %586 }
 0x1b6   :  { %v465_v16 = vmul.f32 %v587_v29, %v462_v26 }
 0x1b8   :  { %v473_v30 = vrot.slane %v465_v16, %v472_v27  ;;  %v467_v31 = vmul.f32 %v465_v16, %v457_v8 }
 0x1ba   :  { %474 = vrot.lane.b32.xlu0 %v473_v30, %s639_s0  ;;  %v468_v20 = vsub.f32 %v466_v19, %v467_v31 }
 0x1bc   :  { %v483_v32 = vrot.slane %v468_v20, %v472_v27 }
 0x1be   :  { %484 = vrot.lane.b32.xlu1 %v483_v32, %s639_s0 }
 0x22c   :  { %v475_v33 = vpop.permute.xlu0 %474 }
 0x22d   :  { %v478_v34 = vsel %vm477_vm1, %v465_v16, %v475_v33 }
 0x22e   :  { %v491_v35 = vrot.slane %v478_v34, %v472_v27 }
 0x230   :  { %v485_v36 = vpop.permute.xlu1 %484  ;;  %v492_v37 = vmul.f32 %v491_v35, %v716_v18  ;;  %v493_v40 = vmul.f32 %v491_v35, %v721_v21  ;;  %v494_v42 = vmul.f32 %v491_v35, %v723_v22  ;;  %v495_v41 = vmul.f32 %v491_v35, %v731_v28 }
 0x231   :  { %v487_v38 = vsel %vm477_vm1, %v468_v20, %v485_v36  ;;  %v496_v45 = vmul.f32 %v491_v35, %v740_v51  ;;  %v497_v5 = vmul.f32 %v491_v35, %v745_v57  ;;  %v498_v46 = vmul.f32 %v491_v35, %v747_v60 }
 0x232   :  { %v503_v43 = vrot.slane %v487_v38, %v472_v27  ;;  %v499_v47 = vmul.f32 %v491_v35, %v752_v2 }
 0x234   :  { %v504_v10 = vadd.f32 %v503_v43, %v492_v37  ;;  %v505_v48 = vadd.f32 %v503_v43, %v493_v40  ;;  %v506_v49 = vadd.f32 %v503_v43, %v494_v42  ;;  %v507_v18 = vadd.f32 %v503_v43, %v495_v41 }
 0x235   :  { %v508_v50 = vadd.f32 %v503_v43, %v496_v45  ;;  %v509_v23 = vadd.f32 %v503_v43, %v497_v5  ;;  %v510_v21 = vadd.f32 %v503_v43, %v498_v46  ;;  %v511_v53 = vadd.f32 %v503_v43, %v499_v47 }
 0x236   :  { %v512_v22 = vmax.f32 %v504_v10, 0.0  ;;  %v513_v55 = vmax.f32 %v505_v48, 0.0  ;;  %v514_v28 = vmax.f32 %v506_v49, 0.0  ;;  %v515_v24 = vmax.f32 %v507_v18, 0.0 }
 0x237   :  { %v516_v39 = vmax.f32 %v508_v50, 0.0  ;;  %v517_v51 = vmax.f32 %v509_v23, 0.0  ;;  %v518_v56 = vmax.f32 %v510_v21, 0.0  ;;  %v519_v57 = vmax.f32 %v511_v53, 0.0 }
 0x238   :  { %v578_v58 = vpack.c.bf16 %v513_v55, %v512_v22  ;;  %v579_v60 = vpack.c.bf16 %v515_v24, %v514_v28 }
 0x239   :  { %v580_v59 = vpack.c.bf16 %v517_v51, %v516_v39  ;;  %v581_v2 = vpack.c.bf16 %v519_v57, %v518_v56 }
 0x23a   :  { %552 = vst [vmem:[%s822_s4] sm:$0xff] %v578_v58  ;;  %553 = vst [vmem:[%s822_s4 + $0x8] sm:$0xff] %v579_v60 }
 0x23b   :  { %554 = vst [vmem:[%s822_s4 + $0x10] sm:$0xff] %v580_v59  ;;  %555 = vst [vmem:[%s822_s4 + $0x18] sm:$0xff] %v581_v2 }
 0x23c   :  { %560 = vsyncpa [#allocation3], 1 }
 0x23d   :  { %561 = vsyncpa [#allocation5], 1 }

// kernel: generator_forward.6
= control target key start
LH: loop header
LB: loop body
LE: loop exit
PB: predicated region body
PF: predicated region fallthrough
CT: control target
= control target key end

     0   :  { %vm368_vm0 = vcmask 523264   ;;  %s860_s29 = smov 32   ;;  %vm596_vm1 = vcmask 261120   ;;  %vm599_vm2 = vcmask 785408   ;;  %s1076_s1 = inlined_call_operand.vmem [shape: bf16[576,128], index: 1, kind: input, shape index: {}]   ;;  %s1077_s0 = inlined_call_operand.vmem [shape: bf16[32,576], index: 0, kind: input, shape index: {}]   ;;  %s1078_s2 = inlined_call_operand.vmem [shape: f32[1,32], index: 2, kind: input, shape index: {}]   ;;  %s1079_s3 = inlined_call_operand.vmem [shape: f32[1,32], index: 3, kind: input, shape index: {}]   ;;  %s1080_s4 = inlined_call_operand.vmem [shape: bf16[32,128], index: 4, kind: output, shape index: {}]  }
   0x1   :  { %v806_v0 = vld [vmem:[%s1076_s1 + $0x40] sm:$0xff]   ;;  %v810_v4 = vld [vmem:[%s1076_s1 + $0x48] sm:$0xff]   ;;  %v814_v8 = vld [vmem:[%s1076_s1 + $0x50] sm:$0xff]  }
   0x2   :  { %v807_v1 = vld [vmem:[%s1076_s1 + $0xc0] sm:$0xff]   ;;  %729 = vmatprep.subr.bf16.mxu0 %v806_v0  ;;  %v811_v5 = vld [vmem:[%s1076_s1 + $0xc8] sm:$0xff]   ;;  %v815_v9 = vld [vmem:[%s1076_s1 + $0xd0] sm:$0xff]  }
   0x3   :  { %v808_v2 = vld [vmem:[%s1076_s1] sm:$0xff]   ;;  %757 = vmatprep.subr.bf16.mxu1 %v807_v1  ;;  %v812_v6 = vld [vmem:[%s1076_s1 + $0x8] sm:$0xff]   ;;  %v816_v10 = vld [vmem:[%s1076_s1 + $0x10] sm:$0xff]  }
   0x4   :  { %v809_v3 = vld [vmem:[%s1076_s1 + $0x80] sm:$0xff]   ;;  %730 = vmatpush3.bf16.msra.mxu0 %v808_v2  ;;  %v813_v7 = vld [vmem:[%s1076_s1 + $0x88] sm:$0xff]   ;;  %v817_v11 = vld [vmem:[%s1076_s1 + $0x90] sm:$0xff]  }
   0x5   :  { %758 = vmatpush3.bf16.msra.mxu1 %v809_v3  ;;  %731 = vmatprep.subr.bf16.mxu0 %v810_v4  ;;  %v818_v12 = vld [vmem:[%s1076_s1 + $0x58] sm:$0xff]   ;;  %v822_v16 = vld [vmem:[%s1076_s1 + $0x60] sm:$0xff]   ;;  %v826_v20 = vld [vmem:[%s1076_s1 + $0x68] sm:$0xff]  }
   0x6   :  { %759 = vmatprep.subr.bf16.mxu1 %v811_v5  ;;  %v819_v13 = vld [vmem:[%s1076_s1 + $0xd8] sm:$0xff]   ;;  %v823_v17 = vld [vmem:[%s1076_s1 + $0xe0] sm:$0xff]   ;;  %v827_v21 = vld [vmem:[%s1076_s1 + $0xe8] sm:$0xff]  }
   0x7   :  { %v820_v14 = vld [vmem:[%s1076_s1 + $0x18] sm:$0xff]   ;;  %v824_v18 = vld [vmem:[%s1076_s1 + $0x20] sm:$0xff]   ;;  %v828_v22 = vld [vmem:[%s1076_s1 + $0x28] sm:$0xff]  }
   0x8   :  { %732 = vmatpush3.bf16.msra.mxu0 %v812_v6  ;;  %v821_v15 = vld [vmem:[%s1076_s1 + $0x98] sm:$0xff]   ;;  %v825_v19 = vld [vmem:[%s1076_s1 + $0xa0] sm:$0xff]   ;;  %v829_v23 = vld [vmem:[%s1076_s1 + $0xa8] sm:$0xff]  }
   0x9   :  { %760 = vmatpush3.bf16.msra.mxu1 %v813_v7  ;;  %733 = vmatprep.subr.bf16.mxu0 %v814_v8  ;;  %v830_v24 = vld [vmem:[%s1076_s1 + $0x70] sm:$0xff]   ;;  %v834_v28 = vld [vmem:[%s1076_s1 + $0x78] sm:$0xff]   ;;  %v843_v35 = vld [vmem:[%s1077_s0 + $0xc] ss:$20 sps:$4 sm:$0xff]  }
   0xa   :  { %761 = vmatprep.subr.bf16.mxu1 %v815_v9  ;;  %v831_v25 = vld [vmem:[%s1076_s1 + $0xf0] sm:$0xff]   ;;  %v835_v29 = vld [vmem:[%s1076_s1 + $0xf8] sm:$0xff]   ;;  %v844_v36 = vld [vmem:[%s1076_s1 + $0x100] sm:$0xff]   ;;  %456 = vmatprep.mubr.bf16.mxu1 %v843_v35 }
   0xb   :  { %v832_v26 = vld [vmem:[%s1076_s1 + $0x30] sm:$0xff]   ;;  %v836_v30 = vld [vmem:[%s1076_s1 + $0x38] sm:$0xff]   ;;  %v845_v37 = vld [vmem:[%s1076_s1 + $0x108] sm:$0xff]  }
   0xc   :  { %734 = vmatpush3.bf16.msra.mxu0 %v816_v10  ;;  %v833_v27 = vld [vmem:[%s1076_s1 + $0xb0] sm:$0xff]   ;;  %v837_v31 = vld [vmem:[%s1076_s1 + $0xb8] sm:$0xff]   ;;  %v846_v38 = vld [vmem:[%s1077_s0 + $0x2c] ss:$20 sps:$4 sm:$0xff]  }
   0xd   :  { %762 = vmatpush3.bf16.msra.mxu1 %v817_v11  ;;  %735 = vmatprep.subr.bf16.mxu0 %v818_v12  ;;  %v838_v32 = vld [vmem:[%s1077_s0] ss:$20 sps:$4 sm:$0xff]   ;;  %v840_v33 = vld [vmem:[%s1077_s0 + $0x4] ss:$20 sps:$4 sm:$0xff]   ;;  %v841_v34 = vld [vmem:[%s1077_s0 + $0x8] ss:$20 sps:$4 sm:$0xff]  }
   0xe   :  { %763 = vmatprep.subr.bf16.mxu1 %v819_v13  ;;  %407 = vmatprep.mubr.bf16.mxu0 %v840_v33  ;;  %v848_v39 = vld [vmem:[%s1077_s0 + $0x34] ss:$20 sps:$4 sm:$0xff]   ;;  %v851_v42 = vld [vmem:[%s1077_s0 + $0x30] ss:$20 sps:$4 sm:$0xff]   ;;  %v853_v44 = vld [vmem:[%s1076_s1 + $0x118] sm:$0xff]  }
   0xf   :  { %v850_v40 = vld [vmem:[%s1077_s0 + $0x28] ss:$20 sps:$4 sm:$0xff]   ;;  %v852_v41 = vld [vmem:[%s1076_s1 + $0x110] sm:$0xff]   ;;  %v855_v45 = vld [vmem:[%s1077_s0 + $0x38] ss:$20 sps:$4 sm:$0xff]   ;;  %s859_s1 = smov 96  }
  0x10   :  { %736 = vmatpush3.bf16.msra.mxu0 %v820_v14  ;;  %v854_v43 = vld [vmem:[%s1077_s0 + $0x10] ss:$20 sps:$4 sm:$0xff]   ;;  %s858_s0 = smov 64  }
  0x11   :  { %764 = vmatpush3.bf16.msra.mxu1 %v821_v15  ;;  %737 = vmatprep.subr.bf16.mxu0 %v822_v16 }
  0x12   :  { %765 = vmatprep.subr.bf16.mxu1 %v823_v17 }
  0x14   :  { %738 = vmatpush3.bf16.msra.mxu0 %v824_v18 }
  0x15   :  { %766 = vmatpush3.bf16.msra.mxu1 %v825_v19  ;;  %739 = vmatprep.subr.bf16.mxu0 %v826_v20 }
  0x16   :  { %767 = vmatprep.subr.bf16.mxu1 %v827_v21 }
  0x18   :  { %740 = vmatpush3.bf16.msra.mxu0 %v828_v22 }
  0x19   :  { %768 = vmatpush3.bf16.msra.mxu1 %v829_v23  ;;  %741 = vmatprep.subr.bf16.mxu0 %v830_v24 }
  0x1a   :  { %769 = vmatprep.subr.bf16.mxu1 %v831_v25 }
  0x1c   :  { %742 = vmatpush3.bf16.msra.mxu0 %v832_v26 }
  0x1d   :  { %770 = vmatpush3.bf16.msra.mxu1 %v833_v27  ;;  %743 = vmatprep.subr.bf16.mxu0 %v834_v28 }
  0x1e   :  { %771 = vmatprep.subr.bf16.mxu1 %v835_v29 }
  0x20   :  { %744 = vmatpush3.bf16.msra.mxu0 %v836_v30 }
  0x21   :  { %772 = vmatpush3.bf16.msra.mxu1 %v837_v31  ;;  %791 = vmatprep.subr.bf16.mxu0 %v844_v36 }
  0x23   :  { %408 = vmatmul.mubr.bf16.vlgmr.msra.gmra.mrb[0].mxu0 %v838_v32 }
  0x24   :  { %457 = vmatmul.mubr.bf16.vlgmr.msra.gmra.mrb[0].mxu1 %v841_v34  ;;  %792 = vmatpush3.bf16.msra.mxu0 %v844_v36 }
  0x25   :  { %793 = vmatprep.subr.bf16.mxu0 %v845_v37  ;;  %415 = vmatprep.mubr.bf16.mxu0 %v846_v38 }
  0x26   :  { %464 = vmatprep.mubr.bf16.mxu1 %v848_v39 }
  0x28   :  { %794 = vmatpush3.bf16.msra.mxu0 %v845_v37 }
  0x29   :  { %795 = vmatprep.subr.bf16.mxu0 %v852_v41 }
  0x2b   :  { %416 = vmatmul.mubr.bf16.gmra.mrb[4].mxu0 %v850_v40 }
  0x2c   :  { %465 = vmatmul.mubr.bf16.gmra.mrb[4].mxu1 %v851_v42  ;;  %799 = vmatprep.mubr.msk.bf16.mxu0 %vm368_vm0, %v854_v43 }
  0x2d   :  { %796 = vmatpush3.bf16.msra.mxu0 %v852_v41 }
  0x2e   :  { %797 = vmatprep.subr.bf16.mxu0 %v853_v44 }
  0x31   :  { %798 = vmatpush3.bf16.msra.mxu0 %v853_v44 }
  0x34   :  { %800 = vmatmul.mubr.msk.bf16.vlgmr.msra.gmra.mrb[8].mxu0 %vm368_vm0, %v855_v45 }
  0xf6   :  { %v745_v46 = vpop.f32.mrb[0].mxu0 }
  0xf7   :  { %v773_v47 = vpop.f32.mrb[0].mxu1  ;;  %v746_v48 = vpop.f32.mrb[1].mxu0 }
  0xf8   :  { %v747_v49 = vadd.f32 %v746_v48, %v745_v46  ;;  %v774_v50 = vpop.f32.mrb[1].mxu1  ;;  %v748_v51 = vpop.f32.mrb[2].mxu0 }
  0xf9   :  { %v775_v52 = vadd.f32 %v774_v50, %v773_v47  ;;  %v776_v53 = vpop.f32.mrb[2].mxu1  ;;  %v749_v54 = vpop.f32.mrb[3].mxu0 }
  0xfa   :  { %v750_v55 = vadd.f32 %v749_v54, %v748_v51  ;;  %v777_v56 = vpop.f32.mrb[3].mxu1 }
  0xfb   :  { %v778_v57 = vadd.f32 %v777_v56, %v776_v53  ;;  %v459_v58 = vadd.f32 %v775_v52, %v747_v49 }
  0xfd   :  { %v462_v59 = vadd.f32 %v778_v57, %v750_v55 }
  0xfe   :  { %v751_v60 = vpop.f32.mrb[4].mxu0 }
  0xff   :  { %v779_v61 = vpop.f32.mrb[4].mxu1  ;;  %v752_v62 = vpop.f32.mrb[5].mxu0 }
 0x100   :  { %v753_v63 = vadd.f32 %v752_v62, %v751_v60  ;;  %v780_v0 = vpop.f32.mrb[5].mxu1  ;;  %v754_v1 = vpop.f32.mrb[6].mxu0  ;;  %v575_v60 = vld [vmem:[%s1078_s2] sm:$0x1] }
 0x101   :  { %v781_v2 = vadd.f32 %v780_v0, %v779_v61  ;;  %v782_v3 = vpop.f32.mrb[6].mxu1  ;;  %v755_v4 = vpop.f32.mrb[7].mxu0  ;;  %v579_v0 = vld [vmem:[%s1079_s3] sm:$0x1] }
 0x102   :  { %v756_v5 = vadd.f32 %v755_v4, %v754_v1  ;;  %v783_v6 = vpop.f32.mrb[7].mxu1 }
 0x103   :  { %v784_v7 = vadd.f32 %v783_v6, %v782_v3  ;;  %v467_v8 = vadd.f32 %v781_v2, %v753_v63 }
 0x105   :  { %v470_v9 = vadd.f32 %v784_v7, %v756_v5 }
 0x107   :  { %v801_v10 = vpop.f32.mrb[8].mxu0 }
 0x108   :  { %v1026_v11 = vadd.f32 %v801_v10, %v467_v8  ;;  %v507_v12 = vpop.f32.mrb[9].mxu0 }
 0x109   :  { %v1028_v13 = vadd.f32 %v507_v12, %v459_v58  ;;  %v802_v14 = vpop.f32.mrb[10].mxu0  ;;  %v583_v58 = vlaneseq }
 0x10a   :  { %v1030_v15 = vadd.f32 %v802_v14, %v470_v9  ;;  %v510_v16 = vpop.f32.mrb[11].mxu0  ;;  %v533_v21 = vmul.f32 %v1026_v11, %v1026_v11 }
 0x10b   :  { %v1032_v17 = vadd.f32 %v510_v16, %v462_v59  ;;  %v531_v18 = vmul.f32 %v1028_v13, %v1028_v13  ;;  %v584_v59 = vshrl.u32 %v583_v58, 7 }
 0x10c   :  { %v534_v24 = vmul.f32 %v1030_v15, %v1030_v15 }
 0x10d   :  { %v522_v19 = vadd.f32 %v1032_v17, %v1028_v13  ;;  %v532_v20 = vmul.f32 %v1032_v17, %v1032_v17  ;;  %v585_v61 = vsub.s32 0, %v584_v59 }
 0x10f   :  { %v523_v22 = vadd.f32 %v522_v19, %v1026_v11  ;;  %v535_v23 = vadd.f32 %v532_v20, %v531_v18 }
 0x111   :  { %v524_v25 = vadd.f32 %v523_v22, %v1030_v15  ;;  %v536_v26 = vadd.f32 %v535_v23, %v533_v21 }
 0x113   :  { %v525_v27 = vrot.slane %v524_v25, 4  ;;  %v537_v28 = vadd.f32 %v536_v26, %v534_v24 }
 0x115   :  { %v526_v29 = vadd.f32 %v525_v27, %v524_v25  ;;  %v538_v30 = vrot.slane %v537_v28, 4 }
 0x117   :  { %v527_v31 = vrot.slane %v526_v29, 2  ;;  %v539_v32 = vadd.f32 %v538_v30, %v537_v28 }
 0x119   :  { %v528_v33 = vadd.f32 %v527_v31, %v526_v29  ;;  %v540_v34 = vrot.slane %v539_v32, 2 }
 0x11b   :  { %v529_v35 = vrot.slane %v528_v33, 1  ;;  %v541_v36 = vadd.f32 %v540_v34, %v539_v32 }
 0x11d   :  { %v530_v37 = vadd.f32 %v529_v35, %v528_v33  ;;  %v542_v38 = vrot.slane %v541_v36, 1 }
 0x11f   :  { %554 = vrot.lane.b32.xlu1 %v530_v37, %s858_s0  ;;  %545 = vrot.lane.b32.xlu0 %v530_v37, %s859_s1  ;;  %v543_v39 = vadd.f32 %v542_v38, %v541_v36 }
 0x123   :  { %558 = vrot.lane.b32.xlu1 %v543_v39, %s858_s0  ;;  %550 = vrot.lane.b32.xlu0 %v543_v39, %s859_s1 }
 0x127   :  { %566 = vrot.lane.b32.xlu1 %v543_v39, %s860_s29  ;;  %562 = vrot.lane.b32.xlu0 %v530_v37, %s860_s29 }
 0x191   :  { %v555_v40 = vpop.permute.xlu1 %554  ;;  %v546_v41 = vpop.permute.xlu0 %545 }
 0x192   :  { %v548_v42 = vadd.f32 %v546_v41, %v530_v37 }
 0x194   :  { %v557_v47 = vadd.f32 %v555_v40, %v548_v42 }
 0x195   :  { %v559_v43 = vpop.permute.xlu1 %558  ;;  %v551_v44 = vpop.permute.xlu0 %550 }
 0x196   :  { %v553_v45 = vadd.f32 %v551_v44, %v543_v39 }
 0x198   :  { %v561_v46 = vadd.f32 %v559_v43, %v553_v45 }
 0x199   :  { %v567_v48 = vpop.permute.xlu1 %566  ;;  %v563_v49 = vpop.permute.xlu0 %562 }
 0x19a   :  { %v569_v50 = vadd.f32 %v567_v48, %v561_v46  ;;  %v565_v51 = vadd.f32 %v563_v49, %v557_v47 }
 0x19c   :  { %v570_v52 = vmul.f32 0.0078125, %v565_v51  ;;  %v571_v53 = vmul.f32 0.0078125, %v569_v50 }
 0x19e   :  { %v572_v54 = vmul.f32 %v570_v52, %v570_v52 }
 0x1a0   :  { %v573_v55 = vsub.f32 %v571_v53, %v572_v54 }
 0x1a2   :  { %v574_v56 = vmax.f32 %v573_v55, 0.0 }
 0x1a4   :  { %v576_v57 = vadd.f32 1e-05, %v574_v56 }
 0x1a6   :  { %856 = vrsqrt.f32 %v576_v57 }
 0x1b0   :  { %v857_v62 = vpop.eup %856 }
 0x1b1   :  { %v578_v63 = vmul.f32 %v857_v62, %v575_v60 }
 0x1b3   :  { %v580_v1 = vmul.f32 %v578_v63, %v570_v52  ;;  %v586_v2 = vrot.slane %v578_v63, %v585_v61 }
 0x1b5   :  { %v581_v3 = vsub.f32 %v579_v0, %v580_v1  ;;  %590 = vrot.lane.b32.xlu1 %v586_v2, %s858_s0  ;;  %587 = vrot.lane.b32.xlu0 %v586_v2, %s860_s29 }
 0x1b7   :  { %v605_v4 = vrot.slane %v581_v3, %v585_v61 }
 0x1b9   :  { %593 = vrot.lane.b32.xlu0 %v586_v2, %s859_s1  ;;  %606 = vrot.lane.b32.xlu1 %v605_v4, %s860_s29 }
 0x1bd   :  { %609 = vrot.lane.b32.xlu0 %v605_v4, %s858_s0  ;;  %612 = vrot.lane.b32.xlu1 %v605_v4, %s859_s1 }
 0x227   :  { %v591_v5 = vpop.permute.xlu1 %590  ;;  %v588_v6 = vpop.permute.xlu0 %587 }
 0x228   :  { %v597_v7 = vsel %vm596_vm1, %v578_v63, %v588_v6 }
 0x229   :  { %v598_v8 = vsel %vm368_vm0, %v597_v7, %v591_v5 }
 0x22b   :  { %v594_v9 = vpop.permute.xlu0 %593  ;;  %v607_v10 = vpop.permute.xlu1 %606 }
 0x22c   :  { %v600_v12 = vsel %vm599_vm2, %v598_v8, %v594_v9  ;;  %v615_v16 = vsel %vm596_vm1, %v581_v3, %v607_v10 }
 0x22d   :  { %v621_v14 = vrot.slane %v600_v12, %v585_v61 }
 0x22f   :  { %v610_v18 = vpop.permute.xlu0 %609  ;;  %v613_v19 = vpop.permute.xlu1 %612  ;;  %v622_v21 = vmul.f32 %v621_v14, %v1028_v13  ;;  %v623_v23 = vmul.f32 %v621_v14, %v1032_v17  ;;  %v624_v24 = vmul.f32 %v621_v14, %v1026_v11  ;;  %v625_v25 = vmul.f32 %v621_v14, %v1030_v15 }
 0x230   :  { %v616_v20 = vsel %vm368_vm0, %v615_v16, %v610_v18 }
 0x231   :  { %v617_v22 = vsel %vm599_vm2, %v616_v20, %v613_v19 }
 0x232   :  { %v629_v26 = vrot.slane %v617_v22, %v585_v61 }
 0x234   :  { %v630_v27 = vadd.f32 %v629_v26, %v622_v21  ;;  %v631_v28 = vadd.f32 %v629_v26, %v623_v23  ;;  %v632_v29 = vadd.f32 %v629_v26, %v624_v24  ;;  %v633_v30 = vadd.f32 %v629_v26, %v625_v25 }
 0x236   :  { %v634_v31 = vmax.f32 %v630_v27, 0.0  ;;  %v635_v32 = vmax.f32 %v631_v28, 0.0  ;;  %v636_v33 = vmax.f32 %v632_v29, 0.0  ;;  %v637_v34 = vmax.f32 %v633_v30, 0.0 }
 0x238   :  { %v721_v35 = vpack.c.bf16 %v635_v32, %v634_v31  ;;  %v726_v36 = vpack.c.bf16 %v637_v34, %v636_v33 }
 0x23a   :  { %722 = vst [vmem:[%s1080_s4] sm:$0xff] %v721_v35   ;;  %728 = vst [vmem:[%s1080_s4 + $0x8] sm:$0xff] %v726_v36  }

// kernel: generator_forward.7
= control target key start
LH: loop header
LB: loop body
LE: loop exit
PB: predicated region body
PF: predicated region fallthrough
CT: control target
= control target key end

     0   :  { %vm314_vm0 = vcmask 261120   ;;  %vm533_vm1 = vcmask 523264   ;;  %s1090_s19 = smov 112   ;;  %s1091_s20 = smov 80   ;;  %vm676_vm2 = vcmask 130048   ;;  %vm679_vm3 = vcmask 392192   ;;  %s1468_s1 = inlined_call_operand.vmem [shape: bf16[288,64], index: 1, kind: input, shape index: {}]   ;;  %s1469_s0 = inlined_call_operand.vmem [shape: bf16[128,288], index: 0, kind: input, shape index: {}]   ;;  %s1470_s2 = inlined_call_operand.vmem [shape: f32[1,16], index: 2, kind: input, shape index: {}]   ;;  %s1471_s3 = inlined_call_operand.vmem [shape: f32[1,16], index: 3, kind: input, shape index: {}]   ;;  %s1472_s4 = inlined_call_operand.vmem [shape: bf16[128,64], index: 4, kind: output, shape index: {}]  }
   0x1   :  { %v1037_v0 = vld [vmem:[%s1468_s1 + $0x40] sm:$0xff]   ;;  %v1039_v2 = vld [vmem:[%s1468_s1 + $0x48] sm:$0xff]   ;;  %v1041_v4 = vld [vmem:[%s1468_s1 + $0x50] sm:$0xff]   ;;  %s1092_s25 = smov 32   ;;  %s1093_s26 = smov 16   ;;  %vm818_vm4 = vcmask 519168  }
   0x2   :  { %v1038_v1 = vld [vmem:[%s1468_s1] sm:$0xff]   ;;  %921 = vmatprep.subr.bf16.mxu0 %v1037_v0  ;;  %1015 = vmatprep.subr.bf16.mxu1 %v1037_v0  ;;  %v1040_v3 = vld [vmem:[%s1468_s1 + $0x8] sm:$0xff]   ;;  %v1042_v5 = vld [vmem:[%s1468_s1 + $0x10] sm:$0xff]   ;;  %s1094_s27 = smov 48  }
   0x3   :  { %922 = vmatpush3.bf16.msra.mxu0 %v1038_v1  ;;  %1023 = vmatpush3.bf16.msra.mxu1 %v1038_v1  ;;  %v1043_v6 = vld [vmem:[%s1468_s1 + $0x58] sm:$0xff]   ;;  %v1045_v8 = vld [vmem:[%s1468_s1 + $0x60] sm:$0xff]   ;;  %v1047_v10 = vld [vmem:[%s1468_s1 + $0x68] sm:$0xff]  }
   0x4   :  { %923 = vmatprep.subr.bf16.mxu0 %v1039_v2  ;;  %1016 = vmatprep.subr.bf16.mxu1 %v1039_v2  ;;  %v1044_v7 = vld [vmem:[%s1468_s1 + $0x18] sm:$0xff]   ;;  %v1046_v9 = vld [vmem:[%s1468_s1 + $0x20] sm:$0xff]   ;;  %v1048_v13 = vld [vmem:[%s1468_s1 + $0x28] sm:$0xff]  }
   0x5   :  { %v1055_v11 = vld [vmem:[%s1469_s0 + $0x4] ss:$12 sps:$4 sm:$0xff]   ;;  %v1058_v12 = vld [vmem:[%s1469_s0 + $0x94] ss:$12 sps:$4 sm:$0xff]   ;;  %v1051_v16 = vld [vmem:[%s1468_s1 + $0x78] sm:$0xff]  }
   0x6   :  { %v1049_v14 = vld [vmem:[%s1468_s1 + $0x70] sm:$0xff]   ;;  %371 = vmatprep.mubr.bf16.mxu0 %v1055_v11  ;;  %419 = vmatprep.mubr.bf16.mxu1 %v1058_v12  ;;  %v1052_v17 = vld [vmem:[%s1468_s1 + $0x38] sm:$0xff]   ;;  %v1053_v18 = vld [vmem:[%s1469_s0] ss:$12 sps:$4 sm:$0xff]  }
   0x7   :  { %924 = vmatpush3.bf16.msra.mxu0 %v1040_v3  ;;  %1024 = vmatpush3.bf16.msra.mxu1 %v1040_v3  ;;  %v1050_v15 = vld [vmem:[%s1468_s1 + $0x30] sm:$0xff]   ;;  %v1059_v19 = vld [vmem:[%s1468_s1 + $0x80] sm:$0xff]   ;;  %v1060_v21 = vld [vmem:[%s1469_s0 + $0x1c] ss:$12 sps:$4 sm:$0xff]  }
   0x8   :  { %925 = vmatprep.subr.bf16.mxu0 %v1041_v4  ;;  %1017 = vmatprep.subr.bf16.mxu1 %v1041_v4  ;;  %v1056_v20 = vld [vmem:[%s1469_s0 + $0x90] ss:$12 sps:$4 sm:$0xff]   ;;  %v1062_v22 = vld [vmem:[%s1469_s0 + $0xac] ss:$12 sps:$4 sm:$0xff]   ;;  %v1065_v25 = vld [vmem:[%s1469_s0 + $0xa8] ss:$12 sps:$4 sm:$0xff]  }
   0x9   :  { %v1066_v23 = vld [vmem:[%s1468_s1 + $0x88] sm:$0xff]   ;;  %v1064_v24 = vld [vmem:[%s1469_s0 + $0x18] ss:$12 sps:$4 sm:$0xff]   ;;  %v1067_v26 = vld [vmem:[%s1469_s0 + $0x34] ss:$12 sps:$4 sm:$0xff]  }
   0xa   :  { %v1069_v27 = vld [vmem:[%s1469_s0 + $0x8] ss:$12 sps:$4 sm:$0xff]   ;;  %v1070_v28 = vld [vmem:[%s1469_s0 + $0x30] ss:$12 sps:$4 sm:$0xff]   ;;  %v1071_v29 = vld [vmem:[%s1469_s0 + $0x20] ss:$12 sps:$4 sm:$0xff]  }
   0xb   :  { %926 = vmatpush3.bf16.msra.mxu0 %v1042_v5  ;;  %1025 = vmatpush3.bf16.msra.mxu1 %v1042_v5  ;;  %v1072_v30 = vld [vmem:[%s1469_s0 + $0x4c] ss:$12 sps:$4 sm:$0xff]   ;;  %v1075_v32 = vld [vmem:[%s1469_s0 + $0x48] ss:$12 sps:$4 sm:$0xff]   ;;  %v1076_v33 = vld [vmem:[%s1469_s0 + $0x50] ss:$12 sps:$4 sm:$0xff]  }
   0xc   :  { %927 = vmatprep.subr.bf16.mxu0 %v1043_v6  ;;  %1018 = vmatprep.subr.bf16.mxu1 %v1043_v6  ;;  %v1074_v31 = vld [vmem:[%s1469_s0 + $0x38] ss:$12 sps:$4 sm:$0xff]   ;;  %v1079_v35 = vld [vmem:[%s1469_s0 + $0x68] ss:$12 sps:$4 sm:$0xff]   ;;  %v1080_v36 = vld [vmem:[%s1469_s0 + $0x60] ss:$12 sps:$4 sm:$0xff]  }
   0xd   :  { %v1077_v34 = vld [vmem:[%s1469_s0 + $0x64] ss:$12 sps:$4 sm:$0xff]   ;;  %v1081_v37 = vld [vmem:[%s1469_s0 + $0x80] ss:$12 sps:$4 sm:$0xff]   ;;  %v1082_v38 = vld [vmem:[%s1469_s0 + $0x7c] ss:$12 sps:$4 sm:$0xff]  }
   0xe   :  { %v1084_v39 = vld [vmem:[%s1469_s0 + $0x98] ss:$12 sps:$4 sm:$0xff]   ;;  %v1086_v41 = vld [vmem:[%s1469_s0 + $0xb0] ss:$12 sps:$4 sm:$0xff]  }
   0xf   :  { %928 = vmatpush3.bf16.msra.mxu0 %v1044_v7  ;;  %1026 = vmatpush3.bf16.msra.mxu1 %v1044_v7  ;;  %v1085_v40 = vld [vmem:[%s1469_s0 + $0x78] ss:$12 sps:$4 sm:$0xff]   ;;  %s1089_s0 = smov 96  }
  0x10   :  { %929 = vmatprep.subr.bf16.mxu0 %v1045_v8  ;;  %1019 = vmatprep.subr.bf16.mxu1 %v1045_v8 }
  0x13   :  { %930 = vmatpush3.bf16.msra.mxu0 %v1046_v9  ;;  %1027 = vmatpush3.bf16.msra.mxu1 %v1046_v9 }
  0x14   :  { %931 = vmatprep.subr.bf16.mxu0 %v1047_v10  ;;  %1020 = vmatprep.subr.bf16.mxu1 %v1047_v10 }
  0x17   :  { %932 = vmatpush3.bf16.msra.mxu0 %v1048_v13  ;;  %1028 = vmatpush3.bf16.msra.mxu1 %v1048_v13 }
  0x18   :  { %933 = vmatprep.subr.bf16.mxu0 %v1049_v14  ;;  %1021 = vmatprep.subr.bf16.mxu1 %v1049_v14 }
  0x1b   :  { %934 = vmatpush3.bf16.msra.mxu0 %v1050_v15  ;;  %1029 = vmatpush3.bf16.msra.mxu1 %v1050_v15 }
  0x1c   :  { %935 = vmatprep.subr.bf16.mxu0 %v1051_v16  ;;  %1022 = vmatprep.subr.bf16.mxu1 %v1051_v16 }
  0x1f   :  { %936 = vmatpush3.bf16.msra.mxu0 %v1052_v17  ;;  %1030 = vmatpush3.bf16.msra.mxu1 %v1052_v17 }
  0x20   :  { %995 = vmatprep.subr.bf16.mxu1 %v1059_v19 }
  0x22   :  { %372 = vmatmul.mubr.bf16.vlgmr.msra.gmra.mrb[0].mxu0 %v1053_v18  ;;  %420 = vmatmul.mubr.bf16.vlgmr.msra.gmra.mrb[0].mxu1 %v1056_v20 }
  0x23   :  { %996 = vmatpush3.bf16.msra.mxu1 %v1059_v19  ;;  %379 = vmatprep.mubr.bf16.mxu0 %v1060_v21 }
  0x24   :  { %427 = vmatprep.mubr.bf16.mxu1 %v1062_v22  ;;  %997 = vmatprep.subr.bf16.mxu1 %v1066_v23 }
  0x27   :  { %998 = vmatpush3.bf16.msra.mxu1 %v1066_v23 }
  0x2a   :  { %380 = vmatmul.mubr.bf16.gmra.mrb[4].mxu0 %v1064_v24  ;;  %428 = vmatmul.mubr.bf16.gmra.mrb[4].mxu1 %v1065_v25 }
  0x2b   :  { %387 = vmatprep.mubr.bf16.mxu0 %v1067_v26  ;;  %999 = vmatprep.mubr.msk.bf16.mxu1 %vm314_vm0, %v1069_v27 }
  0x32   :  { %388 = vmatmul.mubr.bf16.gmra.mrb[8].mxu0 %v1070_v28  ;;  %1000 = vmatmul.mubr.msk.bf16.vlgmr.msra.gmra.mrb[8].mxu1 %vm314_vm0, %v1071_v29 }
  0x33   :  { %395 = vmatprep.mubr.bf16.mxu0 %v1072_v30  ;;  %1003 = vmatprep.mubr.msk.bf16.mxu1 %vm314_vm0, %v1074_v31 }
  0x3a   :  { %396 = vmatmul.mubr.bf16.gmra.mrb[12].mxu0 %v1075_v32  ;;  %1004 = vmatmul.mubr.msk.bf16.gmra.mrb[12].mxu1 %vm314_vm0, %v1076_v33 }
  0x3b   :  { %403 = vmatprep.mubr.bf16.mxu0 %v1077_v34  ;;  %1007 = vmatprep.mubr.msk.bf16.mxu1 %vm314_vm0, %v1079_v35 }
  0x42   :  { %404 = vmatmul.mubr.bf16.gmra.mrb[16].mxu0 %v1080_v36  ;;  %1008 = vmatmul.mubr.msk.bf16.gmra.mrb[16].mxu1 %vm314_vm0, %v1081_v37 }
  0x43   :  { %411 = vmatprep.mubr.bf16.mxu0 %v1082_v38  ;;  %1011 = vmatprep.mubr.msk.bf16.mxu1 %vm314_vm0, %v1084_v39 }
  0x4a   :  { %412 = vmatmul.mubr.bf16.gmra.mrb[20].mxu0 %v1085_v40  ;;  %1012 = vmatmul.mubr.msk.bf16.gmra.mrb[20].mxu1 %vm314_vm0, %v1086_v41 }
  0xf5   :  { %v937_v42 = vpop.f32.mrb[0].mxu0  ;;  %v973_v43 = vpop.f32.mrb[0].mxu1 }
  0xf6   :  { %v938_v44 = vpop.f32.mrb[1].mxu0  ;;  %v974_v45 = vpop.f32.mrb[1].mxu1 }
  0xf7   :  { %v939_v46 = vadd.f32 %v938_v44, %v937_v42  ;;  %v940_v47 = vpop.f32.mrb[2].mxu0  ;;  %v1254_v48 = vadd.f32 %v974_v45, %v973_v43  ;;  %v976_v49 = vpop.f32.mrb[2].mxu1 }
  0xf8   :  { %v941_v50 = vpop.f32.mrb[3].mxu0  ;;  %v977_v51 = vpop.f32.mrb[3].mxu1 }
  0xf9   :  { %v942_v52 = vadd.f32 %v941_v50, %v940_v47  ;;  %v1256_v53 = vadd.f32 %v977_v51, %v976_v49 }
  0xfd   :  { %v943_v54 = vpop.f32.mrb[4].mxu0  ;;  %v979_v55 = vpop.f32.mrb[4].mxu1 }
  0xfe   :  { %v944_v56 = vpop.f32.mrb[5].mxu0  ;;  %v980_v57 = vpop.f32.mrb[5].mxu1 }
  0xff   :  { %v945_v58 = vadd.f32 %v944_v56, %v943_v54  ;;  %v946_v59 = vpop.f32.mrb[6].mxu0  ;;  %v1258_v60 = vadd.f32 %v980_v57, %v979_v55  ;;  %v982_v61 = vpop.f32.mrb[6].mxu1 }
 0x100   :  { %v947_v62 = vpop.f32.mrb[7].mxu0  ;;  %v983_v63 = vpop.f32.mrb[7].mxu1 }
 0x101   :  { %v948_v0 = vadd.f32 %v947_v62, %v946_v59  ;;  %v1260_v1 = vadd.f32 %v983_v63, %v982_v61 }
 0x105   :  { %v949_v2 = vpop.f32.mrb[8].mxu0  ;;  %v1001_v3 = vpop.f32.mrb[8].mxu1 }
 0x106   :  { %v1262_v4 = vadd.f32 %v1001_v3, %v945_v58  ;;  %v950_v5 = vpop.f32.mrb[9].mxu0  ;;  %v470_v6 = vpop.f32.mrb[9].mxu1 }
 0x107   :  { %v951_v7 = vadd.f32 %v950_v5, %v949_v2  ;;  %v1264_v8 = vadd.f32 %v939_v46, %v470_v6  ;;  %v952_v9 = vpop.f32.mrb[10].mxu0  ;;  %v1002_v10 = vpop.f32.mrb[10].mxu1 }
 0x108   :  { %v1266_v11 = vadd.f32 %v1002_v10, %v948_v0  ;;  %v953_v12 = vpop.f32.mrb[11].mxu0  ;;  %v473_v13 = vpop.f32.mrb[11].mxu1  ;;  %v573_v17 = vmul.f32 %v1262_v4, %v1262_v4  ;;  %v537_v23 = vsel %vm533_vm1, %v1262_v4, 0.0 }
 0x109   :  { %v571_v14 = vmul.f32 %v1264_v8, %v1264_v8  ;;  %v954_v15 = vadd.f32 %v953_v12, %v952_v9  ;;  %v1270_v16 = vadd.f32 %v942_v52, %v473_v13  ;;  %v534_v18 = vsel %vm533_vm1, %v1264_v8, 0.0 }
 0x10a   :  { %v574_v21 = vmul.f32 %v1266_v11, %v1266_v11  ;;  %v590_v32 = vsel %vm533_vm1, %v573_v17, 0.0  ;;  %v539_v33 = vsel %vm533_vm1, %v1266_v11, 0.0 }
 0x10b   :  { %v535_v19 = vsel %vm533_vm1, %v1270_v16, 0.0  ;;  %v572_v20 = vmul.f32 %v1270_v16, %v1270_v16  ;;  %v587_v24 = vsel %vm533_vm1, %v571_v14, 0.0 }
 0x10c   :  { %v536_v22 = vadd.f32 %v535_v19, %v534_v18  ;;  %v592_v38 = vsel %vm533_vm1, %v574_v21, 0.0 }
 0x10d   :  { %v588_v25 = vsel %vm533_vm1, %v572_v20, 0.0  ;;  %v955_v26 = vpop.f32.mrb[12].mxu0  ;;  %v1005_v27 = vpop.f32.mrb[12].mxu1 }
 0x10e   :  { %v538_v28 = vadd.f32 %v537_v23, %v536_v22  ;;  %v589_v29 = vadd.f32 %v588_v25, %v587_v24  ;;  %v956_v30 = vpop.f32.mrb[13].mxu0  ;;  %v486_v31 = vpop.f32.mrb[13].mxu1 }
 0x10f   :  { %v957_v34 = vadd.f32 %v956_v30, %v955_v26  ;;  %v1289_v35 = vadd.f32 %v951_v7, %v486_v31  ;;  %v958_v36 = vpop.f32.mrb[14].mxu0  ;;  %v1006_v37 = vpop.f32.mrb[14].mxu1 }
 0x110   :  { %v591_v39 = vadd.f32 %v590_v32, %v589_v29  ;;  %v540_v40 = vadd.f32 %v539_v33, %v538_v28  ;;  %v959_v41 = vpop.f32.mrb[15].mxu0  ;;  %v489_v42 = vpop.f32.mrb[15].mxu1 }
 0x111   :  { %v1292_v43 = vadd.f32 %v1005_v27, %v957_v34  ;;  %v541_v44 = vsel %vm533_vm1, %v1289_v35, 0.0  ;;  %v575_v45 = vmul.f32 %v1289_v35, %v1289_v35  ;;  %v960_v46 = vadd.f32 %v959_v41, %v958_v36 }
 0x112   :  { %v542_v47 = vadd.f32 %v541_v44, %v540_v40  ;;  %v593_v49 = vadd.f32 %v592_v38, %v591_v39  ;;  %v1298_v50 = vadd.f32 %v954_v15, %v489_v42 }
 0x113   :  { %v594_v51 = vsel %vm533_vm1, %v575_v45, 0.0  ;;  %v1301_v52 = vadd.f32 %v1006_v37, %v960_v46  ;;  %v577_v57 = vmul.f32 %v1292_v43, %v1292_v43  ;;  %v545_v2 = vsel %vm533_vm1, %v1292_v43, 0.0 }
 0x114   :  { %v595_v54 = vadd.f32 %v594_v51, %v593_v49  ;;  %v543_v55 = vsel %vm533_vm1, %v1298_v50, 0.0  ;;  %v576_v56 = vmul.f32 %v1298_v50, %v1298_v50 }
 0x115   :  { %v544_v58 = vadd.f32 %v543_v55, %v542_v47  ;;  %v961_v59 = vpop.f32.mrb[16].mxu0  ;;  %v1009_v61 = vpop.f32.mrb[16].mxu1  ;;  %v598_v13 = vsel %vm533_vm1, %v577_v57, 0.0  ;;  %v578_v14 = vmul.f32 %v1301_v52, %v1301_v52  ;;  %v547_v19 = vsel %vm533_vm1, %v1301_v52, 0.0 }
 0x116   :  { %v596_v62 = vsel %vm533_vm1, %v576_v56, 0.0  ;;  %v962_v63 = vpop.f32.mrb[17].mxu0  ;;  %v502_v0 = vpop.f32.mrb[17].mxu1 }
 0x117   :  { %v597_v3 = vadd.f32 %v596_v62, %v595_v54  ;;  %v963_v5 = vadd.f32 %v962_v63, %v961_v59  ;;  %v964_v6 = vpop.f32.mrb[18].mxu0  ;;  %v1010_v7 = vpop.f32.mrb[18].mxu1  ;;  %v546_v9 = vadd.f32 %v545_v2, %v544_v58  ;;  %v600_v24 = vsel %vm533_vm1, %v578_v14, 0.0 }
 0x118   :  { %v965_v10 = vpop.f32.mrb[19].mxu0  ;;  %v505_v12 = vpop.f32.mrb[19].mxu1 }
 0x119   :  { %v966_v15 = vadd.f32 %v965_v10, %v964_v6  ;;  %v1315_v17 = vadd.f32 %v963_v5, %v502_v0  ;;  %v599_v18 = vadd.f32 %v598_v13, %v597_v3  ;;  %v548_v23 = vadd.f32 %v547_v19, %v546_v9 }
 0x11b   :  { %v549_v20 = vsel %vm533_vm1, %v1315_v17, 0.0  ;;  %v579_v21 = vmul.f32 %v1315_v17, %v1315_v17  ;;  %v1323_v22 = vadd.f32 %v966_v15, %v505_v12  ;;  %v601_v30 = vadd.f32 %v600_v24, %v599_v18 }
 0x11c   :  { %v550_v29 = vadd.f32 %v549_v20, %v548_v23 }
 0x11d   :  { %v602_v25 = vsel %vm533_vm1, %v579_v21, 0.0  ;;  %v580_v26 = vmul.f32 %v1323_v22, %v1323_v22  ;;  %v967_v27 = vpop.f32.mrb[20].mxu0  ;;  %v1013_v28 = vpop.f32.mrb[20].mxu1  ;;  %v551_v34 = vsel %vm533_vm1, %v1323_v22, 0.0 }
 0x11e   :  { %v1330_v31 = vadd.f32 %v1013_v28, %v1258_v60  ;;  %v968_v32 = vpop.f32.mrb[21].mxu0  ;;  %v518_v33 = vpop.f32.mrb[21].mxu1  ;;  %v603_v40 = vadd.f32 %v602_v25, %v601_v30  ;;  %v552_v47 = vadd.f32 %v551_v34, %v550_v29 }
 0x11f   :  { %v969_v36 = vadd.f32 %v968_v32, %v967_v27  ;;  %v1335_v37 = vadd.f32 %v1254_v48, %v518_v33  ;;  %v970_v38 = vpop.f32.mrb[22].mxu0  ;;  %v1014_v39 = vpop.f32.mrb[22].mxu1  ;;  %v604_v60 = vsel %vm533_vm1, %v580_v26, 0.0 }
 0x120   :  { %v1338_v41 = vadd.f32 %v1014_v39, %v1260_v1  ;;  %v971_v42 = vpop.f32.mrb[23].mxu0  ;;  %v521_v44 = vpop.f32.mrb[23].mxu1  ;;  %v605_v1 = vadd.f32 %v604_v60, %v603_v40  ;;  %v585_v5 = vmul.f32 %v1330_v31, %v1330_v31  ;;  %v561_v12 = vsel %vm533_vm1, %v1330_v31, 0.0 }
 0x121   :  { %v1341_v45 = vadd.f32 %v1009_v61, %v969_v36  ;;  %v972_v46 = vadd.f32 %v971_v42, %v970_v38  ;;  %v1344_v49 = vadd.f32 %v1256_v53, %v521_v44  ;;  %v583_v57 = vmul.f32 %v1335_v37, %v1335_v37 }
 0x122   :  { %v557_v62 = vsel %vm533_vm1, %v1335_v37, 0.0  ;;  %v586_v13 = vmul.f32 %v1338_v41, %v1338_v41  ;;  %v614_v19 = vsel %vm533_vm1, %v585_v5, 0.0  ;;  %v563_v20 = vsel %vm533_vm1, %v1338_v41, 0.0  ;;  %v655_v5 = vld [vmem:[%s1470_s2] sm:$0x1] }
 0x123   :  { %v553_v48 = vsel %vm533_vm1, %v1341_v45, 0.0  ;;  %v581_v51 = vmul.f32 %v1341_v45, %v1341_v45  ;;  %v1350_v54 = vadd.f32 %v1010_v7, %v972_v46  ;;  %v584_v0 = vmul.f32 %v1344_v49, %v1344_v49 }
 0x124   :  { %v554_v55 = vadd.f32 %v553_v48, %v552_v47  ;;  %v610_v6 = vsel %vm533_vm1, %v583_v57, 0.0  ;;  %v559_v7 = vsel %vm533_vm1, %v1344_v49, 0.0  ;;  %v616_v24 = vsel %vm533_vm1, %v586_v13, 0.0 }
 0x125   :  { %v606_v56 = vsel %vm533_vm1, %v581_v51, 0.0  ;;  %v555_v58 = vsel %vm533_vm1, %v1350_v54, 0.0  ;;  %v582_v53 = vmul.f32 %v1350_v54, %v1350_v54  ;;  %v612_v14 = vsel %vm533_vm1, %v584_v0, 0.0 }
 0x126   :  { %v607_v59 = vadd.f32 %v606_v56, %v605_v1  ;;  %v556_v61 = vadd.f32 %v555_v58, %v554_v55 }
 0x127   :  { %v608_v63 = vsel %vm533_vm1, %v582_v53, 0.0 }
 0x128   :  { %v609_v2 = vadd.f32 %v608_v63, %v607_v59  ;;  %v558_v3 = vadd.f32 %v557_v62, %v556_v61 }
 0x12a   :  { %v560_v9 = vadd.f32 %v559_v7, %v558_v3  ;;  %v611_v10 = vadd.f32 %v610_v6, %v609_v2  ;;  %v663_v2 = vlaneseq }
 0x12c   :  { %v562_v15 = vadd.f32 %v561_v12, %v560_v9  ;;  %v613_v18 = vadd.f32 %v612_v14, %v611_v10  ;;  %v664_v3 = vshrl.u32 %v663_v2, 7  ;;  %v659_v10 = vld [vmem:[%s1471_s3] sm:$0x1] }
 0x12e   :  { %v564_v21 = vadd.f32 %v563_v20, %v562_v15  ;;  %v615_v23 = vadd.f32 %v614_v19, %v613_v18  ;;  %v665_v6 = vsub.s32 0, %v664_v3 }
 0x130   :  { %v565_v25 = vrot.slane %v564_v21, 4  ;;  %v617_v26 = vadd.f32 %v616_v24, %v615_v23 }
 0x132   :  { %v566_v27 = vadd.f32 %v565_v25, %v564_v21  ;;  %v618_v28 = vrot.slane %v617_v26, 4 }
 0x134   :  { %v567_v29 = vrot.slane %v566_v27, 2  ;;  %v619_v30 = vadd.f32 %v618_v28, %v617_v26 }
 0x136   :  { %v568_v32 = vadd.f32 %v567_v29, %v566_v27  ;;  %v620_v33 = vrot.slane %v619_v30, 2 }
 0x138   :  { %v569_v34 = vrot.slane %v568_v32, 1  ;;  %v621_v36 = vadd.f32 %v620_v33, %v619_v30 }
 0x13a   :  { %v570_v38 = vadd.f32 %v569_v34, %v568_v32  ;;  %v622_v39 = vrot.slane %v621_v36, 1 }
 0x13c   :  { %634 = vrot.lane.b32.xlu1 %v570_v38, %s1089_s0  ;;  %625 = vrot.lane.b32.xlu0 %v570_v38, %s1090_s19  ;;  %v623_v40 = vadd.f32 %v622_v39, %v621_v36 }
 0x140   :  { %638 = vrot.lane.b32.xlu1 %v623_v40, %s1089_s0  ;;  %630 = vrot.lane.b32.xlu0 %v623_v40, %s1090_s19 }
 0x144   :  { %646 = vrot.lane.b32.xlu1 %v623_v40, %s1091_s20  ;;  %642 = vrot.lane.b32.xlu0 %v570_v38, %s1091_s20 }
 0x1ae   :  { %v635_v42 = vpop.permute.xlu1 %634  ;;  %v626_v44 = vpop.permute.xlu0 %625 }
 0x1af   :  { %v628_v60 = vadd.f32 %v626_v44, %v570_v38 }
 0x1b1   :  { %v637_v1 = vadd.f32 %v635_v42, %v628_v60 }
 0x1b2   :  { %v639_v46 = vpop.permute.xlu1 %638  ;;  %v631_v47 = vpop.permute.xlu0 %630 }
 0x1b3   :  { %v633_v48 = vadd.f32 %v631_v47, %v623_v40 }
 0x1b5   :  { %v641_v51 = vadd.f32 %v639_v46, %v633_v48 }
 0x1b6   :  { %v647_v55 = vpop.permute.xlu1 %646  ;;  %v643_v56 = vpop.permute.xlu0 %642 }
 0x1b7   :  { %v649_v57 = vadd.f32 %v647_v55, %v641_v51  ;;  %v645_v58 = vadd.f32 %v643_v56, %v637_v1 }
 0x1b9   :  { %v650_v53 = vmul.f32 0.001953125, %v645_v58  ;;  %v651_v59 = vmul.f32 0.001953125, %v649_v57 }
 0x1bb   :  { %v652_v61 = vmul.f32 %v650_v53, %v650_v53 }
 0x1bd   :  { %v653_v62 = vsub.f32 %v651_v59, %v652_v61 }
 0x1bf   :  { %v654_v63 = vmax.f32 %v653_v62, 0.0 }
 0x1c1   :  { %v656_v0 = vadd.f32 1e-05, %v654_v63 }
 0x1c3   :  { %1087 = vrsqrt.f32 %v656_v0 }
 0x1cd   :  { %v1088_v7 = vpop.eup %1087 }
 0x1ce   :  { %v658_v9 = vmul.f32 %v1088_v7, %v655_v5 }
 0x1d0   :  { %v660_v12 = vmul.f32 %v658_v9, %v650_v53  ;;  %v666_v13 = vrot.slane %v658_v9, %v665_v6 }
 0x1d2   :  { %v661_v14 = vsub.f32 %v659_v10, %v660_v12  ;;  %670 = vrot.lane.b32.xlu1 %v666_v13, %s1092_s25  ;;  %667 = vrot.lane.b32.xlu0 %v666_v13, %s1093_s26 }
 0x1d4   :  { %v685_v15 = vrot.slane %v661_v14, %v665_v6 }
 0x1d6   :  { %673 = vrot.lane.b32.xlu0 %v666_v13, %s1094_s27  ;;  %686 = vrot.lane.b32.xlu1 %v685_v15, %s1093_s26 }
 0x1da   :  { %689 = vrot.lane.b32.xlu0 %v685_v15, %s1092_s25  ;;  %692 = vrot.lane.b32.xlu1 %v685_v15, %s1094_s27 }
 0x244   :  { %v671_v18 = vpop.permute.xlu1 %670  ;;  %v668_v19 = vpop.permute.xlu0 %667 }
 0x245   :  { %v677_v20 = vsel %vm676_vm2, %v658_v9, %v668_v19 }
 0x246   :  { %v678_v21 = vsel %vm314_vm0, %v677_v20, %v671_v18 }
 0x248   :  { %v674_v23 = vpop.permute.xlu0 %673  ;;  %v687_v24 = vpop.permute.xlu1 %686 }
 0x249   :  { %v680_v25 = vsel %vm679_vm3, %v678_v21, %v674_v23  ;;  %v695_v33 = vsel %vm676_vm2, %v661_v14, %v687_v24 }
 0x24a   :  { %v701_v26 = vrot.slane %v680_v25, %v665_v6 }
 0x24c   :  { %v690_v27 = vpop.permute.xlu0 %689  ;;  %v693_v28 = vpop.permute.xlu1 %692  ;;  %v702_v29 = vmul.f32 %v701_v26, %v1264_v8  ;;  %v703_v30 = vmul.f32 %v701_v26, %v1270_v16  ;;  %v704_v32 = vmul.f32 %v701_v26, %v1262_v4  ;;  %v705_v34 = vmul.f32 %v701_v26, %v1266_v11 }
 0x24d   :  { %v706_v36 = vmul.f32 %v701_v26, %v1289_v35  ;;  %v707_v38 = vmul.f32 %v701_v26, %v1298_v50  ;;  %v696_v39 = vsel %vm314_vm0, %v695_v33, %v690_v27  ;;  %v708_v40 = vmul.f32 %v701_v26, %v1292_v43 }
 0x24e   :  { %v709_v42 = vmul.f32 %v701_v26, %v1301_v52  ;;  %v710_v44 = vmul.f32 %v701_v26, %v1315_v17  ;;  %v697_v8 = vsel %vm679_vm3, %v696_v39, %v693_v28  ;;  %v711_v16 = vmul.f32 %v701_v26, %v1323_v22 }
 0x24f   :  { %v712_v4 = vmul.f32 %v701_v26, %v1341_v45  ;;  %v713_v11 = vmul.f32 %v701_v26, %v1350_v54  ;;  %v721_v60 = vrot.slane %v697_v8, %v665_v6  ;;  %v714_v35 = vmul.f32 %v701_v26, %v1335_v37 }
 0x250   :  { %v715_v50 = vmul.f32 %v701_v26, %v1344_v49  ;;  %v716_v46 = vmul.f32 %v701_v26, %v1330_v31  ;;  %v717_v43 = vmul.f32 %v701_v26, %v1338_v41 }
 0x251   :  { %v722_v52 = vadd.f32 %v721_v60, %v702_v29  ;;  %v723_v17 = vadd.f32 %v721_v60, %v703_v30  ;;  %v724_v47 = vadd.f32 %v721_v60, %v704_v32  ;;  %v725_v48 = vadd.f32 %v721_v60, %v705_v34 }
 0x252   :  { %v726_v51 = vadd.f32 %v721_v60, %v706_v36  ;;  %v727_v22 = vadd.f32 %v721_v60, %v707_v38  ;;  %v728_v1 = vadd.f32 %v721_v60, %v708_v40  ;;  %v729_v45 = vadd.f32 %v721_v60, %v709_v42 }
 0x253   :  { %v730_v55 = vadd.f32 %v721_v60, %v710_v44  ;;  %v731_v54 = vadd.f32 %v721_v60, %v711_v16  ;;  %v732_v56 = vadd.f32 %v721_v60, %v712_v4  ;;  %v733_v57 = vadd.f32 %v721_v60, %v713_v11 }
 0x254   :  { %v734_v37 = vadd.f32 %v721_v60, %v714_v35  ;;  %v735_v58 = vadd.f32 %v721_v60, %v715_v50  ;;  %v736_v49 = vadd.f32 %v721_v60, %v716_v46  ;;  %v737_v53 = vadd.f32 %v721_v60, %v717_v43 }
 0x255   :  { %v738_v31 = vmax.f32 %v722_v52, 0.0  ;;  %v739_v59 = vmax.f32 %v723_v17, 0.0  ;;  %v740_v41 = vmax.f32 %v724_v47, 0.0  ;;  %v741_v61 = vmax.f32 %v725_v48, 0.0 }
 0x256   :  { %v742_v62 = vmax.f32 %v726_v51, 0.0  ;;  %v743_v63 = vmax.f32 %v727_v22, 0.0  ;;  %v744_v0 = vmax.f32 %v728_v1, 0.0  ;;  %v745_v2 = vmax.f32 %v729_v45, 0.0 }
 0x257   :  { %v746_v3 = vmax.f32 %v730_v55, 0.0  ;;  %v747_v5 = vmax.f32 %v731_v54, 0.0  ;;  %v748_v6 = vmax.f32 %v732_v56, 0.0  ;;  %v749_v7 = vmax.f32 %v733_v57, 0.0 }
 0x258   :  { %v750_v9 = vmax.f32 %v734_v37, 0.0  ;;  %v751_v10 = vmax.f32 %v735_v58, 0.0  ;;  %v752_v12 = vmax.f32 %v736_v49, 0.0  ;;  %v753_v13 = vmax.f32 %v737_v53, 0.0 }
 0x259   :  { %v905_v14 = vpack.c.bf16 %v738_v31, %v738_v31  ;;  %v906_v15 = vpack.c.bf16 %v739_v59, %v739_v59  ;;  %v907_v18 = vpack.c.bf16 %v740_v41, %v740_v41  ;;  %v908_v19 = vpack.c.bf16 %v741_v61, %v741_v61 }
 0x25a   :  { %v909_v20 = vpack.c.bf16 %v742_v62, %v742_v62  ;;  %v910_v21 = vpack.c.bf16 %v743_v63, %v743_v63  ;;  %v911_v23 = vpack.c.bf16 %v744_v0, %v744_v0  ;;  %v912_v24 = vpack.c.bf16 %v745_v2, %v745_v2 }
 0x25b   :  { %v913_v25 = vpack.c.bf16 %v746_v3, %v746_v3  ;;  %v914_v26 = vpack.c.bf16 %v747_v5, %v747_v5  ;;  %v915_v27 = vpack.c.bf16 %v748_v6, %v748_v6  ;;  %v916_v28 = vpack.c.bf16 %v749_v7, %v749_v7  ;;  %819 = vst.msk [vmem:[%s1472_s4] sm:$0xf] %vm818_vm4, %v905_v14 }
 0x25c   :  { %820 = vst.msk [vmem:[%s1472_s4 + $0x4] sm:$0xf] %vm818_vm4, %v906_v15  ;;  %821 = vst.msk [vmem:[%s1472_s4 + $0x8] sm:$0xf] %vm818_vm4, %v907_v18  ;;  %v917_v29 = vpack.c.bf16 %v750_v9, %v750_v9  ;;  %v918_v30 = vpack.c.bf16 %v751_v10, %v751_v10  ;;  %v919_v32 = vpack.c.bf16 %v752_v12, %v752_v12 }
 0x25d   :  { %822 = vst.msk [vmem:[%s1472_s4 + $0xc] sm:$0xf] %vm818_vm4, %v908_v19  ;;  %v920_v33 = vpack.c.bf16 %v753_v13, %v753_v13  ;;  %823 = vst.msk [vmem:[%s1472_s4 + $0x10] sm:$0xf] %vm818_vm4, %v909_v20 }
 0x25e   :  { %824 = vst.msk [vmem:[%s1472_s4 + $0x14] sm:$0xf] %vm818_vm4, %v910_v21  ;;  %825 = vst.msk [vmem:[%s1472_s4 + $0x18] sm:$0xf] %vm818_vm4, %v911_v23 }
 0x25f   :  { %826 = vst.msk [vmem:[%s1472_s4 + $0x1c] sm:$0xf] %vm818_vm4, %v912_v24  ;;  %827 = vst.msk [vmem:[%s1472_s4 + $0x20] sm:$0xf] %vm818_vm4, %v913_v25 }
 0x260   :  { %828 = vst.msk [vmem:[%s1472_s4 + $0x24] sm:$0xf] %vm818_vm4, %v914_v26  ;;  %829 = vst.msk [vmem:[%s1472_s4 + $0x28] sm:$0xf] %vm818_vm4, %v915_v27 }
 0x261   :  { %830 = vst.msk [vmem:[%s1472_s4 + $0x2c] sm:$0xf] %vm818_vm4, %v916_v28  ;;  %831 = vst.msk [vmem:[%s1472_s4 + $0x30] sm:$0xf] %vm818_vm4, %v917_v29 }
 0x262   :  { %832 = vst.msk [vmem:[%s1472_s4 + $0x34] sm:$0xf] %vm818_vm4, %v918_v30  ;;  %833 = vst.msk [vmem:[%s1472_s4 + $0x38] sm:$0xf] %vm818_vm4, %v919_v32 }
 0x263   :  { %834 = vst.msk [vmem:[%s1472_s4 + $0x3c] sm:$0xf] %vm818_vm4, %v920_v33 }

// kernel: generator_forward.8
= control target key start
LH: loop header
LB: loop body
LE: loop exit
PB: predicated region body
PF: predicated region fallthrough
CT: control target
= control target key end

     0   :  { %v2123_v0 = vmov 0   ;;  %vm442_vm0 = vcmask 130048   ;;  %vm828_vm1 = vcmask 261120   ;;  %s2125_s26 = smov 120   ;;  %s2126_s27 = smov 104   ;;  %vm1211_vm2 = vcmask 64512   ;;  %s3898_s1 = inlined_call_operand.vmem [shape: bf16[144,32], index: 1, kind: input, shape index: {}]   ;;  %s3899_s0 = inlined_call_operand.vmem [shape: bf16[512,144], index: 0, kind: input, shape index: {}]   ;;  %s3900_s2 = inlined_call_operand.vmem [shape: f32[1,8], index: 2, kind: input, shape index: {}]   ;;  %s3901_s3 = inlined_call_operand.vmem [shape: f32[1,8], index: 3, kind: input, shape index: {}]   ;;  %s3902_s4 = inlined_call_operand.vmem [shape: bf16[512,32], index: 4, kind: output, shape index: {}]  }
   0x1   :  { %539 = vmatprep.subr.bf16.mxu0 %v2123_v0  ;;  %v2016_v1 = vld [vmem:[%s3898_s1] sm:$0xff]   ;;  %1991 = vmatprep.subr.bf16.mxu1 %v2123_v0  ;;  %v2017_v2 = vld [vmem:[%s3898_s1 + $0x8] sm:$0xff]   ;;  %v2018_v3 = vld [vmem:[%s3898_s1 + $0x10] sm:$0xff]   ;;  %s2127_s6 = smov 16   ;;  %s2128_s7 = smov 8   ;;  %vm1214_vm3 = vcmask 195584  }
   0x2   :  { %540 = vmatpush1.bf16.msra.mxu0 %v2016_v1  ;;  %2000 = vmatpush1.bf16.msra.mxu1 %v2016_v1  ;;  %v2019_v4 = vld [vmem:[%s3898_s1 + $0x18] sm:$0xff]   ;;  %v2027_v5 = vld [vmem:[%s3899_s0 + $0x4] ss:$8 sps:$4 sm:$0xff]   ;;  %v2022_v9 = vld [vmem:[%s3898_s1 + $0x30] sm:$0xff]   ;;  %s2129_s8 = smov 24   ;;  %vm1689_vm4 = vcmask 257024  }
   0x3   :  { %541 = vmatprep.subr.bf16.mxu0 %v2123_v0  ;;  %1992 = vmatprep.subr.bf16.mxu1 %v2123_v0  ;;  %v2020_v6 = vld [vmem:[%s3898_s1 + $0x20] sm:$0xff]   ;;  %v2021_v7 = vld [vmem:[%s3898_s1 + $0x28] sm:$0xff]   ;;  %v2023_v10 = vld [vmem:[%s3898_s1 + $0x38] sm:$0xff]  }
   0x4   :  { %1831 = vmatprep.mubr.msk.bf16.mxu0 %vm442_vm0, %v2027_v5  ;;  %v2051_v8 = vld [vmem:[%s3899_s0 + $0x104] ss:$8 sps:$4 sm:$0xff]   ;;  %v2025_v12 = vld [vmem:[%s3899_s0] ss:$8 sps:$4 sm:$0xff]   ;;  %v2028_v13 = vld [vmem:[%s3899_s0 + $0x14] ss:$8 sps:$4 sm:$0xff]  }
   0x5   :  { %1847 = vmatprep.mubr.msk.bf16.mxu1 %vm442_vm0, %v2051_v8  ;;  %v2024_v11 = vld [vmem:[%s3898_s1 + $0x40] sm:$0xff]   ;;  %v2055_v15 = vld [vmem:[%s3899_s0 + $0x114] ss:$8 sps:$4 sm:$0xff]   ;;  %v2030_v16 = vld [vmem:[%s3899_s0 + $0x10] ss:$8 sps:$4 sm:$0xff]  }
   0x6   :  { %542 = vmatpush1.bf16.msra.mxu0 %v2017_v2  ;;  %2001 = vmatpush1.bf16.msra.mxu1 %v2017_v2  ;;  %v2049_v14 = vld [vmem:[%s3899_s0 + $0x100] ss:$8 sps:$4 sm:$0xff]   ;;  %v2031_v17 = vld [vmem:[%s3899_s0 + $0x24] ss:$8 sps:$4 sm:$0xff]   ;;  %v2057_v18 = vld [vmem:[%s3899_s0 + $0x110] ss:$8 sps:$4 sm:$0xff]  }
   0x7   :  { %543 = vmatprep.subr.bf16.mxu0 %v2123_v0  ;;  %1993 = vmatprep.subr.bf16.mxu1 %v2123_v0  ;;  %v2061_v19 = vld [vmem:[%s3899_s0 + $0x124] ss:$8 sps:$4 sm:$0xff]   ;;  %v2033_v20 = vld [vmem:[%s3899_s0 + $0x20] ss:$8 sps:$4 sm:$0xff]   ;;  %v2034_v21 = vld [vmem:[%s3899_s0 + $0x34] ss:$8 sps:$4 sm:$0xff]  }
   0x8   :  { %v2063_v22 = vld [vmem:[%s3899_s0 + $0x120] ss:$8 sps:$4 sm:$0xff]   ;;  %v2067_v23 = vld [vmem:[%s3899_s0 + $0x134] ss:$8 sps:$4 sm:$0xff]   ;;  %v2036_v24 = vld [vmem:[%s3899_s0 + $0x30] ss:$8 sps:$4 sm:$0xff]  }
   0x9   :  { %v2069_v25 = vld [vmem:[%s3899_s0 + $0x130] ss:$8 sps:$4 sm:$0xff]   ;;  %v2037_v26 = vld [vmem:[%s3899_s0 + $0x44] ss:$8 sps:$4 sm:$0xff]   ;;  %v2039_v28 = vld [vmem:[%s3899_s0 + $0x40] ss:$8 sps:$4 sm:$0xff]  }
   0xa   :  { %544 = vmatpush1.bf16.msra.mxu0 %v2018_v3  ;;  %2002 = vmatpush1.bf16.msra.mxu1 %v2018_v3  ;;  %v2073_v27 = vld [vmem:[%s3899_s0 + $0x144] ss:$8 sps:$4 sm:$0xff]   ;;  %v2075_v29 = vld [vmem:[%s3899_s0 + $0x140] ss:$8 sps:$4 sm:$0xff]   ;;  %v2040_v30 = vld [vmem:[%s3899_s0 + $0x54] ss:$8 sps:$4 sm:$0xff]  }
   0xb   :  { %545 = vmatprep.subr.bf16.mxu0 %v2123_v0  ;;  %1994 = vmatprep.subr.bf16.mxu1 %v2123_v0  ;;  %v2079_v31 = vld [vmem:[%s3899_s0 + $0x154] ss:$8 sps:$4 sm:$0xff]   ;;  %v2042_v32 = vld [vmem:[%s3899_s0 + $0x50] ss:$8 sps:$4 sm:$0xff]   ;;  %v2043_v34 = vld [vmem:[%s3899_s0 + $0x64] ss:$8 sps:$4 sm:$0xff]  }
   0xc   :  { %v2081_v33 = vld [vmem:[%s3899_s0 + $0x150] ss:$8 sps:$4 sm:$0xff]   ;;  %v2085_v35 = vld [vmem:[%s3899_s0 + $0x164] ss:$8 sps:$4 sm:$0xff]   ;;  %v2045_v36 = vld [vmem:[%s3899_s0 + $0x60] ss:$8 sps:$4 sm:$0xff]  }
   0xd   :  { %v2087_v37 = vld [vmem:[%s3899_s0 + $0x160] ss:$8 sps:$4 sm:$0xff]   ;;  %v2046_v38 = vld [vmem:[%s3899_s0 + $0x74] ss:$8 sps:$4 sm:$0xff]   ;;  %v2048_v40 = vld [vmem:[%s3899_s0 + $0x70] ss:$8 sps:$4 sm:$0xff]  }
   0xe   :  { %546 = vmatpush1.bf16.msra.mxu0 %v2019_v4  ;;  %2003 = vmatpush1.bf16.msra.mxu1 %v2019_v4  ;;  %v2091_v39 = vld [vmem:[%s3899_s0 + $0x174] ss:$8 sps:$4 sm:$0xff]   ;;  %v2093_v41 = vld [vmem:[%s3899_s0 + $0x170] ss:$8 sps:$4 sm:$0xff]   ;;  %v2052_v42 = vld [vmem:[%s3899_s0 + $0x84] ss:$8 sps:$4 sm:$0xff]  }
   0xf   :  { %547 = vmatprep.subr.bf16.mxu0 %v2123_v0  ;;  %1995 = vmatprep.subr.bf16.mxu1 %v2123_v0  ;;  %v2097_v43 = vld [vmem:[%s3899_s0 + $0x184] ss:$8 sps:$4 sm:$0xff]   ;;  %v2054_v44 = vld [vmem:[%s3899_s0 + $0x80] ss:$8 sps:$4 sm:$0xff]   ;;  %v2058_v46 = vld [vmem:[%s3899_s0 + $0x94] ss:$8 sps:$4 sm:$0xff]  }
  0x10   :  { %v2099_v45 = vld [vmem:[%s3899_s0 + $0x180] ss:$8 sps:$4 sm:$0xff]   ;;  %v2100_v47 = vld [vmem:[%s3899_s0 + $0x194] ss:$8 sps:$4 sm:$0xff]   ;;  %v2060_v48 = vld [vmem:[%s3899_s0 + $0x90] ss:$8 sps:$4 sm:$0xff]  }
  0x11   :  { %v2102_v49 = vld [vmem:[%s3899_s0 + $0x190] ss:$8 sps:$4 sm:$0xff]   ;;  %v2064_v50 = vld [vmem:[%s3899_s0 + $0xa4] ss:$8 sps:$4 sm:$0xff]   ;;  %v2066_v52 = vld [vmem:[%s3899_s0 + $0xa0] ss:$8 sps:$4 sm:$0xff]  }
  0x12   :  { %548 = vmatpush1.bf16.msra.mxu0 %v2020_v6  ;;  %2004 = vmatpush1.bf16.msra.mxu1 %v2020_v6  ;;  %v2103_v51 = vld [vmem:[%s3899_s0 + $0x1a4] ss:$8 sps:$4 sm:$0xff]   ;;  %v2105_v53 = vld [vmem:[%s3899_s0 + $0x1a0] ss:$8 sps:$4 sm:$0xff]   ;;  %v2070_v54 = vld [vmem:[%s3899_s0 + $0xb4] ss:$8 sps:$4 sm:$0xff]  }
  0x13   :  { %549 = vmatprep.subr.bf16.mxu0 %v2123_v0  ;;  %1996 = vmatprep.subr.bf16.mxu1 %v2123_v0  ;;  %v2106_v55 = vld [vmem:[%s3899_s0 + $0x1b4] ss:$8 sps:$4 sm:$0xff]   ;;  %v2072_v56 = vld [vmem:[%s3899_s0 + $0xb0] ss:$8 sps:$4 sm:$0xff]   ;;  %v2076_v58 = vld [vmem:[%s3899_s0 + $0xc4] ss:$8 sps:$4 sm:$0xff]  }
  0x14   :  { %v2108_v57 = vld [vmem:[%s3899_s0 + $0x1b0] ss:$8 sps:$4 sm:$0xff]   ;;  %v2109_v59 = vld [vmem:[%s3899_s0 + $0x1c4] ss:$8 sps:$4 sm:$0xff]   ;;  %v2078_v60 = vld [vmem:[%s3899_s0 + $0xc0] ss:$8 sps:$4 sm:$0xff]  }
  0x15   :  { %v2111_v61 = vld [vmem:[%s3899_s0 + $0x1c0] ss:$8 sps:$4 sm:$0xff]   ;;  %v2082_v62 = vld [vmem:[%s3899_s0 + $0xd4] ss:$8 sps:$4 sm:$0xff]   ;;  %v2114_v1 = vld [vmem:[%s3899_s0 + $0x1d0] ss:$8 sps:$4 sm:$0xff]  }
  0x16   :  { %550 = vmatpush1.bf16.msra.mxu0 %v2021_v7  ;;  %2005 = vmatpush1.bf16.msra.mxu1 %v2021_v7  ;;  %v2112_v63 = vld [vmem:[%s3899_s0 + $0x1d4] ss:$8 sps:$4 sm:$0xff]   ;;  %v2088_v2 = vld [vmem:[%s3899_s0 + $0xe4] ss:$8 sps:$4 sm:$0xff]   ;;  %v2090_v4 = vld [vmem:[%s3899_s0 + $0xe0] ss:$8 sps:$4 sm:$0xff]  }
  0x17   :  { %551 = vmatprep.subr.bf16.mxu0 %v2123_v0  ;;  %1997 = vmatprep.subr.bf16.mxu1 %v2123_v0  ;;  %v2115_v3 = vld [vmem:[%s3899_s0 + $0x1e4] ss:$8 sps:$4 sm:$0xff]   ;;  %v2117_v5 = vld [vmem:[%s3899_s0 + $0x1e0] ss:$8 sps:$4 sm:$0xff]   ;;  %v2094_v6 = vld [vmem:[%s3899_s0 + $0xf4] ss:$8 sps:$4 sm:$0xff]  }
  0x18   :  { %v2118_v7 = vld [vmem:[%s3899_s0 + $0x1f4] ss:$8 sps:$4 sm:$0xff]   ;;  %v2096_v8 = vld [vmem:[%s3899_s0 + $0xf0] ss:$8 sps:$4 sm:$0xff]  }
  0x1a   :  { %552 = vmatpush1.bf16.msra.mxu0 %v2022_v9  ;;  %2006 = vmatpush1.bf16.msra.mxu1 %v2022_v9  ;;  %v2120_v9 = vld [vmem:[%s3899_s0 + $0x1f0] ss:$8 sps:$4 sm:$0xff]  }
  0x1b   :  { %553 = vmatprep.subr.bf16.mxu0 %v2123_v0  ;;  %1998 = vmatprep.subr.bf16.mxu1 %v2123_v0 }
  0x1e   :  { %554 = vmatpush1.bf16.msra.mxu0 %v2023_v10  ;;  %2007 = vmatpush1.bf16.msra.mxu1 %v2023_v10 }
  0x1f   :  { %555 = vmatprep.subr.bf16.mxu0 %v2123_v0  ;;  %1999 = vmatprep.subr.bf16.mxu1 %v2123_v0  ;;  %v2084_v0 = vld [vmem:[%s3899_s0 + $0xd0] ss:$8 sps:$4 sm:$0xff]   ;;  %s2124_s0 = smov 112  }
  0x22   :  { %556 = vmatpush1.bf16.msra.mxu0 %v2024_v11  ;;  %2008 = vmatpush1.bf16.msra.mxu1 %v2024_v11 }
  0x25   :  { %572 = vmatmul.mubr.bf16.vlgmr.msra.gmra.mrb[0].mxu0 %v2025_v12  ;;  %700 = vmatmul.mubr.bf16.vlgmr.msra.gmra.mrb[0].mxu1 %v2049_v14 }
  0x26   :  { %1832 = vmatprep.mubr.msk.bf16.mxu0 %vm442_vm0, %v2028_v13  ;;  %1848 = vmatprep.mubr.msk.bf16.mxu1 %vm442_vm0, %v2055_v15 }
  0x2d   :  { %580 = vmatmul.mubr.bf16.gmra.mrb[4].mxu0 %v2030_v16  ;;  %708 = vmatmul.mubr.bf16.gmra.mrb[4].mxu1 %v2057_v18 }
  0x2e   :  { %1833 = vmatprep.mubr.msk.bf16.mxu0 %vm442_vm0, %v2031_v17  ;;  %1849 = vmatprep.mubr.msk.bf16.mxu1 %vm442_vm0, %v2061_v19 }
  0x35   :  { %588 = vmatmul.mubr.bf16.gmra.mrb[8].mxu0 %v2033_v20  ;;  %716 = vmatmul.mubr.bf16.gmra.mrb[8].mxu1 %v2063_v22 }
  0x36   :  { %1834 = vmatprep.mubr.msk.bf16.mxu0 %vm442_vm0, %v2034_v21  ;;  %1850 = vmatprep.mubr.msk.bf16.mxu1 %vm442_vm0, %v2067_v23 }
  0x3d   :  { %596 = vmatmul.mubr.bf16.gmra.mrb[12].mxu0 %v2036_v24  ;;  %724 = vmatmul.mubr.bf16.gmra.mrb[12].mxu1 %v2069_v25 }
  0x3e   :  { %1835 = vmatprep.mubr.msk.bf16.mxu0 %vm442_vm0, %v2037_v26  ;;  %1851 = vmatprep.mubr.msk.bf16.mxu1 %vm442_vm0, %v2073_v27 }
  0x45   :  { %604 = vmatmul.mubr.bf16.gmra.mrb[16].mxu0 %v2039_v28  ;;  %732 = vmatmul.mubr.bf16.gmra.mrb[16].mxu1 %v2075_v29 }
  0x46   :  { %1836 = vmatprep.mubr.msk.bf16.mxu0 %vm442_vm0, %v2040_v30  ;;  %1852 = vmatprep.mubr.msk.bf16.mxu1 %vm442_vm0, %v2079_v31 }
  0x4d   :  { %612 = vmatmul.mubr.bf16.gmra.mrb[20].mxu0 %v2042_v32  ;;  %740 = vmatmul.mubr.bf16.gmra.mrb[20].mxu1 %v2081_v33 }
  0x4e   :  { %1837 = vmatprep.mubr.msk.bf16.mxu0 %vm442_vm0, %v2043_v34  ;;  %1853 = vmatprep.mubr.msk.bf16.mxu1 %vm442_vm0, %v2085_v35 }
  0x55   :  { %620 = vmatmul.mubr.bf16.gmra.mrb[24].mxu0 %v2045_v36  ;;  %748 = vmatmul.mubr.bf16.gmra.mrb[24].mxu1 %v2087_v37 }
  0x56   :  { %1838 = vmatprep.mubr.msk.bf16.mxu0 %vm442_vm0, %v2046_v38  ;;  %1854 = vmatprep.mubr.msk.bf16.mxu1 %vm442_vm0, %v2091_v39 }
  0x5d   :  { %628 = vmatmul.mubr.bf16.gmra.mrb[28].mxu0 %v2048_v40  ;;  %756 = vmatmul.mubr.bf16.gmra.mrb[28].mxu1 %v2093_v41 }
  0x5e   :  { %1839 = vmatprep.mubr.msk.bf16.mxu0 %vm442_vm0, %v2052_v42  ;;  %1855 = vmatprep.mubr.msk.bf16.mxu1 %vm442_vm0, %v2097_v43 }
  0x65   :  { %636 = vmatmul.mubr.bf16.gmra.mrb[32].mxu0 %v2054_v44  ;;  %764 = vmatmul.mubr.bf16.gmra.mrb[32].mxu1 %v2099_v45 }
  0x66   :  { %1840 = vmatprep.mubr.msk.bf16.mxu0 %vm442_vm0, %v2058_v46  ;;  %1856 = vmatprep.mubr.msk.bf16.mxu1 %vm442_vm0, %v2100_v47 }
  0x6d   :  { %644 = vmatmul.mubr.bf16.gmra.mrb[36].mxu0 %v2060_v48  ;;  %772 = vmatmul.mubr.bf16.gmra.mrb[36].mxu1 %v2102_v49 }
  0x6e   :  { %1841 = vmatprep.mubr.msk.bf16.mxu0 %vm442_vm0, %v2064_v50  ;;  %1857 = vmatprep.mubr.msk.bf16.mxu1 %vm442_vm0, %v2103_v51 }
  0x75   :  { %652 = vmatmul.mubr.bf16.gmra.mrb[40].mxu0 %v2066_v52  ;;  %780 = vmatmul.mubr.bf16.gmra.mrb[40].mxu1 %v2105_v53 }
  0x76   :  { %1842 = vmatprep.mubr.msk.bf16.mxu0 %vm442_vm0, %v2070_v54  ;;  %1858 = vmatprep.mubr.msk.bf16.mxu1 %vm442_vm0, %v2106_v55 }
  0x7d   :  { %660 = vmatmul.mubr.bf16.gmra.mrb[44].mxu0 %v2072_v56  ;;  %788 = vmatmul.mubr.bf16.gmra.mrb[44].mxu1 %v2108_v57 }
  0x7e   :  { %1843 = vmatprep.mubr.msk.bf16.mxu0 %vm442_vm0, %v2076_v58  ;;  %1859 = vmatprep.mubr.msk.bf16.mxu1 %vm442_vm0, %v2109_v59 }
  0x85   :  { %668 = vmatmul.mubr.bf16.gmra.mrb[48].mxu0 %v2078_v60  ;;  %796 = vmatmul.mubr.bf16.gmra.mrb[48].mxu1 %v2111_v61 }
  0x86   :  { %1844 = vmatprep.mubr.msk.bf16.mxu0 %vm442_vm0, %v2082_v62  ;;  %1860 = vmatprep.mubr.msk.bf16.mxu1 %vm442_vm0, %v2112_v63 }
  0x8d   :  { %676 = vmatmul.mubr.bf16.gmra.mrb[52].mxu0 %v2084_v0  ;;  %804 = vmatmul.mubr.bf16.gmra.mrb[52].mxu1 %v2114_v1 }
  0x8e   :  { %1845 = vmatprep.mubr.msk.bf16.mxu0 %vm442_vm0, %v2088_v2  ;;  %1861 = vmatprep.mubr.msk.bf16.mxu1 %vm442_vm0, %v2115_v3 }
  0x95   :  { %684 = vmatmul.mubr.bf16.gmra.mrb[56].mxu0 %v2090_v4  ;;  %812 = vmatmul.mubr.bf16.gmra.mrb[56].mxu1 %v2117_v5 }
  0x96   :  { %1846 = vmatprep.mubr.msk.bf16.mxu0 %vm442_vm0, %v2094_v6  ;;  %1862 = vmatprep.mubr.msk.bf16.mxu1 %vm442_vm0, %v2118_v7 }
  0x9d   :  { %692 = vmatmul.mubr.bf16.gmra.mrb[60].mxu0 %v2096_v8  ;;  %820 = vmatmul.mubr.bf16.gmra.mrb[60].mxu1 %v2120_v9 }
  0xf8   :  { %v2406_v10 = vpop.f32.mrb[0].mxu0  ;;  %v2408_v11 = vpop.f32.mrb[0].mxu1 }
  0xf9   :  { %v962_v12 = vmul.f32 %v2406_v10, %v2406_v10  ;;  %v575_v13 = vpop.f32.mrb[1].mxu0  ;;  %v703_v14 = vpop.f32.mrb[1].mxu1  ;;  %v829_v17 = vsel %vm828_vm1, %v2406_v10, 0.0 }
  0xfa   :  { %v2412_v15 = vpop.f32.mrb[2].mxu0  ;;  %v2414_v16 = vpop.f32.mrb[2].mxu1 }
  0xfb   :  { %v830_v18 = vsel %vm828_vm1, %v2412_v15, 0.0  ;;  %v963_v19 = vmul.f32 %v2412_v15, %v2412_v15  ;;  %v578_v20 = vpop.f32.mrb[3].mxu0  ;;  %v706_v21 = vpop.f32.mrb[3].mxu1  ;;  %v1026_v23 = vsel %vm828_vm1, %v962_v12, 0.0 }
  0xfc   :  { %v831_v22 = vadd.f32 %v830_v18, %v829_v17 }
  0xfd   :  { %v1027_v24 = vsel %vm828_vm1, %v963_v19, 0.0 }
  0xfe   :  { %v1028_v25 = vadd.f32 %v1027_v24, %v1026_v23 }
 0x100   :  { %v2424_v26 = vpop.f32.mrb[4].mxu0  ;;  %v2426_v27 = vpop.f32.mrb[4].mxu1 }
 0x101   :  { %v832_v28 = vsel %vm828_vm1, %v2424_v26, 0.0  ;;  %v964_v29 = vmul.f32 %v2424_v26, %v2424_v26  ;;  %v583_v30 = vpop.f32.mrb[5].mxu0  ;;  %v711_v31 = vpop.f32.mrb[5].mxu1 }
 0x102   :  { %v833_v32 = vadd.f32 %v832_v28, %v831_v22  ;;  %v2432_v33 = vpop.f32.mrb[6].mxu0  ;;  %v2434_v34 = vpop.f32.mrb[6].mxu1 }
 0x103   :  { %v1029_v35 = vsel %vm828_vm1, %v964_v29, 0.0  ;;  %v834_v36 = vsel %vm828_vm1, %v2432_v33, 0.0  ;;  %v965_v37 = vmul.f32 %v2432_v33, %v2432_v33  ;;  %v586_v38 = vpop.f32.mrb[7].mxu0  ;;  %v714_v39 = vpop.f32.mrb[7].mxu1 }
 0x104   :  { %v1030_v40 = vadd.f32 %v1029_v35, %v1028_v25  ;;  %v835_v41 = vadd.f32 %v834_v36, %v833_v32 }
 0x105   :  { %v1031_v42 = vsel %vm828_vm1, %v965_v37, 0.0 }
 0x106   :  { %v1032_v43 = vadd.f32 %v1031_v42, %v1030_v40 }
 0x108   :  { %v2442_v44 = vpop.f32.mrb[8].mxu0  ;;  %v2444_v45 = vpop.f32.mrb[8].mxu1 }
 0x109   :  { %v836_v46 = vsel %vm828_vm1, %v2442_v44, 0.0  ;;  %v966_v47 = vmul.f32 %v2442_v44, %v2442_v44  ;;  %v591_v48 = vpop.f32.mrb[9].mxu0  ;;  %v719_v49 = vpop.f32.mrb[9].mxu1 }
 0x10a   :  { %v837_v50 = vadd.f32 %v836_v46, %v835_v41  ;;  %v2450_v51 = vpop.f32.mrb[10].mxu0  ;;  %v2452_v52 = vpop.f32.mrb[10].mxu1 }
 0x10b   :  { %v1033_v53 = vsel %vm828_vm1, %v966_v47, 0.0  ;;  %v838_v54 = vsel %vm828_vm1, %v2450_v51, 0.0  ;;  %v967_v55 = vmul.f32 %v2450_v51, %v2450_v51  ;;  %v594_v56 = vpop.f32.mrb[11].mxu0  ;;  %v722_v57 = vpop.f32.mrb[11].mxu1 }
 0x10c   :  { %v1034_v58 = vadd.f32 %v1033_v53, %v1032_v43  ;;  %v839_v59 = vadd.f32 %v838_v54, %v837_v50 }
 0x10d   :  { %v1035_v60 = vsel %vm828_vm1, %v967_v55, 0.0 }
 0x10e   :  { %v1036_v61 = vadd.f32 %v1035_v60, %v1034_v58 }
 0x110   :  { %v2460_v62 = vpop.f32.mrb[12].mxu0  ;;  %v2462_v63 = vpop.f32.mrb[12].mxu1 }
 0x111   :  { %v840_v0 = vsel %vm828_vm1, %v2460_v62, 0.0  ;;  %v968_v1 = vmul.f32 %v2460_v62, %v2460_v62  ;;  %v599_v2 = vpop.f32.mrb[13].mxu0  ;;  %v727_v3 = vpop.f32.mrb[13].mxu1 }
 0x112   :  { %v841_v4 = vadd.f32 %v840_v0, %v839_v59  ;;  %v2468_v5 = vpop.f32.mrb[14].mxu0  ;;  %v2470_v6 = vpop.f32.mrb[14].mxu1 }
 0x113   :  { %v1037_v7 = vsel %vm828_vm1, %v968_v1, 0.0  ;;  %v842_v8 = vsel %vm828_vm1, %v2468_v5, 0.0  ;;  %v969_v9 = vmul.f32 %v2468_v5, %v2468_v5  ;;  %v602_v12 = vpop.f32.mrb[15].mxu0  ;;  %v730_v13 = vpop.f32.mrb[15].mxu1 }
 0x114   :  { %v1038_v14 = vadd.f32 %v1037_v7, %v1036_v61  ;;  %v843_v17 = vadd.f32 %v842_v8, %v841_v4 }
 0x115   :  { %v1039_v18 = vsel %vm828_vm1, %v969_v9, 0.0 }
 0x116   :  { %v1040_v19 = vadd.f32 %v1039_v18, %v1038_v14 }
 0x118   :  { %v2478_v20 = vpop.f32.mrb[16].mxu0  ;;  %v2480_v21 = vpop.f32.mrb[16].mxu1 }
 0x119   :  { %v844_v22 = vsel %vm828_vm1, %v2478_v20, 0.0  ;;  %v970_v23 = vmul.f32 %v2478_v20, %v2478_v20  ;;  %v607_v24 = vpop.f32.mrb[17].mxu0  ;;  %v735_v25 = vpop.f32.mrb[17].mxu1 }
 0x11a   :  { %v845_v28 = vadd.f32 %v844_v22, %v843_v17  ;;  %v2486_v29 = vpop.f32.mrb[18].mxu0  ;;  %v2488_v30 = vpop.f32.mrb[18].mxu1 }
 0x11b   :  { %v1041_v31 = vsel %vm828_vm1, %v970_v23, 0.0  ;;  %v846_v32 = vsel %vm828_vm1, %v2486_v29, 0.0  ;;  %v971_v35 = vmul.f32 %v2486_v29, %v2486_v29  ;;  %v610_v36 = vpop.f32.mrb[19].mxu0  ;;  %v738_v37 = vpop.f32.mrb[19].mxu1 }
 0x11c   :  { %v1042_v38 = vadd.f32 %v1041_v31, %v1040_v19  ;;  %v847_v39 = vadd.f32 %v846_v32, %v845_v28 }
 0x11d   :  { %v1043_v40 = vsel %vm828_vm1, %v971_v35, 0.0 }
 0x11e   :  { %v1044_v41 = vadd.f32 %v1043_v40, %v1042_v38 }
 0x120   :  { %v2496_v42 = vpop.f32.mrb[20].mxu0  ;;  %v2498_v43 = vpop.f32.mrb[20].mxu1 }
 0x121   :  { %v848_v46 = vsel %vm828_vm1, %v2496_v42, 0.0  ;;  %v972_v47 = vmul.f32 %v2496_v42, %v2496_v42  ;;  %v615_v48 = vpop.f32.mrb[21].mxu0  ;;  %v743_v49 = vpop.f32.mrb[21].mxu1 }
 0x122   :  { %v849_v50 = vadd.f32 %v848_v46, %v847_v39  ;;  %v2504_v53 = vpop.f32.mrb[22].mxu0  ;;  %v2506_v54 = vpop.f32.mrb[22].mxu1 }
 0x123   :  { %v1045_v55 = vsel %vm828_vm1, %v972_v47, 0.0  ;;  %v850_v56 = vsel %vm828_vm1, %v2504_v53, 0.0  ;;  %v973_v57 = vmul.f32 %v2504_v53, %v2504_v53  ;;  %v618_v58 = vpop.f32.mrb[23].mxu0  ;;  %v746_v59 = vpop.f32.mrb[23].mxu1 }
 0x124   :  { %v1046_v60 = vadd.f32 %v1045_v55, %v1044_v41  ;;  %v851_v61 = vadd.f32 %v850_v56, %v849_v50 }
 0x125   :  { %v1047_v0 = vsel %vm828_vm1, %v973_v57, 0.0 }
 0x126   :  { %v1048_v1 = vadd.f32 %v1047_v0, %v1046_v60 }
 0x128   :  { %v2514_v2 = vpop.f32.mrb[24].mxu0  ;;  %v2516_v3 = vpop.f32.mrb[24].mxu1 }
 0x129   :  { %v852_v4 = vsel %vm828_vm1, %v2514_v2, 0.0  ;;  %v974_v7 = vmul.f32 %v2514_v2, %v2514_v2  ;;  %v623_v8 = vpop.f32.mrb[25].mxu0  ;;  %v751_v9 = vpop.f32.mrb[25].mxu1 }
 0x12a   :  { %v853_v12 = vadd.f32 %v852_v4, %v851_v61  ;;  %v2522_v13 = vpop.f32.mrb[26].mxu0  ;;  %v2524_v14 = vpop.f32.mrb[26].mxu1 }
 0x12b   :  { %v1049_v17 = vsel %vm828_vm1, %v974_v7, 0.0  ;;  %v854_v18 = vsel %vm828_vm1, %v2522_v13, 0.0  ;;  %v975_v19 = vmul.f32 %v2522_v13, %v2522_v13  ;;  %v626_v22 = vpop.f32.mrb[27].mxu0  ;;  %v754_v23 = vpop.f32.mrb[27].mxu1 }
 0x12c   :  { %v1050_v24 = vadd.f32 %v1049_v17, %v1048_v1  ;;  %v855_v25 = vadd.f32 %v854_v18, %v853_v12 }
 0x12d   :  { %v1051_v28 = vsel %vm828_vm1, %v975_v19, 0.0 }
 0x12e   :  { %v1052_v31 = vadd.f32 %v1051_v28, %v1050_v24 }
 0x130   :  { %v2532_v32 = vpop.f32.mrb[28].mxu0  ;;  %v2534_v35 = vpop.f32.mrb[28].mxu1 }
 0x131   :  { %3943 = vst [vmem:[#allocation2_spill] sm:$0xff] %v2532_v32  ;;  %v856_v36 = vsel %vm828_vm1, %v2532_v32, 0.0  ;;  %v976_v37 = vmul.f32 %v2532_v32, %v2532_v32  ;;  %v631_v38 = vpop.f32.mrb[29].mxu0  ;;  %v759_v39 = vpop.f32.mrb[29].mxu1  ;;  %v894_v32 = vsel %vm828_vm1, %v2414_v16, 0.0 }
 0x132   :  { %v857_v40 = vadd.f32 %v856_v36, %v855_v25  ;;  %v2540_v41 = vpop.f32.mrb[30].mxu0  ;;  %v2542_v46 = vpop.f32.mrb[30].mxu1 }
 0x133   :  { %3944 = vst [vmem:[#allocation3_spill] sm:$0xff] %v2540_v41  ;;  %v1053_v47 = vsel %vm828_vm1, %v976_v37, 0.0  ;;  %v858_v48 = vsel %vm828_vm1, %v2540_v41, 0.0  ;;  %v977_v49 = vmul.f32 %v2540_v41, %v2540_v41  ;;  %v634_v50 = vpop.f32.mrb[31].mxu0  ;;  %v762_v55 = vpop.f32.mrb[31].mxu1 }
 0x134   :  { %v1054_v56 = vadd.f32 %v1053_v47, %v1052_v31  ;;  %v859_v57 = vadd.f32 %v858_v48, %v857_v40 }
 0x135   :  { %v1055_v58 = vsel %vm828_vm1, %v977_v49, 0.0 }
 0x136   :  { %v1056_v59 = vadd.f32 %v1055_v58, %v1054_v56 }
 0x138   :  { %v2550_v60 = vpop.f32.mrb[32].mxu0  ;;  %v2552_v61 = vpop.f32.mrb[32].mxu1 }
 0x139   :  { %3945 = vst [vmem:[#allocation4_spill] sm:$0xff] %v2550_v60  ;;  %v860_v0 = vsel %vm828_vm1, %v2550_v60, 0.0  ;;  %v978_v1 = vmul.f32 %v2550_v60, %v2550_v60  ;;  %v639_v4 = vpop.f32.mrb[33].mxu0  ;;  %v767_v7 = vpop.f32.mrb[33].mxu1 }
 0x13a   :  { %v861_v8 = vadd.f32 %v860_v0, %v859_v57  ;;  %v2558_v9 = vpop.f32.mrb[34].mxu0  ;;  %v2560_v12 = vpop.f32.mrb[34].mxu1 }
 0x13b   :  { %3946 = vst [vmem:[#allocation5_spill] sm:$0xff] %v2558_v9  ;;  %v1057_v17 = vsel %vm828_vm1, %v978_v1, 0.0  ;;  %v862_v18 = vsel %vm828_vm1, %v2558_v9, 0.0  ;;  %v979_v19 = vmul.f32 %v2558_v9, %v2558_v9  ;;  %v642_v22 = vpop.f32.mrb[35].mxu0  ;;  %v770_v23 = vpop.f32.mrb[35].mxu1 }
 0x13c   :  { %v1058_v24 = vadd.f32 %v1057_v17, %v1056_v59  ;;  %v863_v25 = vadd.f32 %v862_v18, %v861_v8 }
 0x13d   :  { %v1059_v28 = vsel %vm828_vm1, %v979_v19, 0.0 }
 0x13e   :  { %v1060_v31 = vadd.f32 %v1059_v28, %v1058_v24 }
 0x140   :  { %v2568_v36 = vpop.f32.mrb[36].mxu0  ;;  %v2570_v37 = vpop.f32.mrb[36].mxu1 }
 0x141   :  { %3947 = vst [vmem:[#allocation6_spill] sm:$0xff] %v2568_v36  ;;  %v864_v38 = vsel %vm828_vm1, %v2568_v36, 0.0  ;;  %v980_v39 = vmul.f32 %v2568_v36, %v2568_v36  ;;  %v647_v40 = vpop.f32.mrb[37].mxu0  ;;  %v775_v47 = vpop.f32.mrb[37].mxu1 }
 0x142   :  { %v865_v48 = vadd.f32 %v864_v38, %v863_v25  ;;  %v2576_v49 = vpop.f32.mrb[38].mxu0  ;;  %v2578_v50 = vpop.f32.mrb[38].mxu1 }
 0x143   :  { %3948 = vst [vmem:[#allocation7_spill] sm:$0xff] %v2576_v49  ;;  %v1061_v55 = vsel %vm828_vm1, %v980_v39, 0.0  ;;  %v866_v56 = vsel %vm828_vm1, %v2576_v49, 0.0  ;;  %v981_v57 = vmul.f32 %v2576_v49, %v2576_v49  ;;  %v650_v58 = vpop.f32.mrb[39].mxu0  ;;  %v778_v59 = vpop.f32.mrb[39].mxu1 }
 0x144   :  { %v1062_v0 = vadd.f32 %v1061_v55, %v1060_v31  ;;  %v867_v1 = vadd.f32 %v866_v56, %v865_v48 }
 0x145   :  { %v1063_v4 = vsel %vm828_vm1, %v981_v57, 0.0 }
 0x146   :  { %v1064_v7 = vadd.f32 %v1063_v4, %v1062_v0 }
 0x148   :  { %v2586_v8 = vpop.f32.mrb[40].mxu0  ;;  %v2588_v17 = vpop.f32.mrb[40].mxu1 }
 0x149   :  { %3949 = vst [vmem:[#allocation8_spill] sm:$0xff] %v2586_v8  ;;  %v868_v18 = vsel %vm828_vm1, %v2586_v8, 0.0  ;;  %v982_v19 = vmul.f32 %v2586_v8, %v2586_v8  ;;  %v655_v22 = vpop.f32.mrb[41].mxu0  ;;  %v783_v23 = vpop.f32.mrb[41].mxu1 }
 0x14a   :  { %v869_v24 = vadd.f32 %v868_v18, %v867_v1  ;;  %v2594_v25 = vpop.f32.mrb[42].mxu0  ;;  %v2596_v28 = vpop.f32.mrb[42].mxu1 }
 0x14b   :  { %3950 = vst [vmem:[#allocation9_spill] sm:$0xff] %v2594_v25  ;;  %v1065_v31 = vsel %vm828_vm1, %v982_v19, 0.0  ;;  %v870_v38 = vsel %vm828_vm1, %v2594_v25, 0.0  ;;  %v983_v39 = vmul.f32 %v2594_v25, %v2594_v25  ;;  %v658_v40 = vpop.f32.mrb[43].mxu0  ;;  %v786_v47 = vpop.f32.mrb[43].mxu1 }
 0x14c   :  { %v1066_v48 = vadd.f32 %v1065_v31, %v1064_v7  ;;  %v871_v55 = vadd.f32 %v870_v38, %v869_v24 }
 0x14d   :  { %v1067_v56 = vsel %vm828_vm1, %v983_v39, 0.0 }
 0x14e   :  { %v1068_v57 = vadd.f32 %v1067_v56, %v1066_v48 }
 0x150   :  { %v2604_v58 = vpop.f32.mrb[44].mxu0  ;;  %v2606_v59 = vpop.f32.mrb[44].mxu1 }
 0x151   :  { %3951 = vst [vmem:[#allocation10_spill] sm:$0xff] %v2604_v58  ;;  %v872_v0 = vsel %vm828_vm1, %v2604_v58, 0.0  ;;  %v984_v1 = vmul.f32 %v2604_v58, %v2604_v58  ;;  %v663_v4 = vpop.f32.mrb[45].mxu0  ;;  %v791_v18 = vpop.f32.mrb[45].mxu1 }
 0x152   :  { %v873_v19 = vadd.f32 %v872_v0, %v871_v55  ;;  %v2612_v22 = vpop.f32.mrb[46].mxu0  ;;  %v2614_v7 = vpop.f32.mrb[46].mxu1 }
 0x153   :  { %3952 = vst [vmem:[#allocation11_spill] sm:$0xff] %v2612_v22  ;;  %v1069_v23 = vsel %vm828_vm1, %v984_v1, 0.0  ;;  %v874_v24 = vsel %vm828_vm1, %v2612_v22, 0.0  ;;  %v985_v31 = vmul.f32 %v2612_v22, %v2612_v22  ;;  %v666_v38 = vpop.f32.mrb[47].mxu0  ;;  %v794_v39 = vpop.f32.mrb[47].mxu1 }
 0x154   :  { %v1070_v40 = vadd.f32 %v1069_v23, %v1068_v57  ;;  %v875_v47 = vadd.f32 %v874_v24, %v873_v19 }
 0x155   :  { %v1071_v48 = vsel %vm828_vm1, %v985_v31, 0.0 }
 0x156   :  { %v1072_v56 = vadd.f32 %v1071_v48, %v1070_v40 }
 0x158   :  { %v2622_v55 = vpop.f32.mrb[48].mxu0  ;;  %v2624_v0 = vpop.f32.mrb[48].mxu1 }
 0x159   :  { %3953 = vst [vmem:[#allocation12_spill] sm:$0xff] %v2622_v55  ;;  %v876_v1 = vsel %vm828_vm1, %v2622_v55, 0.0  ;;  %v986_v4 = vmul.f32 %v2622_v55, %v2622_v55  ;;  %v671_v18 = vpop.f32.mrb[49].mxu0  ;;  %v799_v58 = vpop.f32.mrb[49].mxu1 }
 0x15a   :  { %v877_v22 = vadd.f32 %v876_v1, %v875_v47  ;;  %v2630_v38 = vpop.f32.mrb[50].mxu0  ;;  %v2632_v57 = vpop.f32.mrb[50].mxu1 }
 0x15b   :  { %3954 = vst [vmem:[#allocation13_spill] sm:$0xff] %v2630_v38  ;;  %3955 = vst [vmem:[#allocation14_spill] sm:$0xff] %v2632_v57  ;;  %v1073_v19 = vsel %vm828_vm1, %v986_v4, 0.0  ;;  %v878_v23 = vsel %vm828_vm1, %v2630_v38, 0.0  ;;  %v987_v24 = vmul.f32 %v2630_v38, %v2630_v38  ;;  %v674_v31 = vpop.f32.mrb[51].mxu0  ;;  %v802_v39 = vpop.f32.mrb[51].mxu1 }
 0x15c   :  { %v1074_v40 = vadd.f32 %v1073_v19, %v1072_v56  ;;  %v879_v48 = vadd.f32 %v878_v23, %v877_v22 }
 0x15d   :  { %v1075_v18 = vsel %vm828_vm1, %v987_v24, 0.0 }
 0x15e   :  { %v1076_v58 = vadd.f32 %v1075_v18, %v1074_v40 }
 0x160   :  { %v2640_v47 = vpop.f32.mrb[52].mxu0  ;;  %v2642_v1 = vpop.f32.mrb[52].mxu1 }
 0x161   :  { %3956 = vst [vmem:[#allocation15_spill] sm:$0xff] %v2640_v47  ;;  %3957 = vst [vmem:[#allocation16_spill] sm:$0xff] %v2642_v1  ;;  %v880_v4 = vsel %vm828_vm1, %v2640_v47, 0.0  ;;  %v988_v55 = vmul.f32 %v2640_v47, %v2640_v47  ;;  %v679_v25 = vpop.f32.mrb[53].mxu0  ;;  %v807_v8 = vpop.f32.mrb[53].mxu1 }
 0x162   :  { %v881_v38 = vadd.f32 %v880_v4, %v879_v48  ;;  %v2648_v31 = vpop.f32.mrb[54].mxu0  ;;  %v2650_v56 = vpop.f32.mrb[54].mxu1 }
 0x163   :  { %3958 = vst [vmem:[#allocation17_spill] sm:$0xff] %v2648_v31  ;;  %3959 = vst [vmem:[#allocation18_spill] sm:$0xff] %v2650_v56  ;;  %v1077_v22 = vsel %vm828_vm1, %v988_v55, 0.0  ;;  %v882_v19 = vsel %vm828_vm1, %v2648_v31, 0.0  ;;  %v989_v23 = vmul.f32 %v2648_v31, %v2648_v31  ;;  %v682_v24 = vpop.f32.mrb[55].mxu0  ;;  %v810_v39 = vpop.f32.mrb[55].mxu1 }
 0x164   :  { %v1078_v40 = vadd.f32 %v1077_v22, %v1076_v58  ;;  %v883_v18 = vadd.f32 %v882_v19, %v881_v38 }
 0x165   :  { %v1079_v25 = vsel %vm828_vm1, %v989_v23, 0.0 }
 0x166   :  { %v1080_v8 = vadd.f32 %v1079_v25, %v1078_v40 }
 0x168   :  { %v2658_v48 = vpop.f32.mrb[56].mxu0  ;;  %v2660_v4 = vpop.f32.mrb[56].mxu1 }
 0x169   :  { %3960 = vst [vmem:[#allocation19_spill] sm:$0xff] %v2658_v48  ;;  %3961 = vst [vmem:[#allocation20_spill] sm:$0xff] %v2660_v4  ;;  %v884_v55 = vsel %vm828_vm1, %v2658_v48, 0.0  ;;  %v990_v47 = vmul.f32 %v2658_v48, %v2658_v48  ;;  %v687_v49 = vpop.f32.mrb[57].mxu0  ;;  %v815_v36 = vpop.f32.mrb[57].mxu1 }
 0x16a   :  { %v885_v31 = vadd.f32 %v884_v55, %v883_v18  ;;  %v2666_v24 = vpop.f32.mrb[58].mxu0  ;;  %v2668_v58 = vpop.f32.mrb[58].mxu1 }
 0x16b   :  { %3962 = vst [vmem:[#allocation21_spill] sm:$0xff] %v2666_v24  ;;  %3963 = vst [vmem:[#allocation22_spill] sm:$0xff] %v2668_v58  ;;  %v1081_v38 = vsel %vm828_vm1, %v990_v47, 0.0  ;;  %v886_v22 = vsel %vm828_vm1, %v2666_v24, 0.0  ;;  %v991_v19 = vmul.f32 %v2666_v24, %v2666_v24  ;;  %v690_v23 = vpop.f32.mrb[59].mxu0  ;;  %v818_v39 = vpop.f32.mrb[59].mxu1 }
 0x16c   :  { %v1082_v40 = vadd.f32 %v1081_v38, %v1080_v8  ;;  %v887_v25 = vadd.f32 %v886_v22, %v885_v31  ;;  %v994_v31 = vmul.f32 %v2408_v11, %v2408_v11 }
 0x16d   :  { %v1083_v49 = vsel %vm828_vm1, %v991_v19, 0.0 }
 0x16e   :  { %v1084_v36 = vadd.f32 %v1083_v49, %v1082_v40  ;;  %v995_v49 = vmul.f32 %v2414_v16, %v2414_v16  ;;  %v1089_v41 = vsel %vm828_vm1, %v994_v31, 0.0 }
 0x170   :  { %v2676_v18 = vpop.f32.mrb[60].mxu0  ;;  %v2678_v55 = vpop.f32.mrb[60].mxu1 }
 0x171   :  { %3964 = vst [vmem:[#allocation23_spill] sm:$0xff] %v2676_v18  ;;  %3965 = vst [vmem:[#allocation24_spill] sm:$0xff] %v2678_v55  ;;  %v888_v47 = vsel %vm828_vm1, %v2676_v18, 0.0  ;;  %v992_v48 = vmul.f32 %v2676_v18, %v2676_v18  ;;  %v695_v9 = vpop.f32.mrb[61].mxu0  ;;  %v823_v60 = vpop.f32.mrb[61].mxu1 }
 0x172   :  { %v889_v24 = vadd.f32 %v888_v47, %v887_v25  ;;  %v2684_v23 = vpop.f32.mrb[62].mxu0  ;;  %v2686_v8 = vpop.f32.mrb[62].mxu1  ;;  %v892_v25 = vsel %vm828_vm1, %v2408_v11, 0.0 }
 0x173   :  { %v1085_v38 = vsel %vm828_vm1, %v992_v48, 0.0  ;;  %v890_v22 = vsel %vm828_vm1, %v2684_v23, 0.0  ;;  %v993_v19 = vmul.f32 %v2684_v23, %v2684_v23  ;;  %v698_v39 = vpop.f32.mrb[63].mxu0  ;;  %v826_v40 = vpop.f32.mrb[63].mxu1 }
 0x174   :  { %v1086_v9 = vadd.f32 %v1085_v38, %v1084_v36  ;;  %v891_v60 = vadd.f32 %v890_v22, %v889_v24  ;;  %v996_v39 = vmul.f32 %v2426_v27, %v2426_v27  ;;  %v1091_v38 = vsel %vm828_vm1, %v995_v49, 0.0 }
 0x175   :  { %v1087_v47 = vsel %vm828_vm1, %v993_v19, 0.0  ;;  %v896_v22 = vsel %vm828_vm1, %v2426_v27, 0.0  ;;  %v997_v19 = vmul.f32 %v2434_v34, %v2434_v34  ;;  %v900_v49 = vsel %vm828_vm1, %v2444_v45, 0.0 }
 0x176   :  { %v893_v18 = vadd.f32 %v892_v25, %v891_v60  ;;  %v1088_v48 = vadd.f32 %v1087_v47, %v1086_v9  ;;  %v1093_v31 = vsel %vm828_vm1, %v996_v39, 0.0  ;;  %v898_v60 = vsel %vm828_vm1, %v2434_v34, 0.0 }
 0x177   :  { %v998_v25 = vmul.f32 %v2444_v45, %v2444_v45  ;;  %v999_v47 = vmul.f32 %v2452_v52, %v2452_v52 }
 0x178   :  { %v895_v36 = vadd.f32 %v894_v32, %v893_v18  ;;  %v1090_v24 = vadd.f32 %v1089_v41, %v1088_v48  ;;  %v1095_v18 = vsel %vm828_vm1, %v997_v19, 0.0 }
 0x179   :  { %v1097_v39 = vsel %vm828_vm1, %v998_v25, 0.0  ;;  %v1099_v19 = vsel %vm828_vm1, %v999_v47, 0.0 }
 0x17a   :  { %v897_v40 = vadd.f32 %v896_v22, %v895_v36  ;;  %v1092_v9 = vadd.f32 %v1091_v38, %v1090_v24  ;;  %v902_v24 = vsel %vm828_vm1, %v2452_v52, 0.0  ;;  %v1000_v38 = vmul.f32 %v2462_v63, %v2462_v63 }
 0x17c   :  { %v899_v32 = vadd.f32 %v898_v60, %v897_v40  ;;  %v1094_v41 = vadd.f32 %v1093_v31, %v1092_v9  ;;  %v904_v9 = vsel %vm828_vm1, %v2462_v63, 0.0  ;;  %v1001_v31 = vmul.f32 %v2470_v6, %v2470_v6 }
 0x17d   :  { %v1101_v25 = vsel %vm828_vm1, %v1000_v38, 0.0 }
 0x17e   :  { %v901_v48 = vadd.f32 %v900_v49, %v899_v32  ;;  %v1096_v36 = vadd.f32 %v1095_v18, %v1094_v41  ;;  %v906_v41 = vsel %vm828_vm1, %v2470_v6, 0.0  ;;  %v1002_v18 = vmul.f32 %v2480_v21, %v2480_v21 }
 0x17f   :  { %v1103_v47 = vsel %vm828_vm1, %v1001_v31, 0.0 }
 0x180   :  { %v903_v22 = vadd.f32 %v902_v24, %v901_v48  ;;  %v1098_v40 = vadd.f32 %v1097_v39, %v1096_v36  ;;  %v908_v36 = vsel %vm828_vm1, %v2480_v21, 0.0  ;;  %v1003_v39 = vmul.f32 %v2488_v30, %v2488_v30 }
 0x181   :  { %v1105_v38 = vsel %vm828_vm1, %v1002_v18, 0.0 }
 0x182   :  { %v905_v60 = vadd.f32 %v904_v9, %v903_v22  ;;  %v1100_v32 = vadd.f32 %v1099_v19, %v1098_v40  ;;  %v910_v40 = vsel %vm828_vm1, %v2488_v30, 0.0  ;;  %v1004_v19 = vmul.f32 %v2498_v43, %v2498_v43 }
 0x183   :  { %v1107_v31 = vsel %vm828_vm1, %v1003_v39, 0.0 }
 0x184   :  { %v907_v49 = vadd.f32 %v906_v41, %v905_v60  ;;  %v1102_v48 = vadd.f32 %v1101_v25, %v1100_v32  ;;  %v912_v32 = vsel %vm828_vm1, %v2498_v43, 0.0  ;;  %v1005_v25 = vmul.f32 %v2506_v54, %v2506_v54 }
 0x185   :  { %v1109_v18 = vsel %vm828_vm1, %v1004_v19, 0.0 }
 0x186   :  { %v1104_v24 = vadd.f32 %v1103_v47, %v1102_v48  ;;  %v909_v22 = vadd.f32 %v908_v36, %v907_v49  ;;  %v914_v48 = vsel %vm828_vm1, %v2506_v54, 0.0  ;;  %v1006_v47 = vmul.f32 %v2516_v3, %v2516_v3 }
 0x187   :  { %v1111_v39 = vsel %vm828_vm1, %v1005_v25, 0.0 }
 0x188   :  { %v911_v9 = vadd.f32 %v910_v40, %v909_v22  ;;  %v1106_v60 = vadd.f32 %v1105_v38, %v1104_v24  ;;  %v916_v22 = vsel %vm828_vm1, %v2516_v3, 0.0  ;;  %v1007_v38 = vmul.f32 %v2524_v14, %v2524_v14 }
 0x189   :  { %v1113_v19 = vsel %vm828_vm1, %v1006_v47, 0.0 }
 0x18a   :  { %v913_v41 = vadd.f32 %v912_v32, %v911_v9  ;;  %v1108_v49 = vadd.f32 %v1107_v31, %v1106_v60  ;;  %v918_v60 = vsel %vm828_vm1, %v2524_v14, 0.0  ;;  %v1008_v31 = vmul.f32 %v2534_v35, %v2534_v35 }
 0x18b   :  { %v1115_v25 = vsel %vm828_vm1, %v1007_v38, 0.0 }
 0x18c   :  { %v915_v36 = vadd.f32 %v914_v48, %v913_v41  ;;  %v1110_v24 = vadd.f32 %v1109_v18, %v1108_v49  ;;  %v920_v49 = vsel %vm828_vm1, %v2534_v35, 0.0  ;;  %v1009_v18 = vmul.f32 %v2542_v46, %v2542_v46 }
 0x18d   :  { %v1117_v47 = vsel %vm828_vm1, %v1008_v31, 0.0 }
 0x18e   :  { %v917_v40 = vadd.f32 %v916_v22, %v915_v36  ;;  %v1112_v9 = vadd.f32 %v1111_v39, %v1110_v24  ;;  %v922_v24 = vsel %vm828_vm1, %v2542_v46, 0.0  ;;  %v1010_v39 = vmul.f32 %v2552_v61, %v2552_v61 }
 0x18f   :  { %v1119_v38 = vsel %vm828_vm1, %v1009_v18, 0.0 }
 0x190   :  { %v919_v32 = vadd.f32 %v918_v60, %v917_v40  ;;  %v1114_v41 = vadd.f32 %v1113_v19, %v1112_v9  ;;  %v924_v9 = vsel %vm828_vm1, %v2552_v61, 0.0  ;;  %v1011_v19 = vmul.f32 %v2560_v12, %v2560_v12 }
 0x191   :  { %v1121_v31 = vsel %vm828_vm1, %v1010_v39, 0.0 }
 0x192   :  { %v921_v48 = vadd.f32 %v920_v49, %v919_v32  ;;  %v1116_v36 = vadd.f32 %v1115_v25, %v1114_v41  ;;  %v926_v41 = vsel %vm828_vm1, %v2560_v12, 0.0  ;;  %v1012_v25 = vmul.f32 %v2570_v37, %v2570_v37 }
 0x193   :  { %v1123_v18 = vsel %vm828_vm1, %v1011_v19, 0.0 }
 0x194   :  { %v923_v22 = vadd.f32 %v922_v24, %v921_v48  ;;  %v1118_v40 = vadd.f32 %v1117_v47, %v1116_v36  ;;  %v928_v36 = vsel %vm828_vm1, %v2570_v37, 0.0  ;;  %v1013_v47 = vmul.f32 %v2578_v50, %v2578_v50 }
 0x195   :  { %v1125_v39 = vsel %vm828_vm1, %v1012_v25, 0.0 }
 0x196   :  { %v925_v60 = vadd.f32 %v924_v9, %v923_v22  ;;  %v1120_v32 = vadd.f32 %v1119_v38, %v1118_v40  ;;  %v930_v40 = vsel %vm828_vm1, %v2578_v50, 0.0  ;;  %v1014_v38 = vmul.f32 %v2588_v17, %v2588_v17 }
 0x197   :  { %v1127_v19 = vsel %vm828_vm1, %v1013_v47, 0.0 }
 0x198   :  { %v1122_v49 = vadd.f32 %v1121_v31, %v1120_v32  ;;  %v927_v48 = vadd.f32 %v926_v41, %v925_v60  ;;  %v932_v32 = vsel %vm828_vm1, %v2588_v17, 0.0  ;;  %v1015_v31 = vmul.f32 %v2596_v28, %v2596_v28 }
 0x199   :  { %v1129_v25 = vsel %vm828_vm1, %v1014_v38, 0.0 }
 0x19a   :  { %v1124_v24 = vadd.f32 %v1123_v18, %v1122_v49  ;;  %v929_v22 = vadd.f32 %v928_v36, %v927_v48  ;;  %v934_v48 = vsel %vm828_vm1, %v2596_v28, 0.0  ;;  %v1016_v18 = vmul.f32 %v2606_v59, %v2606_v59 }
 0x19b   :  { %v1131_v47 = vsel %vm828_vm1, %v1015_v31, 0.0 }
 0x19c   :  { %v1126_v9 = vadd.f32 %v1125_v39, %v1124_v24  ;;  %v931_v60 = vadd.f32 %v930_v40, %v929_v22  ;;  %v936_v22 = vsel %vm828_vm1, %v2606_v59, 0.0  ;;  %v1017_v39 = vmul.f32 %v2614_v7, %v2614_v7 }
 0x19d   :  { %v1133_v38 = vsel %vm828_vm1, %v1016_v18, 0.0 }
 0x19e   :  { %v1128_v41 = vadd.f32 %v1127_v19, %v1126_v9  ;;  %v933_v49 = vadd.f32 %v932_v32, %v931_v60  ;;  %v938_v60 = vsel %vm828_vm1, %v2614_v7, 0.0  ;;  %v1018_v19 = vmul.f32 %v2624_v0, %v2624_v0 }
 0x19f   :  { %v1135_v31 = vsel %vm828_vm1, %v1017_v39, 0.0 }
 0x1a0   :  { %v1130_v36 = vadd.f32 %v1129_v25, %v1128_v41  ;;  %v935_v24 = vadd.f32 %v934_v48, %v933_v49  ;;  %v940_v49 = vsel %vm828_vm1, %v2624_v0, 0.0  ;;  %v1019_v25 = vmul.f32 %v2632_v57, %v2632_v57 }
 0x1a1   :  { %v1137_v18 = vsel %vm828_vm1, %v1018_v19, 0.0 }
 0x1a2   :  { %v1132_v40 = vadd.f32 %v1131_v47, %v1130_v36  ;;  %v937_v9 = vadd.f32 %v936_v22, %v935_v24  ;;  %v942_v24 = vsel %vm828_vm1, %v2632_v57, 0.0  ;;  %v1020_v47 = vmul.f32 %v2642_v1, %v2642_v1 }
 0x1a3   :  { %v1139_v39 = vsel %vm828_vm1, %v1019_v25, 0.0 }
 0x1a4   :  { %v1134_v32 = vadd.f32 %v1133_v38, %v1132_v40  ;;  %v939_v41 = vadd.f32 %v938_v60, %v937_v9  ;;  %v944_v9 = vsel %vm828_vm1, %v2642_v1, 0.0  ;;  %v1021_v38 = vmul.f32 %v2650_v56, %v2650_v56 }
 0x1a5   :  { %v1141_v19 = vsel %vm828_vm1, %v1020_v47, 0.0 }
 0x1a6   :  { %v1136_v48 = vadd.f32 %v1135_v31, %v1134_v32  ;;  %v941_v36 = vadd.f32 %v940_v49, %v939_v41  ;;  %v946_v41 = vsel %vm828_vm1, %v2650_v56, 0.0  ;;  %v1022_v31 = vmul.f32 %v2660_v4, %v2660_v4 }
 0x1a7   :  { %v1143_v25 = vsel %vm828_vm1, %v1021_v38, 0.0 }
 0x1a8   :  { %v1138_v22 = vadd.f32 %v1137_v18, %v1136_v48  ;;  %v943_v40 = vadd.f32 %v942_v24, %v941_v36  ;;  %v948_v36 = vsel %vm828_vm1, %v2660_v4, 0.0  ;;  %v1023_v18 = vmul.f32 %v2668_v58, %v2668_v58 }
 0x1a9   :  { %v1024_v24 = vmul.f32 %v2678_v55, %v2678_v55 }
 0x1aa   :  { %v1140_v60 = vadd.f32 %v1139_v39, %v1138_v22  ;;  %v945_v32 = vadd.f32 %v944_v9, %v943_v40  ;;  %v1145_v40 = vsel %vm828_vm1, %v1022_v31, 0.0  ;;  %v950_v39 = vsel %vm828_vm1, %v2668_v58, 0.0 }
 0x1ab   :  { %v952_v9 = vsel %vm828_vm1, %v2678_v55, 0.0  ;;  %v954_v31 = vsel %vm828_vm1, %v2686_v8, 0.0 }
 0x1ac   :  { %v1142_v49 = vadd.f32 %v1141_v19, %v1140_v60  ;;  %v947_v48 = vadd.f32 %v946_v41, %v945_v32  ;;  %v1147_v32 = vsel %vm828_vm1, %v1023_v18, 0.0  ;;  %v1149_v19 = vsel %vm828_vm1, %v1024_v24, 0.0 }
 0x1ad   :  { %v1025_v41 = vmul.f32 %v2686_v8, %v2686_v8 }
 0x1ae   :  { %v1144_v47 = vadd.f32 %v1143_v25, %v1142_v49  ;;  %v949_v22 = vadd.f32 %v948_v36, %v947_v48 }
 0x1af   :  { %v1151_v36 = vsel %vm828_vm1, %v1025_v41, 0.0 }
 0x1b0   :  { %v1146_v38 = vadd.f32 %v1145_v40, %v1144_v47  ;;  %v951_v60 = vadd.f32 %v950_v39, %v949_v22 }
 0x1b2   :  { %v1148_v4 = vadd.f32 %v1147_v32, %v1146_v38  ;;  %v953_v49 = vadd.f32 %v952_v9, %v951_v60 }
 0x1b4   :  { %v1150_v48 = vadd.f32 %v1149_v19, %v1148_v4  ;;  %v955_v25 = vadd.f32 %v954_v31, %v953_v49 }
 0x1b6   :  { %v956_v58 = vrot.slane %v955_v25, 4  ;;  %v1152_v55 = vadd.f32 %v1151_v36, %v1150_v48 }
 0x1b8   :  { %v957_v47 = vadd.f32 %v956_v58, %v955_v25  ;;  %v1153_v22 = vrot.slane %v1152_v55, 4 }
 0x1ba   :  { %v958_v40 = vrot.slane %v957_v47, 2  ;;  %v1154_v18 = vadd.f32 %v1153_v22, %v1152_v55 }
 0x1bc   :  { %v959_v39 = vadd.f32 %v958_v40, %v957_v47  ;;  %v1155_v24 = vrot.slane %v1154_v18, 2 }
 0x1be   :  { %v960_v56 = vrot.slane %v959_v39, 1  ;;  %v1156_v1 = vadd.f32 %v1155_v24, %v1154_v18 }
 0x1c0   :  { %v961_v57 = vadd.f32 %v960_v56, %v959_v39  ;;  %v1157_v38 = vrot.slane %v1156_v1, 1  ;;  %v1198_v39 = vlaneseq }
 0x1c2   :  { %1169 = vrot.lane.b32.xlu1 %v961_v57, %s2124_s0  ;;  %1160 = vrot.lane.b32.xlu0 %v961_v57, %s2125_s26  ;;  %v1158_v4 = vadd.f32 %v1157_v38, %v1156_v1  ;;  %v1199_v24 = vshrl.u32 %v1198_v39, 7 }
 0x1c4   :  { %v2857_v38 = vsub.s32 0, %v1199_v24 }
 0x1c6   :  { %1173 = vrot.lane.b32.xlu1 %v1158_v4, %s2124_s0  ;;  %1165 = vrot.lane.b32.xlu0 %v1158_v4, %s2125_s26 }
 0x1ca   :  { %1181 = vrot.lane.b32.xlu1 %v1158_v4, %s2126_s27  ;;  %1177 = vrot.lane.b32.xlu0 %v961_v57, %s2126_s27 }
 0x234   :  { %v1170_v58 = vpop.permute.xlu1 %1169  ;;  %v1161_v9 = vpop.permute.xlu0 %1160 }
 0x235   :  { %v1163_v60 = vadd.f32 %v1161_v9, %v961_v57  ;;  %v1190_v57 = vld [vmem:[%s3900_s2] sm:$0x1] }
 0x236   :  { %v1194_v9 = vld [vmem:[%s3901_s3] sm:$0x1] }
 0x237   :  { %v1172_v49 = vadd.f32 %v1170_v58, %v1163_v60 }
 0x238   :  { %v1174_v55 = vpop.permute.xlu1 %1173  ;;  %v1166_v32 = vpop.permute.xlu0 %1165 }
 0x239   :  { %v1168_v19 = vadd.f32 %v1166_v32, %v1158_v4 }
 0x23b   :  { %v1176_v41 = vadd.f32 %v1174_v55, %v1168_v19 }
 0x23c   :  { %v1182_v56 = vpop.permute.xlu1 %1181  ;;  %v1178_v31 = vpop.permute.xlu0 %1177 }
 0x23d   :  { %v1184_v48 = vadd.f32 %v1182_v56, %v1176_v41  ;;  %v1180_v25 = vadd.f32 %v1178_v31, %v1172_v49 }
 0x23f   :  { %v1185_v36 = vmul.f32 0.00048828125, %v1180_v25  ;;  %v1186_v47 = vmul.f32 0.00048828125, %v1184_v48 }
 0x241   :  { %v1187_v1 = vmul.f32 %v1185_v36, %v1185_v36 }
 0x243   :  { %v1188_v22 = vsub.f32 %v1186_v47, %v1187_v1 }
 0x245   :  { %v1189_v40 = vmax.f32 %v1188_v22, 0.0 }
 0x247   :  { %v1191_v18 = vadd.f32 1e-05, %v1189_v40 }
 0x249   :  { %2121 = vrsqrt.f32 %v1191_v18 }
 0x253   :  { %v2122_v4 = vpop.eup %2121 }
 0x254   :  { %v1193_v58 = vmul.f32 %v2122_v4, %v1190_v57  ;;  %v3966_v57 = vld [vmem:[#allocation2_spill] sm:$0xff]  ;;  %v3967_v4 = vld [vmem:[#allocation3_spill] sm:$0xff] }
 0x256   :  { %v1195_v60 = vmul.f32 %v1193_v58, %v1185_v36  ;;  %v1201_v55 = vrot.slane %v1193_v58, %v2857_v38 }
 0x258   :  { %v1196_v32 = vsub.f32 %v1194_v9, %v1195_v60  ;;  %1205 = vrot.lane.b32.xlu1 %v1201_v55, %s2127_s6  ;;  %1202 = vrot.lane.b32.xlu0 %v1201_v55, %s2128_s7  ;;  %v3969_v9 = vld [vmem:[#allocation5_spill] sm:$0xff]  ;;  %v3970_v60 = vld [vmem:[#allocation6_spill] sm:$0xff] }
 0x25a   :  { %v1220_v19 = vrot.slane %v1196_v32, %v2857_v38 }
 0x25c   :  { %1208 = vrot.lane.b32.xlu0 %v1201_v55, %s2129_s8  ;;  %1221 = vrot.lane.b32.xlu1 %v1220_v19, %s2128_s7  ;;  %v3971_v55 = vld [vmem:[#allocation7_spill] sm:$0xff] }
 0x260   :  { %1224 = vrot.lane.b32.xlu0 %v1220_v19, %s2127_s6  ;;  %1227 = vrot.lane.b32.xlu1 %v1220_v19, %s2129_s8  ;;  %v3972_v19 = vld [vmem:[#allocation8_spill] sm:$0xff] }
 0x2ca   :  { %v1203_v41 = vpop.permute.xlu0 %1202  ;;  %v1206_v49 = vpop.permute.xlu1 %1205 }
 0x2cb   :  { %v1212_v56 = vsel %vm1211_vm2, %v1193_v58, %v1203_v41  ;;  %v3968_v58 = vld [vmem:[#allocation4_spill] sm:$0xff] }
 0x2cc   :  { %v1213_v31 = vsel %vm442_vm0, %v1212_v56, %v1206_v49  ;;  %v3973_v49 = vld [vmem:[#allocation9_spill] sm:$0xff] }
 0x2ce   :  { %v1209_v48 = vpop.permute.xlu0 %1208  ;;  %v1222_v47 = vpop.permute.xlu1 %1221 }
 0x2cf   :  { %v1215_v25 = vsel %vm1214_vm3, %v1213_v31, %v1209_v48  ;;  %v1230_v18 = vsel %vm1211_vm2, %v1196_v32, %v1222_v47  ;;  %v3974_v31 = vld [vmem:[#allocation10_spill] sm:$0xff] }
 0x2d0   :  { %v2867_v36 = vrot.slane %v1215_v25, %v2857_v38  ;;  %v3975_v25 = vld [vmem:[#allocation11_spill] sm:$0xff] }
 0x2d2   :  { %v2871_v1 = vmul.f32 %v2867_v36, %v2406_v10  ;;  %v2875_v22 = vmul.f32 %v2867_v36, %v2412_v15  ;;  %v2879_v40 = vmul.f32 %v2867_v36, %v2424_v26  ;;  %v2883_v39 = vmul.f32 %v2867_v36, %v2432_v33 }
 0x2d3   :  { %v2887_v24 = vmul.f32 %v2867_v36, %v2442_v44  ;;  %v2891_v10 = vmul.f32 %v2867_v36, %v2450_v51  ;;  %v2895_v15 = vmul.f32 %v2867_v36, %v2460_v62  ;;  %v2899_v26 = vmul.f32 %v2867_v36, %v2468_v5 }
 0x2d4   :  { %v2903_v33 = vmul.f32 %v2867_v36, %v2478_v20  ;;  %v2907_v44 = vmul.f32 %v2867_v36, %v2486_v29  ;;  %v2911_v51 = vmul.f32 %v2867_v36, %v2496_v42  ;;  %v2915_v62 = vmul.f32 %v2867_v36, %v2504_v53 }
 0x2d5   :  { %v2919_v5 = vmul.f32 %v2867_v36, %v2514_v2  ;;  %v2923_v20 = vmul.f32 %v2867_v36, %v2522_v13  ;;  %v2927_v29 = vmul.f32 %v2867_v36, %v3966_v57  ;;  %v2931_v42 = vmul.f32 %v2867_v36, %v3967_v4  ;;  %v3977_v57 = vld [vmem:[#allocation12_spill] sm:$0xff] }
 0x2d6   :  { %v2935_v53 = vmul.f32 %v2867_v36, %v3968_v58  ;;  %v2939_v2 = vmul.f32 %v2867_v36, %v3969_v9  ;;  %v2943_v13 = vmul.f32 %v2867_v36, %v3970_v60  ;;  %v2947_v32 = vmul.f32 %v2867_v36, %v3971_v55  ;;  %v3979_v58 = vld [vmem:[#allocation13_spill] sm:$0xff]  ;;  %v3980_v60 = vld [vmem:[#allocation15_spill] sm:$0xff] }
 0x2d7   :  { %v2951_v41 = vmul.f32 %v2867_v36, %v3972_v19  ;;  %v2955_v56 = vmul.f32 %v2867_v36, %v3973_v49  ;;  %v2959_v48 = vmul.f32 %v2867_v36, %v3974_v31  ;;  %v2963_v47 = vmul.f32 %v2867_v36, %v3975_v25  ;;  %v3981_v19 = vld [vmem:[#allocation17_spill] sm:$0xff]  ;;  %v3982_v31 = vld [vmem:[#allocation19_spill] sm:$0xff] }
 0x2d8   :  { %v2967_v4 = vmul.f32 %v2867_v36, %v3977_v57  ;;  %v2971_v9 = vmul.f32 %v2867_v36, %v3979_v58  ;;  %v2975_v55 = vmul.f32 %v2867_v36, %v3980_v60  ;;  %v2979_v49 = vmul.f32 %v2867_v36, %v3981_v19 }
 0x2d9   :  { %3976 = vst [vmem:[#allocation2_spill] sm:$0xff] %v2963_v47  ;;  %v2983_v25 = vmul.f32 %v2867_v36, %v3982_v31  ;;  %v3983_v47 = vld [vmem:[#allocation21_spill] sm:$0xff]  ;;  %v2995_v60 = vmul.f32 %v2867_v36, %v2684_v23  ;;  %v2999_v19 = vmul.f32 %v2867_v36, %v2408_v11  ;;  %v3003_v31 = vmul.f32 %v2867_v36, %v2414_v16 }
 0x2da   :  { %3978 = vst [vmem:[#allocation3_spill] sm:$0xff] %v2967_v4  ;;  %v2987_v57 = vmul.f32 %v2867_v36, %v3983_v47  ;;  %v3984_v4 = vld [vmem:[#allocation23_spill] sm:$0xff]  ;;  %v3007_v47 = vmul.f32 %v2867_v36, %v2426_v27  ;;  %v3015_v23 = vmul.f32 %v2867_v36, %v2444_v45  ;;  %v3019_v11 = vmul.f32 %v2867_v36, %v2452_v52 }
 0x2db   :  { %v2991_v58 = vmul.f32 %v2867_v36, %v3984_v4  ;;  %v3011_v4 = vmul.f32 %v2867_v36, %v2434_v34  ;;  %v3023_v16 = vmul.f32 %v2867_v36, %v2462_v63  ;;  %v3027_v27 = vmul.f32 %v2867_v36, %v2470_v6 }
 0x2dc   :  { %3985 = vst [vmem:[#allocation4_spill] sm:$0xff] %v3019_v11  ;;  %v3031_v34 = vmul.f32 %v2867_v36, %v2480_v21  ;;  %v3035_v45 = vmul.f32 %v2867_v36, %v2488_v30  ;;  %v3039_v52 = vmul.f32 %v2867_v36, %v2498_v43  ;;  %v1225_v11 = vpop.permute.xlu0 %1224  ;;  %v3043_v63 = vmul.f32 %v2867_v36, %v2506_v54 }
 0x2dd   :  { %v3047_v6 = vmul.f32 %v2867_v36, %v2516_v3  ;;  %v3051_v21 = vmul.f32 %v2867_v36, %v2524_v14  ;;  %v3055_v30 = vmul.f32 %v2867_v36, %v2534_v35  ;;  %v3059_v43 = vmul.f32 %v2867_v36, %v2542_v46 }
 0x2de   :  { %3986 = vst [vmem:[#allocation5_spill] sm:$0xff] %v3035_v45  ;;  %v1228_v45 = vpop.permute.xlu1 %1227  ;;  %v3063_v54 = vmul.f32 %v2867_v36, %v2552_v61  ;;  %v3067_v3 = vmul.f32 %v2867_v36, %v2560_v12  ;;  %v3071_v14 = vmul.f32 %v2867_v36, %v2570_v37  ;;  %v3075_v35 = vmul.f32 %v2867_v36, %v2578_v50 }
 0x2df   :  { %v3079_v46 = vmul.f32 %v2867_v36, %v2588_v17  ;;  %v3083_v61 = vmul.f32 %v2867_v36, %v2596_v28  ;;  %v3088_v12 = vmul.f32 %v2867_v36, %v2606_v59  ;;  %v3092_v37 = vmul.f32 %v2867_v36, %v2614_v7  ;;  %v3994_v59 = vld [vmem:[#allocation18_spill] sm:$0xff] }
 0x2e0   :  { %3987 = vst [vmem:[#allocation6_spill] sm:$0xff] %v3063_v54  ;;  %v1231_v54 = vsel %vm442_vm0, %v1230_v18, %v1225_v11  ;;  %v3096_v50 = vmul.f32 %v2867_v36, %v2624_v0  ;;  %v3109_v11 = vmul.f32 %v2867_v36, %v3994_v59 }
 0x2e1   :  { %3988 = vst [vmem:[#allocation7_spill] sm:$0xff] %v3079_v46  ;;  %3989 = vst [vmem:[#allocation8_spill] sm:$0xff] %v3083_v61  ;;  %v1232_v17 = vsel %vm1214_vm3, %v1231_v54, %v1228_v45  ;;  %v3991_v46 = vld [vmem:[#allocation14_spill] sm:$0xff]  ;;  %v3993_v61 = vld [vmem:[#allocation16_spill] sm:$0xff] }
 0x2e2   :  { %3990 = vst [vmem:[#allocation9_spill] sm:$0xff] %v3092_v37  ;;  %v3101_v28 = vmul.f32 %v2867_v36, %v3991_v46  ;;  %v3105_v18 = vmul.f32 %v2867_v36, %v3993_v61  ;;  %v3112_v7 = vrot.slane %v1232_v17, %v2857_v38  ;;  %v3995_v37 = vld [vmem:[#allocation20_spill] sm:$0xff]  ;;  %v3996_v45 = vld [vmem:[#allocation22_spill] sm:$0xff]  ;;  %v3128_v61 = vmul.f32 %v2867_v36, %v2686_v8 }
 0x2e3   :  { %v3116_v0 = vmul.f32 %v2867_v36, %v3995_v37  ;;  %v3120_v54 = vmul.f32 %v2867_v36, %v3996_v45  ;;  %v3997_v46 = vld [vmem:[#allocation24_spill] sm:$0xff]  ;;  %v3999_v45 = vld [vmem:[#allocation3_spill] sm:$0xff] }
 0x2e4   :  { %3992 = vst [vmem:[#allocation10_spill] sm:$0xff] %v3101_v28  ;;  %v3124_v28 = vmul.f32 %v2867_v36, %v3997_v46  ;;  %v3132_v38 = vadd.f32 %v3112_v7, %v2871_v1  ;;  %v3136_v37 = vadd.f32 %v3112_v7, %v2875_v22  ;;  %v3140_v17 = vadd.f32 %v3112_v7, %v2879_v40 }
 0x2e5   :  { %v3144_v59 = vadd.f32 %v3112_v7, %v2883_v39  ;;  %v3148_v8 = vadd.f32 %v3112_v7, %v2887_v24  ;;  %v3152_v36 = vadd.f32 %v3112_v7, %v2891_v10  ;;  %v3156_v1 = vadd.f32 %v3112_v7, %v2895_v15 }
 0x2e6   :  { %v3160_v22 = vadd.f32 %v3112_v7, %v2899_v26  ;;  %v3164_v40 = vadd.f32 %v3112_v7, %v2903_v33  ;;  %v3168_v39 = vadd.f32 %v3112_v7, %v2907_v44  ;;  %v3172_v24 = vadd.f32 %v3112_v7, %v2911_v51 }
 0x2e7   :  { %v3176_v10 = vadd.f32 %v3112_v7, %v2915_v62  ;;  %v3180_v15 = vadd.f32 %v3112_v7, %v2919_v5  ;;  %v3184_v26 = vadd.f32 %v3112_v7, %v2923_v20  ;;  %v3188_v33 = vadd.f32 %v3112_v7, %v2927_v29 }
 0x2e8   :  { %v3192_v44 = vadd.f32 %v3112_v7, %v2931_v42  ;;  %v3196_v51 = vadd.f32 %v3112_v7, %v2935_v53  ;;  %v3200_v62 = vadd.f32 %v3112_v7, %v2939_v2  ;;  %v3204_v5 = vadd.f32 %v3112_v7, %v2943_v13  ;;  %v3998_v2 = vld [vmem:[#allocation2_spill] sm:$0xff] }
 0x2e9   :  { %v3208_v20 = vadd.f32 %v3112_v7, %v2947_v32  ;;  %v3212_v29 = vadd.f32 %v3112_v7, %v2951_v41  ;;  %v3216_v42 = vadd.f32 %v3112_v7, %v2955_v56  ;;  %v3220_v53 = vadd.f32 %v3112_v7, %v2959_v48 }
 0x2ea   :  { %v3224_v13 = vadd.f32 %v3112_v7, %v3998_v2  ;;  %v3228_v32 = vadd.f32 %v3112_v7, %v3999_v45  ;;  %v3232_v41 = vadd.f32 %v3112_v7, %v2971_v9  ;;  %v3236_v56 = vadd.f32 %v3112_v7, %v2975_v55  ;;  %v4003_v45 = vld [vmem:[#allocation4_spill] sm:$0xff] }
 0x2eb   :  { %v3240_v48 = vadd.f32 %v3112_v7, %v2979_v49  ;;  %v3244_v46 = vadd.f32 %v3112_v7, %v2983_v25  ;;  %v3248_v2 = vadd.f32 %v3112_v7, %v2987_v57  ;;  %v3252_v9 = vadd.f32 %v3112_v7, %v2991_v58 }
 0x2ec   :  { %v3256_v55 = vadd.f32 %v3112_v7, %v2995_v60  ;;  %v3260_v49 = vadd.f32 %v3112_v7, %v2999_v19  ;;  %v3264_v25 = vadd.f32 %v3112_v7, %v3003_v31  ;;  %v3268_v57 = vadd.f32 %v3112_v7, %v3007_v47 }
 0x2ed   :  { %v3272_v58 = vadd.f32 %v3112_v7, %v3011_v4  ;;  %v3276_v60 = vadd.f32 %v3112_v7, %v3015_v23  ;;  %v3280_v19 = vadd.f32 %v3112_v7, %v4003_v45  ;;  %v3284_v31 = vadd.f32 %v3112_v7, %v3023_v16 }
 0x2ee   :  { %4000 = vst [vmem:[#allocation11_spill] sm:$0xff] %v3256_v55  ;;  %v3288_v47 = vadd.f32 %v3112_v7, %v3027_v27  ;;  %v3292_v4 = vadd.f32 %v3112_v7, %v3031_v34  ;;  %v3300_v45 = vadd.f32 %v3112_v7, %v3039_v52  ;;  %v3304_v16 = vadd.f32 %v3112_v7, %v3043_v63 }
 0x2ef   :  { %4001 = vst [vmem:[#allocation12_spill] sm:$0xff] %v3272_v58  ;;  %4002 = vst [vmem:[#allocation13_spill] sm:$0xff] %v3276_v60  ;;  %v4006_v58 = vld [vmem:[#allocation5_spill] sm:$0xff]  ;;  %v3308_v27 = vadd.f32 %v3112_v7, %v3047_v6  ;;  %v3312_v34 = vadd.f32 %v3112_v7, %v3051_v21  ;;  %v3320_v52 = vadd.f32 %v3112_v7, %v3059_v43 }
 0x2f0   :  { %4004 = vst [vmem:[#allocation15_spill] sm:$0xff] %v3284_v31  ;;  %4005 = vst [vmem:[#allocation17_spill] sm:$0xff] %v3292_v4  ;;  %v3296_v23 = vadd.f32 %v3112_v7, %v4006_v58  ;;  %v3316_v58 = vadd.f32 %v3112_v7, %v3055_v30  ;;  %v3328_v6 = vadd.f32 %v3112_v7, %v3067_v3 }
 0x2f1   :  { %4007 = vst [vmem:[#allocation19_spill] sm:$0xff] %v3300_v45  ;;  %4009 = vst [vmem:[#allocation23_spill] sm:$0xff] %v3320_v52  ;;  %v4010_v45 = vld [vmem:[#allocation6_spill] sm:$0xff]  ;;  %v3332_v21 = vadd.f32 %v3112_v7, %v3071_v14  ;;  %v3336_v30 = vadd.f32 %v3112_v7, %v3075_v35  ;;  %v4016_v52 = vld [vmem:[#allocation8_spill] sm:$0xff]  ;;  %v3348_v3 = vadd.f32 %v3112_v7, %v3088_v12 }
 0x2f2   :  { %4008 = vst [vmem:[#allocation21_spill] sm:$0xff] %v3316_v58  ;;  %v3324_v63 = vadd.f32 %v3112_v7, %v4010_v45  ;;  %4012 = vst [vmem:[#allocation16_spill] sm:$0xff] %v3328_v6  ;;  %v4015_v58 = vld [vmem:[#allocation7_spill] sm:$0xff]  ;;  %v3344_v45 = vadd.f32 %v3112_v7, %v4016_v52  ;;  %v4017_v6 = vld [vmem:[#allocation9_spill] sm:$0xff]  ;;  %v3356_v35 = vadd.f32 %v3112_v7, %v3096_v50 }
 0x2f3   :  { %4013 = vst [vmem:[#allocation18_spill] sm:$0xff] %v3332_v21  ;;  %4014 = vst [vmem:[#allocation20_spill] sm:$0xff] %v3336_v30  ;;  %v3340_v43 = vadd.f32 %v3112_v7, %v4015_v58  ;;  %v3352_v14 = vadd.f32 %v3112_v7, %v4017_v6  ;;  %v4018_v30 = vld [vmem:[#allocation10_spill] sm:$0xff]  ;;  %v3364_v52 = vadd.f32 %v3112_v7, %v3105_v18 }
 0x2f4   :  { %4011 = vst [vmem:[#allocation14_spill] sm:$0xff] %v3324_v63  ;;  %v3360_v58 = vadd.f32 %v3112_v7, %v4018_v30  ;;  %v3368_v12 = vadd.f32 %v3112_v7, %v3109_v11  ;;  %v3372_v6 = vadd.f32 %v3112_v7, %v3116_v0  ;;  %v3376_v50 = vadd.f32 %v3112_v7, %v3120_v54 }
 0x2f5   :  { %4019 = vst [vmem:[#allocation22_spill] sm:$0xff] %v3364_v52  ;;  %v3380_v30 = vadd.f32 %v3112_v7, %v3124_v28  ;;  %v3384_v18 = vadd.f32 %v3112_v7, %v3128_v61  ;;  %v4030_v60 = vmov %v3364_v52  ;;  %v4038_v61 = vmax.f32 %v3144_v59, 0.0 }
 0x2f6   :  { %4020 = vst [vmem:[#allocation24_spill] sm:$0xff] %v3368_v12  ;;  %4021 = vst [vmem:[#allocation2_spill] sm:$0xff] %v3372_v6  ;;  %v4031_v63 = vmov %v3368_v12  ;;  %v4032_v31 = vmov %v3372_v6  ;;  %v4033_v21 = vmov %v3376_v50  ;;  %v4035_v6 = vmax.f32 %v3132_v38, 0.0 }
 0x2f7   :  { %4022 = vst [vmem:[#allocation3_spill] sm:$0xff] %v3376_v50  ;;  %4023 = vst [vmem:[#allocation4_spill] sm:$0xff] %v3380_v30  ;;  %v4034_v4 = vmov %v3380_v30  ;;  %v4036_v50 = vmax.f32 %v3136_v37, 0.0  ;;  %v4037_v30 = vmax.f32 %v3140_v17, 0.0  ;;  %v1930_v11 = vpack.c.bf16 %v4038_v61, %v4038_v61 }
 0x2f8   :  { %v4025_v55 = vld [vmem:[#allocation19_spill] sm:$0xff]  ;;  %v1927_v52 = vpack.c.bf16 %v4035_v6, %v4035_v6  ;;  %v4039_v12 = vmax.f32 %v3148_v8, 0.0  ;;  %v4040_v38 = vmax.f32 %v3152_v36, 0.0  ;;  %v4041_v37 = vmax.f32 %v3156_v1, 0.0 }
 0x2f9   :  { %v4026_v54 = vld [vmem:[#allocation21_spill] sm:$0xff]  ;;  %v1928_v28 = vpack.c.bf16 %v4036_v50, %v4036_v50  ;;  %v1929_v7 = vpack.c.bf16 %v4037_v30, %v4037_v30  ;;  %v4042_v17 = vmax.f32 %v3160_v22, 0.0  ;;  %v4043_v59 = vmax.f32 %v3164_v40, 0.0  ;;  %1693 = vst.msk [vmem:[%s3902_s4 + $0xc] sm:$0xf] %vm1689_vm4, %v1930_v11 }
 0x2fa   :  { %v1931_v0 = vpack.c.bf16 %v4039_v12, %v4039_v12  ;;  %v1932_v6 = vpack.c.bf16 %v4040_v38, %v4040_v38  ;;  %v1933_v50 = vpack.c.bf16 %v4041_v37, %v4041_v37  ;;  %v4044_v8 = vmax.f32 %v3168_v39, 0.0  ;;  %1690 = vst.msk [vmem:[%s3902_s4] sm:$0xf] %vm1689_vm4, %v1927_v52 }
 0x2fb   :  { %v1934_v30 = vpack.c.bf16 %v4042_v17, %v4042_v17  ;;  %v1935_v61 = vpack.c.bf16 %v4043_v59, %v4043_v59  ;;  %v4045_v36 = vmax.f32 %v3172_v24, 0.0  ;;  %v4046_v1 = vmax.f32 %v3176_v10, 0.0  ;;  %1691 = vst.msk [vmem:[%s3902_s4 + $0x4] sm:$0xf] %vm1689_vm4, %v1928_v28  ;;  %1692 = vst.msk [vmem:[%s3902_s4 + $0x8] sm:$0xf] %vm1689_vm4, %v1929_v7 }
 0x2fc   :  { %v1936_v12 = vpack.c.bf16 %v4044_v8, %v4044_v8  ;;  %v4047_v22 = vmax.f32 %v3180_v15, 0.0  ;;  %v4048_v39 = vmax.f32 %v3184_v26, 0.0  ;;  %v4049_v10 = vmax.f32 %v3188_v33, 0.0  ;;  %1694 = vst.msk [vmem:[%s3902_s4 + $0x10] sm:$0xf] %vm1689_vm4, %v1931_v0 }
 0x2fd   :  { %v1937_v38 = vpack.c.bf16 %v4045_v36, %v4045_v36  ;;  %v1938_v37 = vpack.c.bf16 %v4046_v1, %v4046_v1  ;;  %v4050_v28 = vmax.f32 %v3192_v44, 0.0  ;;  %1695 = vst.msk [vmem:[%s3902_s4 + $0x14] sm:$0xf] %vm1689_vm4, %v1932_v6  ;;  %1696 = vst.msk [vmem:[%s3902_s4 + $0x18] sm:$0xf] %vm1689_vm4, %v1933_v50  ;;  %v4051_v15 = vmax.f32 %v3196_v51, 0.0 }
 0x2fe   :  { %v1939_v40 = vpack.c.bf16 %v4047_v22, %v4047_v22  ;;  %v1940_v24 = vpack.c.bf16 %v4048_v39, %v4048_v39  ;;  %v1941_v52 = vpack.c.bf16 %v4049_v10, %v4049_v10  ;;  %1697 = vst.msk [vmem:[%s3902_s4 + $0x1c] sm:$0xf] %vm1689_vm4, %v1934_v30  ;;  %v4052_v33 = vmax.f32 %v3200_v62, 0.0  ;;  %1698 = vst.msk [vmem:[%s3902_s4 + $0x20] sm:$0xf] %vm1689_vm4, %v1935_v61  ;;  %v4066_v22 = vld [vmem:[#allocation11_spill] sm:$0xff] }
 0x2ff   :  { %v1942_v7 = vpack.c.bf16 %v4050_v28, %v4050_v28  ;;  %v1943_v26 = vpack.c.bf16 %v4051_v15, %v4051_v15  ;;  %v4053_v11 = vmax.f32 %v3204_v5, 0.0  ;;  %v4054_v6 = vmax.f32 %v3208_v20, 0.0  ;;  %1699 = vst.msk [vmem:[%s3902_s4 + $0x24] sm:$0xf] %vm1689_vm4, %v1936_v12  ;;  %1700 = vst.msk [vmem:[%s3902_s4 + $0x28] sm:$0xf] %vm1689_vm4, %v1937_v38 }
 0x300   :  { %v1944_v44 = vpack.c.bf16 %v4052_v33, %v4052_v33  ;;  %1701 = vst.msk [vmem:[%s3902_s4 + $0x2c] sm:$0xf] %vm1689_vm4, %v1938_v37  ;;  %v4055_v51 = vmax.f32 %v3212_v29, 0.0  ;;  %v4056_v5 = vmax.f32 %v3216_v42, 0.0  ;;  %v4057_v17 = vmax.f32 %v3220_v53, 0.0  ;;  %v4071_v28 = vld [vmem:[#allocation12_spill] sm:$0xff] }
 0x301   :  { %v1945_v0 = vpack.c.bf16 %v4053_v11, %v4053_v11  ;;  %v1946_v50 = vpack.c.bf16 %v4054_v6, %v4054_v6  ;;  %v4058_v59 = vmax.f32 %v3224_v13, 0.0  ;;  %1702 = vst.msk [vmem:[%s3902_s4 + $0x30] sm:$0xf] %vm1689_vm4, %v1939_v40  ;;  %1703 = vst.msk [vmem:[%s3902_s4 + $0x34] sm:$0xf] %vm1689_vm4, %v1940_v24  ;;  %v4059_v29 = vmax.f32 %v3228_v32, 0.0 }
 0x302   :  { %v1947_v62 = vpack.c.bf16 %v4055_v51, %v4055_v51  ;;  %v1948_v20 = vpack.c.bf16 %v4056_v5, %v4056_v5  ;;  %v1949_v30 = vpack.c.bf16 %v4057_v17, %v4057_v17  ;;  %1704 = vst.msk [vmem:[%s3902_s4 + $0x38] sm:$0xf] %vm1689_vm4, %v1941_v52  ;;  %1705 = vst.msk [vmem:[%s3902_s4 + $0x3c] sm:$0xf] %vm1689_vm4, %v1942_v7  ;;  %v4060_v53 = vmax.f32 %v3232_v41, 0.0 }
 0x303   :  { %v1950_v61 = vpack.c.bf16 %v4058_v59, %v4058_v59  ;;  %v1951_v42 = vpack.c.bf16 %v4059_v29, %v4059_v29  ;;  %v4061_v8 = vmax.f32 %v3236_v56, 0.0  ;;  %v4062_v36 = vmax.f32 %v3240_v48, 0.0  ;;  %1706 = vst.msk [vmem:[%s3902_s4 + $0x40] sm:$0xf] %vm1689_vm4, %v1943_v26  ;;  %1707 = vst.msk [vmem:[%s3902_s4 + $0x44] sm:$0xf] %vm1689_vm4, %v1944_v44 }
 0x304   :  { %v1952_v13 = vpack.c.bf16 %v4060_v53, %v4060_v53  ;;  %1708 = vst.msk [vmem:[%s3902_s4 + $0x48] sm:$0xf] %vm1689_vm4, %v1945_v0  ;;  %1709 = vst.msk [vmem:[%s3902_s4 + $0x4c] sm:$0xf] %vm1689_vm4, %v1946_v50  ;;  %v4063_v32 = vmax.f32 %v3244_v46, 0.0  ;;  %v4064_v56 = vmax.f32 %v3248_v2, 0.0 }
 0x305   :  { %v1953_v12 = vpack.c.bf16 %v4061_v8, %v4061_v8  ;;  %v1954_v38 = vpack.c.bf16 %v4062_v36, %v4062_v36  ;;  %v4065_v1 = vmax.f32 %v3252_v9, 0.0  ;;  %v4067_v40 = vmax.f32 %v4066_v22, 0.0  ;;  %1710 = vst.msk [vmem:[%s3902_s4 + $0x50] sm:$0xf] %vm1689_vm4, %v1947_v62  ;;  %1711 = vst.msk [vmem:[%s3902_s4 + $0x54] sm:$0xf] %vm1689_vm4, %v1948_v20 }
 0x306   :  { %v1955_v41 = vpack.c.bf16 %v4063_v32, %v4063_v32  ;;  %v1956_v48 = vpack.c.bf16 %v4064_v56, %v4064_v56  ;;  %1712 = vst.msk [vmem:[%s3902_s4 + $0x58] sm:$0xf] %vm1689_vm4, %v1949_v30  ;;  %1713 = vst.msk [vmem:[%s3902_s4 + $0x5c] sm:$0xf] %vm1689_vm4, %v1950_v61  ;;  %v4068_v46 = vmax.f32 %v3260_v49, 0.0  ;;  %v4069_v9 = vmax.f32 %v3264_v25, 0.0 }
 0x307   :  { %v1957_v37 = vpack.c.bf16 %v4065_v1, %v4065_v1  ;;  %v1958_v39 = vpack.c.bf16 %v4067_v40, %v4067_v40  ;;  %v4070_v10 = vmax.f32 %v3268_v57, 0.0  ;;  %v4072_v7 = vmax.f32 %v4071_v28, 0.0  ;;  %1714 = vst.msk [vmem:[%s3902_s4 + $0x60] sm:$0xf] %vm1689_vm4, %v1951_v42  ;;  %1715 = vst.msk [vmem:[%s3902_s4 + $0x64] sm:$0xf] %vm1689_vm4, %v1952_v13 }
 0x308   :  { %v1959_v2 = vpack.c.bf16 %v4068_v46, %v4068_v46  ;;  %v1960_v24 = vpack.c.bf16 %v4069_v9, %v4069_v9  ;;  %1716 = vst.msk [vmem:[%s3902_s4 + $0x68] sm:$0xf] %vm1689_vm4, %v1953_v12  ;;  %1717 = vst.msk [vmem:[%s3902_s4 + $0x6c] sm:$0xf] %vm1689_vm4, %v1954_v38  ;;  %v4073_v49 = vld [vmem:[#allocation13_spill] sm:$0xff]  ;;  %v4075_v26 = vmax.f32 %v3280_v19, 0.0 }
 0x309   :  { %v1961_v52 = vpack.c.bf16 %v4070_v10, %v4070_v10  ;;  %v1962_v15 = vpack.c.bf16 %v4072_v7, %v4072_v7  ;;  %v4074_v25 = vmax.f32 %v4073_v49, 0.0  ;;  %v4076_v44 = vld [vmem:[#allocation15_spill] sm:$0xff]  ;;  %v4078_v6 = vmax.f32 %v3288_v47, 0.0  ;;  %1718 = vst.msk [vmem:[%s3902_s4 + $0x70] sm:$0xf] %vm1689_vm4, %v1955_v41  ;;  %v4079_v19 = vld [vmem:[#allocation17_spill] sm:$0xff] }
 0x30a   :  { %v1964_v33 = vpack.c.bf16 %v4075_v26, %v4075_v26  ;;  %v4077_v11 = vmax.f32 %v4076_v44, 0.0  ;;  %1719 = vst.msk [vmem:[%s3902_s4 + $0x74] sm:$0xf] %vm1689_vm4, %v1956_v48  ;;  %1720 = vst.msk [vmem:[%s3902_s4 + $0x78] sm:$0xf] %vm1689_vm4, %v1957_v37  ;;  %v4080_v47 = vmax.f32 %v4079_v19, 0.0 }
 0x30b   :  { %v1963_v57 = vpack.c.bf16 %v4074_v25, %v4074_v25  ;;  %v1966_v50 = vpack.c.bf16 %v4078_v6, %v4078_v6  ;;  %1721 = vst.msk [vmem:[%s3902_s4 + $0x7c] sm:$0xf] %vm1689_vm4, %v1958_v39  ;;  %v4081_v62 = vmax.f32 %v3296_v23, 0.0  ;;  %v4082_v20 = vmax.f32 %v4025_v55, 0.0  ;;  %1722 = vst.msk [vmem:[%s3902_s4 + $0x80] sm:$0xf] %vm1689_vm4, %v1959_v2 }
 0x30c   :  { %v1965_v0 = vpack.c.bf16 %v4077_v11, %v4077_v11  ;;  %v1967_v51 = vpack.c.bf16 %v4080_v47, %v4080_v47  ;;  %v4083_v30 = vmax.f32 %v3304_v16, 0.0  ;;  %1723 = vst.msk [vmem:[%s3902_s4 + $0x84] sm:$0xf] %vm1689_vm4, %v1960_v24  ;;  %1724 = vst.msk [vmem:[%s3902_s4 + $0x88] sm:$0xf] %vm1689_vm4, %v1961_v52  ;;  %v4084_v55 = vmax.f32 %v3308_v27, 0.0 }
 0x30d   :  { %v1968_v5 = vpack.c.bf16 %v4081_v62, %v4081_v62  ;;  %v1969_v17 = vpack.c.bf16 %v4082_v20, %v4082_v20  ;;  %1725 = vst.msk [vmem:[%s3902_s4 + $0x8c] sm:$0xf] %vm1689_vm4, %v1962_v15  ;;  %v4085_v16 = vmax.f32 %v3312_v34, 0.0  ;;  %v4086_v29 = vmax.f32 %v4026_v54, 0.0  ;;  %v4087_v53 = vld [vmem:[#allocation23_spill] sm:$0xff]  ;;  %v4089_v27 = vld [vmem:[#allocation14_spill] sm:$0xff] }
 0x30e   :  { %v1970_v59 = vpack.c.bf16 %v4083_v30, %v4083_v30  ;;  %v1971_v23 = vpack.c.bf16 %v4084_v55, %v4084_v55  ;;  %v4088_v13 = vmax.f32 %v4087_v53, 0.0  ;;  %1726 = vst.msk [vmem:[%s3902_s4 + $0x90] sm:$0xf] %vm1689_vm4, %v1963_v57  ;;  %1727 = vst.msk [vmem:[%s3902_s4 + $0x94] sm:$0xf] %vm1689_vm4, %v1964_v33  ;;  %v4090_v34 = vmax.f32 %v4089_v27, 0.0 }
 0x30f   :  { %v1972_v61 = vpack.c.bf16 %v4085_v16, %v4085_v16  ;;  %v1973_v42 = vpack.c.bf16 %v4086_v29, %v4086_v29  ;;  %1728 = vst.msk [vmem:[%s3902_s4 + $0x98] sm:$0xf] %vm1689_vm4, %v1965_v0  ;;  %1729 = vst.msk [vmem:[%s3902_s4 + $0x9c] sm:$0xf] %vm1689_vm4, %v1966_v50  ;;  %v4091_v12 = vld [vmem:[#allocation16_spill] sm:$0xff]  ;;  %v4093_v32 = vld [vmem:[#allocation18_spill] sm:$0xff] }
 0x310   :  { %v1974_v8 = vpack.c.bf16 %v4088_v13, %v4088_v13  ;;  %v1975_v54 = vpack.c.bf16 %v4090_v34, %v4090_v34  ;;  %v4092_v36 = vmax.f32 %v4091_v12, 0.0  ;;  %v4094_v41 = vmax.f32 %v4093_v32, 0.0  ;;  %v4095_v48 = vld [vmem:[#allocation20_spill] sm:$0xff]  ;;  %1730 = vst.msk [vmem:[%s3902_s4 + $0xa0] sm:$0xf] %vm1689_vm4, %v1967_v51 }
 0x311   :  { %v4096_v1 = vmax.f32 %v4095_v48, 0.0  ;;  %1731 = vst.msk [vmem:[%s3902_s4 + $0xa4] sm:$0xf] %vm1689_vm4, %v1968_v5  ;;  %1732 = vst.msk [vmem:[%s3902_s4 + $0xa8] sm:$0xf] %vm1689_vm4, %v1969_v17  ;;  %v4097_v22 = vmax.f32 %v3340_v43, 0.0 }
 0x312   :  { %v1976_v38 = vpack.c.bf16 %v4092_v36, %v4092_v36  ;;  %v1977_v56 = vpack.c.bf16 %v4094_v41, %v4094_v41  ;;  %1733 = vst.msk [vmem:[%s3902_s4 + $0xac] sm:$0xf] %vm1689_vm4, %v1970_v59  ;;  %v4098_v39 = vmax.f32 %v3344_v45, 0.0  ;;  %v4099_v2 = vmax.f32 %v3348_v3, 0.0  ;;  %1734 = vst.msk [vmem:[%s3902_s4 + $0xb0] sm:$0xf] %vm1689_vm4, %v1971_v23 }
 0x313   :  { %v1978_v37 = vpack.c.bf16 %v4096_v1, %v4096_v1  ;;  %v1979_v40 = vpack.c.bf16 %v4097_v22, %v4097_v22  ;;  %v4100_v24 = vmax.f32 %v3352_v14, 0.0  ;;  %1735 = vst.msk [vmem:[%s3902_s4 + $0xb4] sm:$0xf] %vm1689_vm4, %v1972_v61  ;;  %1736 = vst.msk [vmem:[%s3902_s4 + $0xb8] sm:$0xf] %vm1689_vm4, %v1973_v42  ;;  %v4101_v43 = vmax.f32 %v3356_v35, 0.0 }
 0x314   :  { %v1980_v46 = vpack.c.bf16 %v4098_v39, %v4098_v39  ;;  %v1981_v9 = vpack.c.bf16 %v4099_v2, %v4099_v2  ;;  %1737 = vst.msk [vmem:[%s3902_s4 + $0xbc] sm:$0xf] %vm1689_vm4, %v1974_v8  ;;  %v4102_v3 = vmax.f32 %v3360_v58, 0.0  ;;  %v4103_v52 = vmax.f32 %v4030_v60, 0.0  ;;  %1738 = vst.msk [vmem:[%s3902_s4 + $0xc0] sm:$0xf] %vm1689_vm4, %v1975_v54 }
 0x315   :  { %v1982_v10 = vpack.c.bf16 %v4100_v24, %v4100_v24  ;;  %v1983_v45 = vpack.c.bf16 %v4101_v43, %v4101_v43  ;;  %v4104_v7 = vmax.f32 %v4031_v63, 0.0  ;;  %1739 = vst.msk [vmem:[%s3902_s4 + $0xc4] sm:$0xf] %vm1689_vm4, %v1976_v38  ;;  %1740 = vst.msk [vmem:[%s3902_s4 + $0xc8] sm:$0xf] %vm1689_vm4, %v1977_v56  ;;  %v4105_v60 = vmax.f32 %v4032_v31, 0.0 }
 0x316   :  { %v1984_v14 = vpack.c.bf16 %v4102_v3, %v4102_v3  ;;  %v1985_v28 = vpack.c.bf16 %v4103_v52, %v4103_v52  ;;  %1741 = vst.msk [vmem:[%s3902_s4 + $0xcc] sm:$0xf] %vm1689_vm4, %v1978_v37  ;;  %v4106_v35 = vmax.f32 %v4033_v21, 0.0  ;;  %v4107_v49 = vmax.f32 %v4034_v4, 0.0  ;;  %1742 = vst.msk [vmem:[%s3902_s4 + $0xd0] sm:$0xf] %vm1689_vm4, %v1979_v40 }
 0x317   :  { %v1986_v15 = vpack.c.bf16 %v4104_v7, %v4104_v7  ;;  %v1987_v63 = vpack.c.bf16 %v4105_v60, %v4105_v60  ;;  %v4108_v57 = vmax.f32 %v3384_v18, 0.0  ;;  %1743 = vst.msk [vmem:[%s3902_s4 + $0xd4] sm:$0xf] %vm1689_vm4, %v1980_v46  ;;  %1744 = vst.msk [vmem:[%s3902_s4 + $0xd8] sm:$0xf] %vm1689_vm4, %v1981_v9 }
 0x318   :  { %v1988_v58 = vpack.c.bf16 %v4106_v35, %v4106_v35  ;;  %v1989_v25 = vpack.c.bf16 %v4107_v49, %v4107_v49  ;;  %1745 = vst.msk [vmem:[%s3902_s4 + $0xdc] sm:$0xf] %vm1689_vm4, %v1982_v10  ;;  %1746 = vst.msk [vmem:[%s3902_s4 + $0xe0] sm:$0xf] %vm1689_vm4, %v1983_v45 }
 0x319   :  { %v1990_v26 = vpack.c.bf16 %v4108_v57, %v4108_v57  ;;  %1747 = vst.msk [vmem:[%s3902_s4 + $0xe4] sm:$0xf] %vm1689_vm4, %v1984_v14  ;;  %1748 = vst.msk [vmem:[%s3902_s4 + $0xe8] sm:$0xf] %vm1689_vm4, %v1985_v28 }
 0x31a   :  { %1749 = vst.msk [vmem:[%s3902_s4 + $0xec] sm:$0xf] %vm1689_vm4, %v1986_v15  ;;  %1750 = vst.msk [vmem:[%s3902_s4 + $0xf0] sm:$0xf] %vm1689_vm4, %v1987_v63 }
 0x31b   :  { %1751 = vst.msk [vmem:[%s3902_s4 + $0xf4] sm:$0xf] %vm1689_vm4, %v1988_v58  ;;  %1752 = vst.msk [vmem:[%s3902_s4 + $0xf8] sm:$0xf] %vm1689_vm4, %v1989_v25 }
 0x31c   :  { %1753 = vst.msk [vmem:[%s3902_s4 + $0xfc] sm:$0xf] %vm1689_vm4, %v1990_v26 }

// kernel: generator_forward.9
= control target key start
LH: loop header
LB: loop body
LE: loop exit
PB: predicated region body
PF: predicated region fallthrough
CT: control target
= control target key end

     0   :  { %vm944_vm0 = vcmask 588800   ;;  %vm1329_vm1 = vcmask 1043456   ;;  %vm2646_vm2 = vcmask 97280   ;;  %s5790_s1 = inlined_call_operand.vmem [shape: bf16[72,12], index: 1, kind: input, shape index: {}]   ;;  %s5791_s0 = inlined_call_operand.vmem [shape: bf16[2048,72], index: 0, kind: input, shape index: {}]   ;;  %s5792_s2 = inlined_call_operand.vmem [shape: f32[2048,12], index: 2, kind: output, shape index: {}]  }
   0x1   :  { %v3579_v0 = vld [vmem:[%s5790_s1] sm:$0xff]   ;;  %v3580_v1 = vld [vmem:[%s5790_s1 + $0x8] sm:$0xff]   ;;  %v3581_v2 = vld [vmem:[%s5790_s1 + $0x10] sm:$0xff]  }
   0x2   :  { %3301 = vmatprep.subr.bf16.mxu0 %v3579_v0  ;;  %3567 = vmatprep.subr.bf16.mxu1 %v3579_v0  ;;  %v3584_v3 = vld [vmem:[%s5791_s0] sm:$0xff]   ;;  %v3582_v5 = vld [vmem:[%s5790_s1 + $0x18] sm:$0xff]   ;;  %v3586_v8 = vld [vmem:[%s5791_s0 + $0x8] sm:$0xff]  }
   0x3   :  { %3302 = vmatpush3.bf16.msra.mxu0 %v3579_v0  ;;  %3572 = vmatpush3.bf16.msra.mxu1 %v3579_v0  ;;  %v3585_v4 = vld [vmem:[%s5791_s0 + $0x200] sm:$0xff]   ;;  %v3587_v9 = vld [vmem:[%s5791_s0 + $0x208] sm:$0xff]   ;;  %v3588_v10 = vld [vmem:[%s5791_s0 + $0x10] sm:$0xff]  }
   0x4   :  { %3303 = vmatprep.subr.bf16.mxu0 %v3580_v1  ;;  %3568 = vmatprep.subr.bf16.mxu1 %v3580_v1  ;;  %v3583_v6 = vld [vmem:[%s5790_s1 + $0x20] ss:$0 sps:$4 sm:$0xff]   ;;  %v3589_v11 = vld [vmem:[%s5791_s0 + $0x210] sm:$0xff]   ;;  %v3590_v12 = vld [vmem:[%s5791_s0 + $0x18] sm:$0xff]  }
   0x5   :  { %3311 = vmatprep.mubr.msk.bf16.mxu0 %vm944_vm0, %v3584_v3  ;;  %3439 = vmatprep.mubr.msk.bf16.mxu1 %vm944_vm0, %v3585_v4  ;;  %v1331_v7 = vsel %vm1329_vm1, %v3583_v6, 0  ;;  %v3591_v13 = vld [vmem:[%s5791_s0 + $0x218] sm:$0xff]   ;;  %v3592_v14 = vld [vmem:[%s5791_s0 + $0x20] sm:$0xff]   ;;  %v3594_v16 = vld [vmem:[%s5791_s0 + $0x28] sm:$0xff]  }
   0x6   :  { %v3593_v15 = vld [vmem:[%s5791_s0 + $0x220] sm:$0xff]   ;;  %v3595_v17 = vld [vmem:[%s5791_s0 + $0x228] sm:$0xff]   ;;  %v3596_v18 = vld [vmem:[%s5791_s0 + $0x30] sm:$0xff]  }
   0x7   :  { %3304 = vmatpush3.bf16.msra.mxu0 %v3580_v1  ;;  %3573 = vmatpush3.bf16.msra.mxu1 %v3580_v1  ;;  %v3597_v19 = vld [vmem:[%s5791_s0 + $0x230] sm:$0xff]   ;;  %v3598_v20 = vld [vmem:[%s5791_s0 + $0x38] sm:$0xff]   ;;  %v3600_v22 = vld [vmem:[%s5791_s0 + $0x40] sm:$0xff]  }
   0x8   :  { %3305 = vmatprep.subr.bf16.mxu0 %v3581_v2  ;;  %3569 = vmatprep.subr.bf16.mxu1 %v3581_v2  ;;  %v3599_v21 = vld [vmem:[%s5791_s0 + $0x238] sm:$0xff]   ;;  %v3601_v23 = vld [vmem:[%s5791_s0 + $0x240] sm:$0xff]   ;;  %v3602_v24 = vld [vmem:[%s5791_s0 + $0x48] sm:$0xff]  }
   0x9   :  { %v3603_v25 = vld [vmem:[%s5791_s0 + $0x248] sm:$0xff]   ;;  %v3604_v26 = vld [vmem:[%s5791_s0 + $0x50] sm:$0xff]   ;;  %v3606_v28 = vld [vmem:[%s5791_s0 + $0x58] sm:$0xff]  }
   0xa   :  { %v3605_v27 = vld [vmem:[%s5791_s0 + $0x250] sm:$0xff]   ;;  %v3607_v29 = vld [vmem:[%s5791_s0 + $0x258] sm:$0xff]   ;;  %v3608_v30 = vld [vmem:[%s5791_s0 + $0x60] sm:$0xff]  }
   0xb   :  { %3306 = vmatpush3.bf16.msra.mxu0 %v3581_v2  ;;  %3574 = vmatpush3.bf16.msra.mxu1 %v3581_v2  ;;  %v3609_v31 = vld [vmem:[%s5791_s0 + $0x260] sm:$0xff]   ;;  %v3610_v32 = vld [vmem:[%s5791_s0 + $0x68] sm:$0xff]   ;;  %v3612_v34 = vld [vmem:[%s5791_s0 + $0x70] sm:$0xff]  }
   0xc   :  { %3307 = vmatprep.subr.bf16.mxu0 %v3582_v5  ;;  %3570 = vmatprep.subr.bf16.mxu1 %v3582_v5  ;;  %v3611_v33 = vld [vmem:[%s5791_s0 + $0x268] sm:$0xff]   ;;  %v3613_v35 = vld [vmem:[%s5791_s0 + $0x270] sm:$0xff]   ;;  %v3614_v36 = vld [vmem:[%s5791_s0 + $0x78] sm:$0xff]  }
   0xd   :  { %v3615_v37 = vld [vmem:[%s5791_s0 + $0x278] sm:$0xff]   ;;  %v3616_v38 = vld [vmem:[%s5791_s0 + $0x80] sm:$0xff]   ;;  %v3618_v40 = vld [vmem:[%s5791_s0 + $0x88] sm:$0xff]  }
   0xe   :  { %v3617_v39 = vld [vmem:[%s5791_s0 + $0x280] sm:$0xff]   ;;  %v3619_v41 = vld [vmem:[%s5791_s0 + $0x288] sm:$0xff]   ;;  %v3620_v42 = vld [vmem:[%s5791_s0 + $0x90] sm:$0xff]  }
   0xf   :  { %3308 = vmatpush3.bf16.msra.mxu0 %v3582_v5  ;;  %3575 = vmatpush3.bf16.msra.mxu1 %v3582_v5  ;;  %v3621_v43 = vld [vmem:[%s5791_s0 + $0x290] sm:$0xff]   ;;  %v3622_v44 = vld [vmem:[%s5791_s0 + $0x98] sm:$0xff]   ;;  %v3624_v46 = vld [vmem:[%s5791_s0 + $0xa0] sm:$0xff]  }
  0x10   :  { %3577 = vmatprep.subr.msk.bf16.mxu0 %vm1329_vm1, %v3583_v6  ;;  %3578 = vmatprep.subr.msk.bf16.mxu1 %vm1329_vm1, %v3583_v6  ;;  %v3623_v45 = vld [vmem:[%s5791_s0 + $0x298] sm:$0xff]   ;;  %v3625_v47 = vld [vmem:[%s5791_s0 + $0x2a0] sm:$0xff]   ;;  %v3626_v48 = vld [vmem:[%s5791_s0 + $0xa8] sm:$0xff]  }
  0x11   :  { %v3627_v49 = vld [vmem:[%s5791_s0 + $0x2a8] sm:$0xff]   ;;  %v3628_v50 = vld [vmem:[%s5791_s0 + $0xb0] sm:$0xff]   ;;  %v3630_v52 = vld [vmem:[%s5791_s0 + $0xb8] sm:$0xff]  }
  0x12   :  { %v3629_v51 = vld [vmem:[%s5791_s0 + $0x2b0] sm:$0xff]   ;;  %v3631_v53 = vld [vmem:[%s5791_s0 + $0x2b8] sm:$0xff]   ;;  %v3632_v54 = vld [vmem:[%s5791_s0 + $0xc0] sm:$0xff]  }
  0x13   :  { %3310 = vmatpush3.bf16.msra.mxu0 %v1331_v7  ;;  %3576 = vmatpush3.bf16.msra.mxu1 %v1331_v7  ;;  %v3633_v55 = vld [vmem:[%s5791_s0 + $0x2c0] sm:$0xff]   ;;  %v3634_v56 = vld [vmem:[%s5791_s0 + $0xc8] sm:$0xff]   ;;  %v3636_v58 = vld [vmem:[%s5791_s0 + $0xd0] sm:$0xff]  }
  0x14   :  { %v3635_v57 = vld [vmem:[%s5791_s0 + $0x2c8] sm:$0xff]   ;;  %v3637_v59 = vld [vmem:[%s5791_s0 + $0x2d0] sm:$0xff]   ;;  %v3638_v60 = vld [vmem:[%s5791_s0 + $0xd8] sm:$0xff]  }
  0x15   :  { %v3639_v61 = vld [vmem:[%s5791_s0 + $0x2d8] sm:$0xff]   ;;  %v3640_v62 = vld [vmem:[%s5791_s0 + $0xe0] sm:$0xff]   ;;  %v3642_v0 = vld [vmem:[%s5791_s0 + $0xe8] sm:$0xff]  }
  0x16   :  { %3312 = vmatmul.mubr.msk.bf16.vlgmr.msra.gmra.mrb[0].mxu0 %vm944_vm0, %v3586_v8  ;;  %3440 = vmatmul.mubr.msk.bf16.vlgmr.msra.gmra.mrb[0].mxu1 %vm944_vm0, %v3587_v9  ;;  %v3641_v63 = vld [vmem:[%s5791_s0 + $0x2e0] sm:$0xff]   ;;  %v3643_v1 = vld [vmem:[%s5791_s0 + $0x2e8] sm:$0xff]   ;;  %v3644_v2 = vld [vmem:[%s5791_s0 + $0xf0] sm:$0xff]  }
  0x17   :  { %3315 = vmatprep.mubr.msk.bf16.mxu0 %vm944_vm0, %v3588_v10  ;;  %3443 = vmatprep.mubr.msk.bf16.mxu1 %vm944_vm0, %v3589_v11  ;;  %v3645_v3 = vld [vmem:[%s5791_s0 + $0x2f0] sm:$0xff]   ;;  %v3646_v4 = vld [vmem:[%s5791_s0 + $0xf8] sm:$0xff]   ;;  %v3648_v6 = vld [vmem:[%s5791_s0 + $0x100] sm:$0xff]  }
  0x18   :  { %v3647_v5 = vld [vmem:[%s5791_s0 + $0x2f8] sm:$0xff]   ;;  %v3649_v7 = vld [vmem:[%s5791_s0 + $0x300] sm:$0xff]   ;;  %v3650_v8 = vld [vmem:[%s5791_s0 + $0x108] sm:$0xff]  }
  0x19   :  { %v3651_v9 = vld [vmem:[%s5791_s0 + $0x308] sm:$0xff]   ;;  %v3652_v10 = vld [vmem:[%s5791_s0 + $0x110] sm:$0xff]  }
  0x1a   :  { %v3653_v11 = vld [vmem:[%s5791_s0 + $0x310] sm:$0xff]  }
  0x1e   :  { %3316 = vmatmul.mubr.msk.bf16.gmra.mrb[4].mxu0 %vm944_vm0, %v3590_v12  ;;  %3444 = vmatmul.mubr.msk.bf16.gmra.mrb[4].mxu1 %vm944_vm0, %v3591_v13  ;;  %v3654_v12 = vld [vmem:[%s5791_s0 + $0x118] sm:$0xff]  }
  0x1f   :  { %3319 = vmatprep.mubr.msk.bf16.mxu0 %vm944_vm0, %v3592_v14  ;;  %3447 = vmatprep.mubr.msk.bf16.mxu1 %vm944_vm0, %v3593_v15  ;;  %v3655_v13 = vld [vmem:[%s5791_s0 + $0x318] sm:$0xff]   ;;  %v3656_v14 = vld [vmem:[%s5791_s0 + $0x120] sm:$0xff]  }
  0x20   :  { %v3657_v15 = vld [vmem:[%s5791_s0 + $0x320] sm:$0xff]  }
  0x26   :  { %3320 = vmatmul.mubr.msk.bf16.gmra.mrb[8].mxu0 %vm944_vm0, %v3594_v16  ;;  %3448 = vmatmul.mubr.msk.bf16.gmra.mrb[8].mxu1 %vm944_vm0, %v3595_v17  ;;  %v3658_v16 = vld [vmem:[%s5791_s0 + $0x128] sm:$0xff]  }
  0x27   :  { %3323 = vmatprep.mubr.msk.bf16.mxu0 %vm944_vm0, %v3596_v18  ;;  %3451 = vmatprep.mubr.msk.bf16.mxu1 %vm944_vm0, %v3597_v19  ;;  %v3659_v17 = vld [vmem:[%s5791_s0 + $0x328] sm:$0xff]   ;;  %v3660_v18 = vld [vmem:[%s5791_s0 + $0x130] sm:$0xff]  }
  0x28   :  { %v3661_v19 = vld [vmem:[%s5791_s0 + $0x330] sm:$0xff]  }
  0x2e   :  { %3324 = vmatmul.mubr.msk.bf16.gmra.mrb[12].mxu0 %vm944_vm0, %v3598_v20  ;;  %3452 = vmatmul.mubr.msk.bf16.gmra.mrb[12].mxu1 %vm944_vm0, %v3599_v21  ;;  %v3662_v20 = vld [vmem:[%s5791_s0 + $0x138] sm:$0xff]  }
  0x2f   :  { %3327 = vmatprep.mubr.msk.bf16.mxu0 %vm944_vm0, %v3600_v22  ;;  %3455 = vmatprep.mubr.msk.bf16.mxu1 %vm944_vm0, %v3601_v23  ;;  %v3663_v21 = vld [vmem:[%s5791_s0 + $0x338] sm:$0xff]   ;;  %v3664_v22 = vld [vmem:[%s5791_s0 + $0x140] sm:$0xff]  }
  0x30   :  { %v3665_v23 = vld [vmem:[%s5791_s0 + $0x340] sm:$0xff]  }
  0x36   :  { %3328 = vmatmul.mubr.msk.bf16.gmra.mrb[16].mxu0 %vm944_vm0, %v3602_v24  ;;  %3456 = vmatmul.mubr.msk.bf16.gmra.mrb[16].mxu1 %vm944_vm0, %v3603_v25  ;;  %v3666_v24 = vld [vmem:[%s5791_s0 + $0x148] sm:$0xff]  }
  0x37   :  { %3331 = vmatprep.mubr.msk.bf16.mxu0 %vm944_vm0, %v3604_v26  ;;  %3459 = vmatprep.mubr.msk.bf16.mxu1 %vm944_vm0, %v3605_v27  ;;  %v3667_v25 = vld [vmem:[%s5791_s0 + $0x348] sm:$0xff]   ;;  %v3668_v26 = vld [vmem:[%s5791_s0 + $0x150] sm:$0xff]  }
  0x38   :  { %v3669_v27 = vld [vmem:[%s5791_s0 + $0x350] sm:$0xff]  }
  0x3e   :  { %3332 = vmatmul.mubr.msk.bf16.gmra.mrb[20].mxu0 %vm944_vm0, %v3606_v28  ;;  %3460 = vmatmul.mubr.msk.bf16.gmra.mrb[20].mxu1 %vm944_vm0, %v3607_v29  ;;  %v3670_v28 = vld [vmem:[%s5791_s0 + $0x158] sm:$0xff]  }
  0x3f   :  { %3335 = vmatprep.mubr.msk.bf16.mxu0 %vm944_vm0, %v3608_v30  ;;  %3463 = vmatprep.mubr.msk.bf16.mxu1 %vm944_vm0, %v3609_v31  ;;  %v3671_v29 = vld [vmem:[%s5791_s0 + $0x358] sm:$0xff]   ;;  %v3672_v30 = vld [vmem:[%s5791_s0 + $0x160] sm:$0xff]  }
  0x40   :  { %v3673_v31 = vld [vmem:[%s5791_s0 + $0x360] sm:$0xff]  }
  0x46   :  { %3336 = vmatmul.mubr.msk.bf16.gmra.mrb[24].mxu0 %vm944_vm0, %v3610_v32  ;;  %3464 = vmatmul.mubr.msk.bf16.gmra.mrb[24].mxu1 %vm944_vm0, %v3611_v33  ;;  %v3674_v32 = vld [vmem:[%s5791_s0 + $0x168] sm:$0xff]  }
  0x47   :  { %3339 = vmatprep.mubr.msk.bf16.mxu0 %vm944_vm0, %v3612_v34  ;;  %3467 = vmatprep.mubr.msk.bf16.mxu1 %vm944_vm0, %v3613_v35  ;;  %v3675_v33 = vld [vmem:[%s5791_s0 + $0x368] sm:$0xff]   ;;  %v3676_v34 = vld [vmem:[%s5791_s0 + $0x170] sm:$0xff]  }
  0x48   :  { %v3677_v35 = vld [vmem:[%s5791_s0 + $0x370] sm:$0xff]  }
  0x4e   :  { %3340 = vmatmul.mubr.msk.bf16.gmra.mrb[28].mxu0 %vm944_vm0, %v3614_v36  ;;  %3468 = vmatmul.mubr.msk.bf16.gmra.mrb[28].mxu1 %vm944_vm0, %v3615_v37  ;;  %v3678_v36 = vld [vmem:[%s5791_s0 + $0x178] sm:$0xff]  }
  0x4f   :  { %3343 = vmatprep.mubr.msk.bf16.mxu0 %vm944_vm0, %v3616_v38  ;;  %3471 = vmatprep.mubr.msk.bf16.mxu1 %vm944_vm0, %v3617_v39  ;;  %v3679_v37 = vld [vmem:[%s5791_s0 + $0x378] sm:$0xff]   ;;  %v3680_v38 = vld [vmem:[%s5791_s0 + $0x180] sm:$0xff]  }
  0x50   :  { %v3681_v39 = vld [vmem:[%s5791_s0 + $0x380] sm:$0xff]  }
  0x56   :  { %3344 = vmatmul.mubr.msk.bf16.gmra.mrb[32].mxu0 %vm944_vm0, %v3618_v40  ;;  %3472 = vmatmul.mubr.msk.bf16.gmra.mrb[32].mxu1 %vm944_vm0, %v3619_v41  ;;  %v3682_v40 = vld [vmem:[%s5791_s0 + $0x188] sm:$0xff]  }
  0x57   :  { %3347 = vmatprep.mubr.msk.bf16.mxu0 %vm944_vm0, %v3620_v42  ;;  %3475 = vmatprep.mubr.msk.bf16.mxu1 %vm944_vm0, %v3621_v43  ;;  %v3683_v41 = vld [vmem:[%s5791_s0 + $0x388] sm:$0xff]   ;;  %v3684_v42 = vld [vmem:[%s5791_s0 + $0x190] sm:$0xff]  }
  0x58   :  { %v3685_v43 = vld [vmem:[%s5791_s0 + $0x390] sm:$0xff]  }
  0x5e   :  { %3348 = vmatmul.mubr.msk.bf16.gmra.mrb[36].mxu0 %vm944_vm0, %v3622_v44  ;;  %3476 = vmatmul.mubr.msk.bf16.gmra.mrb[36].mxu1 %vm944_vm0, %v3623_v45  ;;  %v3686_v44 = vld [vmem:[%s5791_s0 + $0x198] sm:$0xff]  }
  0x5f   :  { %3351 = vmatprep.mubr.msk.bf16.mxu0 %vm944_vm0, %v3624_v46  ;;  %3479 = vmatprep.mubr.msk.bf16.mxu1 %vm944_vm0, %v3625_v47  ;;  %v3687_v45 = vld [vmem:[%s5791_s0 + $0x398] sm:$0xff]   ;;  %v3688_v46 = vld [vmem:[%s5791_s0 + $0x1a0] sm:$0xff]  }
  0x60   :  { %v3689_v47 = vld [vmem:[%s5791_s0 + $0x3a0] sm:$0xff]  }
  0x66   :  { %3352 = vmatmul.mubr.msk.bf16.gmra.mrb[40].mxu0 %vm944_vm0, %v3626_v48  ;;  %3480 = vmatmul.mubr.msk.bf16.gmra.mrb[40].mxu1 %vm944_vm0, %v3627_v49  ;;  %v3690_v48 = vld [vmem:[%s5791_s0 + $0x1a8] sm:$0xff]  }
  0x67   :  { %3355 = vmatprep.mubr.msk.bf16.mxu0 %vm944_vm0, %v3628_v50  ;;  %3483 = vmatprep.mubr.msk.bf16.mxu1 %vm944_vm0, %v3629_v51  ;;  %v3691_v49 = vld [vmem:[%s5791_s0 + $0x3a8] sm:$0xff]   ;;  %v3692_v50 = vld [vmem:[%s5791_s0 + $0x1b0] sm:$0xff]  }
  0x68   :  { %v3693_v51 = vld [vmem:[%s5791_s0 + $0x3b0] sm:$0xff]  }
  0x6e   :  { %3356 = vmatmul.mubr.msk.bf16.gmra.mrb[44].mxu0 %vm944_vm0, %v3630_v52  ;;  %3484 = vmatmul.mubr.msk.bf16.gmra.mrb[44].mxu1 %vm944_vm0, %v3631_v53 }
  0x6f   :  { %3359 = vmatprep.mubr.msk.bf16.mxu0 %vm944_vm0, %v3632_v54  ;;  %3487 = vmatprep.mubr.msk.bf16.mxu1 %vm944_vm0, %v3633_v55 }
  0x76   :  { %3360 = vmatmul.mubr.msk.bf16.gmra.mrb[48].mxu0 %vm944_vm0, %v3634_v56  ;;  %3488 = vmatmul.mubr.msk.bf16.gmra.mrb[48].mxu1 %vm944_vm0, %v3635_v57  ;;  %v3694_v56 = vld [vmem:[%s5791_s0 + $0x1b8] sm:$0xff]  }
  0x77   :  { %3363 = vmatprep.mubr.msk.bf16.mxu0 %vm944_vm0, %v3636_v58  ;;  %3491 = vmatprep.mubr.msk.bf16.mxu1 %vm944_vm0, %v3637_v59  ;;  %v3695_v57 = vld [vmem:[%s5791_s0 + $0x3b8] sm:$0xff]  }
  0x7e   :  { %3364 = vmatmul.mubr.msk.bf16.gmra.mrb[52].mxu0 %vm944_vm0, %v3638_v60  ;;  %3492 = vmatmul.mubr.msk.bf16.gmra.mrb[52].mxu1 %vm944_vm0, %v3639_v61  ;;  %v3696_v60 = vld [vmem:[%s5791_s0 + $0x1c0] sm:$0xff]  }
  0x7f   :  { %3367 = vmatprep.mubr.msk.bf16.mxu0 %vm944_vm0, %v3640_v62  ;;  %3495 = vmatprep.mubr.msk.bf16.mxu1 %vm944_vm0, %v3641_v63  ;;  %v3697_v61 = vld [vmem:[%s5791_s0 + $0x3c0] sm:$0xff]  }
  0x86   :  { %3368 = vmatmul.mubr.msk.bf16.gmra.mrb[56].mxu0 %vm944_vm0, %v3642_v0  ;;  %3496 = vmatmul.mubr.msk.bf16.gmra.mrb[56].mxu1 %vm944_vm0, %v3643_v1 }
  0x87   :  { %3371 = vmatprep.mubr.msk.bf16.mxu0 %vm944_vm0, %v3644_v2  ;;  %3499 = vmatprep.mubr.msk.bf16.mxu1 %vm944_vm0, %v3645_v3 }
  0x8e   :  { %3372 = vmatmul.mubr.msk.bf16.gmra.mrb[60].mxu0 %vm944_vm0, %v3646_v4  ;;  %3500 = vmatmul.mubr.msk.bf16.gmra.mrb[60].mxu1 %vm944_vm0, %v3647_v5  ;;  %v3698_v4 = vld [vmem:[%s5791_s0 + $0x1c8] sm:$0xff]  }
  0x8f   :  { %3375 = vmatprep.mubr.msk.bf16.mxu0 %vm944_vm0, %v3648_v6  ;;  %3503 = vmatprep.mubr.msk.bf16.mxu1 %vm944_vm0, %v3649_v7  ;;  %v3699_v5 = vld [vmem:[%s5791_s0 + $0x3c8] sm:$0xff]  }
  0x96   :  { %3376 = vmatmul.mubr.msk.bf16.gmra.mrb[64].mxu0 %vm944_vm0, %v3650_v8  ;;  %3504 = vmatmul.mubr.msk.bf16.gmra.mrb[64].mxu1 %vm944_vm0, %v3651_v9  ;;  %v3700_v8 = vld [vmem:[%s5791_s0 + $0x1d0] sm:$0xff]  }
  0x97   :  { %3379 = vmatprep.mubr.msk.bf16.mxu0 %vm944_vm0, %v3652_v10  ;;  %3507 = vmatprep.mubr.msk.bf16.mxu1 %vm944_vm0, %v3653_v11  ;;  %v3701_v9 = vld [vmem:[%s5791_s0 + $0x3d0] sm:$0xff]  }
  0x9e   :  { %3380 = vmatmul.mubr.msk.bf16.gmra.mrb[68].mxu0 %vm944_vm0, %v3654_v12  ;;  %3508 = vmatmul.mubr.msk.bf16.gmra.mrb[68].mxu1 %vm944_vm0, %v3655_v13 }
  0x9f   :  { %3383 = vmatprep.mubr.msk.bf16.mxu0 %vm944_vm0, %v3656_v14  ;;  %3511 = vmatprep.mubr.msk.bf16.mxu1 %vm944_vm0, %v3657_v15 }
  0xa6   :  { %3384 = vmatmul.mubr.msk.bf16.gmra.mrb[72].mxu0 %vm944_vm0, %v3658_v16  ;;  %3512 = vmatmul.mubr.msk.bf16.gmra.mrb[72].mxu1 %vm944_vm0, %v3659_v17 }
  0xa7   :  { %3387 = vmatprep.mubr.msk.bf16.mxu0 %vm944_vm0, %v3660_v18  ;;  %3515 = vmatprep.mubr.msk.bf16.mxu1 %vm944_vm0, %v3661_v19 }
  0xae   :  { %3388 = vmatmul.mubr.msk.bf16.gmra.mrb[76].mxu0 %vm944_vm0, %v3662_v20  ;;  %3516 = vmatmul.mubr.msk.bf16.gmra.mrb[76].mxu1 %vm944_vm0, %v3663_v21 }
  0xaf   :  { %3391 = vmatprep.mubr.msk.bf16.mxu0 %vm944_vm0, %v3664_v22  ;;  %3519 = vmatprep.mubr.msk.bf16.mxu1 %vm944_vm0, %v3665_v23  ;;  %v3702_v23 = vld [vmem:[%s5791_s0 + $0x1d8] sm:$0xff]  }
  0xb6   :  { %3392 = vmatmul.mubr.msk.bf16.gmra.mrb[80].mxu0 %vm944_vm0, %v3666_v24  ;;  %3520 = vmatmul.mubr.msk.bf16.gmra.mrb[80].mxu1 %vm944_vm0, %v3667_v25  ;;  %v3703_v24 = vld [vmem:[%s5791_s0 + $0x3d8] sm:$0xff]  }
  0xb7   :  { %3395 = vmatprep.mubr.msk.bf16.mxu0 %vm944_vm0, %v3668_v26  ;;  %3523 = vmatprep.mubr.msk.bf16.mxu1 %vm944_vm0, %v3669_v27 }
  0xbe   :  { %3396 = vmatmul.mubr.msk.bf16.gmra.mrb[84].mxu0 %vm944_vm0, %v3670_v28  ;;  %3524 = vmatmul.mubr.msk.bf16.gmra.mrb[84].mxu1 %vm944_vm0, %v3671_v29  ;;  %v3704_v28 = vld [vmem:[%s5791_s0 + $0x1e0] sm:$0xff]  }
  0xbf   :  { %3399 = vmatprep.mubr.msk.bf16.mxu0 %vm944_vm0, %v3672_v30  ;;  %3527 = vmatprep.mubr.msk.bf16.mxu1 %vm944_vm0, %v3673_v31  ;;  %v3705_v29 = vld [vmem:[%s5791_s0 + $0x3e0] sm:$0xff]  }
  0xc6   :  { %3400 = vmatmul.mubr.msk.bf16.gmra.mrb[88].mxu0 %vm944_vm0, %v3674_v32  ;;  %3528 = vmatmul.mubr.msk.bf16.gmra.mrb[88].mxu1 %vm944_vm0, %v3675_v33 }
  0xc7   :  { %3403 = vmatprep.mubr.msk.bf16.mxu0 %vm944_vm0, %v3676_v34  ;;  %3531 = vmatprep.mubr.msk.bf16.mxu1 %vm944_vm0, %v3677_v35 }
  0xce   :  { %3404 = vmatmul.mubr.msk.bf16.gmra.mrb[92].mxu0 %vm944_vm0, %v3678_v36  ;;  %3532 = vmatmul.mubr.msk.bf16.gmra.mrb[92].mxu1 %vm944_vm0, %v3679_v37 }
  0xcf   :  { %3407 = vmatprep.mubr.msk.bf16.mxu0 %vm944_vm0, %v3680_v38  ;;  %3535 = vmatprep.mubr.msk.bf16.mxu1 %vm944_vm0, %v3681_v39 }
  0xd6   :  { %3408 = vmatmul.mubr.msk.bf16.gmra.mrb[96].mxu0 %vm944_vm0, %v3682_v40  ;;  %3536 = vmatmul.mubr.msk.bf16.gmra.mrb[96].mxu1 %vm944_vm0, %v3683_v41 }
  0xd7   :  { %3411 = vmatprep.mubr.msk.bf16.mxu0 %vm944_vm0, %v3684_v42  ;;  %3539 = vmatprep.mubr.msk.bf16.mxu1 %vm944_vm0, %v3685_v43  ;;  %v3706_v43 = vld [vmem:[%s5791_s0 + $0x1e8] sm:$0xff]  }
  0xde   :  { %3412 = vmatmul.mubr.msk.bf16.gmra.mrb[100].mxu0 %vm944_vm0, %v3686_v44  ;;  %3540 = vmatmul.mubr.msk.bf16.gmra.mrb[100].mxu1 %vm944_vm0, %v3687_v45  ;;  %v3707_v44 = vld [vmem:[%s5791_s0 + $0x3e8] sm:$0xff]  }
  0xdf   :  { %3415 = vmatprep.mubr.msk.bf16.mxu0 %vm944_vm0, %v3688_v46  ;;  %3543 = vmatprep.mubr.msk.bf16.mxu1 %vm944_vm0, %v3689_v47 }
  0xe6   :  { %3416 = vmatmul.mubr.msk.bf16.gmra.mrb[104].mxu0 %vm944_vm0, %v3690_v48  ;;  %3544 = vmatmul.mubr.msk.bf16.gmra.mrb[104].mxu1 %vm944_vm0, %v3691_v49  ;;  %v3708_v48 = vld [vmem:[%s5791_s0 + $0x1f0] sm:$0xff]  }
  0xe7   :  { %3419 = vmatprep.mubr.msk.bf16.mxu0 %vm944_vm0, %v3692_v50  ;;  %3547 = vmatprep.mubr.msk.bf16.mxu1 %vm944_vm0, %v3693_v51  ;;  %v3709_v49 = vld [vmem:[%s5791_s0 + $0x3f0] sm:$0xff]  }
  0xe9   :  { %v3313_v52 = vpop.f32.mrb[0].mxu0  ;;  %v3441_v53 = vpop.f32.mrb[0].mxu1 }
  0xea   :  { %3712 = vtanh.f32 %v3313_v52  ;;  %v1367_v54 = vpop.f32.mrb[1].mxu0  ;;  %v1879_v55 = vpop.f32.mrb[1].mxu1 }
  0xeb   :  { %3714 = vtanh.f32 %v3441_v53  ;;  %v3314_v58 = vpop.f32.mrb[2].mxu0  ;;  %v3442_v59 = vpop.f32.mrb[2].mxu1 }
  0xec   :  { %3716 = vtanh.f32 %v1367_v54  ;;  %v1370_v62 = vpop.f32.mrb[3].mxu0  ;;  %v1882_v63 = vpop.f32.mrb[3].mxu1 }
  0xed   :  { %3718 = vtanh.f32 %v1879_v55 }
  0xee   :  { %3720 = vtanh.f32 %v3314_v58  ;;  %3420 = vmatmul.mubr.msk.bf16.gmra.mrb[108].mxu0 %vm944_vm0, %v3694_v56  ;;  %3548 = vmatmul.mubr.msk.bf16.gmra.mrb[108].mxu1 %vm944_vm0, %v3695_v57 }
  0xef   :  { %3722 = vtanh.f32 %v3442_v59  ;;  %3423 = vmatprep.mubr.msk.bf16.mxu0 %vm944_vm0, %v3696_v60  ;;  %3551 = vmatprep.mubr.msk.bf16.mxu1 %vm944_vm0, %v3697_v61 }
  0xf0   :  { %3724 = vtanh.f32 %v1370_v62 }
  0xf1   :  { %3726 = vtanh.f32 %v1882_v63  ;;  %v3317_v0 = vpop.f32.mrb[4].mxu0  ;;  %v3445_v1 = vpop.f32.mrb[4].mxu1  ;;  %v3710_v63 = vld [vmem:[%s5791_s0 + $0x1f8] sm:$0xff]  }
  0xf2   :  { %3728 = vtanh.f32 %v3317_v0  ;;  %v1383_v2 = vpop.f32.mrb[5].mxu0  ;;  %v1895_v3 = vpop.f32.mrb[5].mxu1  ;;  %v3711_v0 = vld [vmem:[%s5791_s0 + $0x3f8] sm:$0xff]  }
  0xf3   :  { %3730 = vtanh.f32 %v3445_v1  ;;  %v3318_v6 = vpop.f32.mrb[6].mxu0  ;;  %v3446_v7 = vpop.f32.mrb[6].mxu1 }
  0xf4   :  { %v3713_v10 = vpop.eup %3712  ;;  %3732 = vtanh.f32 %v1383_v2  ;;  %v1386_v11 = vpop.f32.mrb[7].mxu0 }
  0xf5   :  { %v1898_v12 = vpop.f32.mrb[7].mxu1  ;;  %v3715_v13 = vpop.eup %3714  ;;  %2649 = vst.msk [vmem:[%s5792_s2 + $0x10] sm:$0xff] %vm2646_vm2, %v3713_v10  ;;  %3734 = vtanh.f32 %v1895_v3 }
  0xf6   :  { %v3717_v14 = vpop.eup %3716  ;;  %2777 = vst.msk [vmem:[%s5792_s2 + $0x410] sm:$0xff] %vm2646_vm2, %v3715_v13  ;;  %3736 = vtanh.f32 %v3318_v6  ;;  %3424 = vmatmul.mubr.msk.bf16.gmra.mrb[112].mxu0 %vm944_vm0, %v3698_v4  ;;  %3552 = vmatmul.mubr.msk.bf16.gmra.mrb[112].mxu1 %vm944_vm0, %v3699_v5 }
  0xf7   :  { %v3719_v15 = vpop.eup %3718  ;;  %2647 = vst.msk [vmem:[%s5792_s2] sm:$0xff] %vm2646_vm2, %v3717_v14  ;;  %3738 = vtanh.f32 %v3446_v7  ;;  %3427 = vmatprep.mubr.msk.bf16.mxu0 %vm944_vm0, %v3700_v8  ;;  %3555 = vmatprep.mubr.msk.bf16.mxu1 %vm944_vm0, %v3701_v9 }
  0xf8   :  { %v3721_v16 = vpop.eup %3720  ;;  %2775 = vst.msk [vmem:[%s5792_s2 + $0x400] sm:$0xff] %vm2646_vm2, %v3719_v15  ;;  %3740 = vtanh.f32 %v1386_v11 }
  0xf9   :  { %v3723_v17 = vpop.eup %3722  ;;  %2650 = vst.msk [vmem:[%s5792_s2 + $0x18] sm:$0xff] %vm2646_vm2, %v3721_v16  ;;  %3742 = vtanh.f32 %v1898_v12  ;;  %v3321_v18 = vpop.f32.mrb[8].mxu0 }
  0xfa   :  { %v3449_v19 = vpop.f32.mrb[8].mxu1  ;;  %v3725_v20 = vpop.eup %3724  ;;  %2778 = vst.msk [vmem:[%s5792_s2 + $0x418] sm:$0xff] %vm2646_vm2, %v3723_v17  ;;  %3744 = vtanh.f32 %v3321_v18 }
  0xfb   :  { %v1399_v21 = vpop.f32.mrb[9].mxu0  ;;  %v1911_v22 = vpop.f32.mrb[9].mxu1  ;;  %2648 = vst.msk [vmem:[%s5792_s2 + $0x8] sm:$0xff] %vm2646_vm2, %v3725_v20  ;;  %3746 = vtanh.f32 %v3449_v19 }
  0xfc   :  { %v3727_v25 = vpop.eup %3726  ;;  %v3322_v26 = vpop.f32.mrb[10].mxu0  ;;  %3748 = vtanh.f32 %v1399_v21 }
  0xfd   :  { %v3450_v27 = vpop.f32.mrb[10].mxu1  ;;  %v3729_v30 = vpop.eup %3728  ;;  %2776 = vst.msk [vmem:[%s5792_s2 + $0x408] sm:$0xff] %vm2646_vm2, %v3727_v25  ;;  %3750 = vtanh.f32 %v1911_v22 }
  0xfe   :  { %v1402_v31 = vpop.f32.mrb[11].mxu0  ;;  %v1914_v32 = vpop.f32.mrb[11].mxu1  ;;  %2653 = vst.msk [vmem:[%s5792_s2 + $0x30] sm:$0xff] %vm2646_vm2, %v3729_v30  ;;  %3752 = vtanh.f32 %v3322_v26  ;;  %3428 = vmatmul.mubr.msk.bf16.gmra.mrb[116].mxu0 %vm944_vm0, %v3702_v23  ;;  %3556 = vmatmul.mubr.msk.bf16.gmra.mrb[116].mxu1 %vm944_vm0, %v3703_v24 }
  0xff   :  { %v3731_v33 = vpop.eup %3730  ;;  %3754 = vtanh.f32 %v3450_v27  ;;  %3431 = vmatprep.mubr.msk.bf16.mxu0 %vm944_vm0, %v3704_v28  ;;  %3559 = vmatprep.mubr.msk.bf16.mxu1 %vm944_vm0, %v3705_v29 }
 0x100   :  { %v3733_v34 = vpop.eup %3732  ;;  %2781 = vst.msk [vmem:[%s5792_s2 + $0x430] sm:$0xff] %vm2646_vm2, %v3731_v33  ;;  %3756 = vtanh.f32 %v1402_v31 }
 0x101   :  { %v3735_v35 = vpop.eup %3734  ;;  %2651 = vst.msk [vmem:[%s5792_s2 + $0x20] sm:$0xff] %vm2646_vm2, %v3733_v34  ;;  %3758 = vtanh.f32 %v1914_v32  ;;  %v3325_v38 = vpop.f32.mrb[12].mxu0 }
 0x102   :  { %v3737_v36 = vpop.eup %3736  ;;  %2779 = vst.msk [vmem:[%s5792_s2 + $0x420] sm:$0xff] %vm2646_vm2, %v3735_v35  ;;  %v3453_v39 = vpop.f32.mrb[12].mxu1  ;;  %3760 = vtanh.f32 %v3325_v38 }
 0x103   :  { %v3739_v37 = vpop.eup %3738  ;;  %2654 = vst.msk [vmem:[%s5792_s2 + $0x38] sm:$0xff] %vm2646_vm2, %v3737_v36  ;;  %v1415_v41 = vpop.f32.mrb[13].mxu0  ;;  %3762 = vtanh.f32 %v3453_v39 }
 0x104   :  { %v3741_v40 = vpop.eup %3740  ;;  %2782 = vst.msk [vmem:[%s5792_s2 + $0x438] sm:$0xff] %vm2646_vm2, %v3739_v37  ;;  %v1927_v42 = vpop.f32.mrb[13].mxu1  ;;  %3764 = vtanh.f32 %v1415_v41 }
 0x105   :  { %v3743_v45 = vpop.eup %3742  ;;  %2652 = vst.msk [vmem:[%s5792_s2 + $0x28] sm:$0xff] %vm2646_vm2, %v3741_v40  ;;  %v3326_v46 = vpop.f32.mrb[14].mxu0  ;;  %3766 = vtanh.f32 %v1927_v42 }
 0x106   :  { %v3454_v47 = vpop.f32.mrb[14].mxu1  ;;  %v3745_v50 = vpop.eup %3744  ;;  %2780 = vst.msk [vmem:[%s5792_s2 + $0x428] sm:$0xff] %vm2646_vm2, %v3743_v45  ;;  %3768 = vtanh.f32 %v3326_v46  ;;  %3432 = vmatmul.mubr.msk.bf16.gmra.mrb[120].mxu0 %vm944_vm0, %v3706_v43  ;;  %3560 = vmatmul.mubr.msk.bf16.gmra.mrb[120].mxu1 %vm944_vm0, %v3707_v44 }
 0x107   :  { %v1418_v51 = vpop.f32.mrb[15].mxu0  ;;  %v1930_v52 = vpop.f32.mrb[15].mxu1  ;;  %2657 = vst.msk [vmem:[%s5792_s2 + $0x50] sm:$0xff] %vm2646_vm2, %v3745_v50  ;;  %3770 = vtanh.f32 %v3454_v47  ;;  %3435 = vmatprep.mubr.msk.bf16.mxu0 %vm944_vm0, %v3708_v48  ;;  %3563 = vmatprep.mubr.msk.bf16.mxu1 %vm944_vm0, %v3709_v49 }
 0x108   :  { %v3747_v53 = vpop.eup %3746  ;;  %3772 = vtanh.f32 %v1418_v51 }
 0x109   :  { %v3749_v54 = vpop.eup %3748  ;;  %2785 = vst.msk [vmem:[%s5792_s2 + $0x450] sm:$0xff] %vm2646_vm2, %v3747_v53  ;;  %3774 = vtanh.f32 %v1930_v52  ;;  %v3329_v58 = vpop.f32.mrb[16].mxu0 }
 0x10a   :  { %v3751_v55 = vpop.eup %3750  ;;  %2655 = vst.msk [vmem:[%s5792_s2 + $0x40] sm:$0xff] %vm2646_vm2, %v3749_v54  ;;  %v3457_v59 = vpop.f32.mrb[16].mxu1  ;;  %3776 = vtanh.f32 %v3329_v58 }
 0x10b   :  { %v3753_v56 = vpop.eup %3752  ;;  %2783 = vst.msk [vmem:[%s5792_s2 + $0x440] sm:$0xff] %vm2646_vm2, %v3751_v55  ;;  %v1431_v61 = vpop.f32.mrb[17].mxu0  ;;  %3778 = vtanh.f32 %v3457_v59 }
 0x10c   :  { %v3755_v57 = vpop.eup %3754  ;;  %2658 = vst.msk [vmem:[%s5792_s2 + $0x58] sm:$0xff] %vm2646_vm2, %v3753_v56  ;;  %v1943_v62 = vpop.f32.mrb[17].mxu1  ;;  %3780 = vtanh.f32 %v1431_v61 }
 0x10d   :  { %v3757_v60 = vpop.eup %3756  ;;  %2786 = vst.msk [vmem:[%s5792_s2 + $0x458] sm:$0xff] %vm2646_vm2, %v3755_v57  ;;  %v3330_v2 = vpop.f32.mrb[18].mxu0  ;;  %3782 = vtanh.f32 %v1943_v62 }
 0x10e   :  { %v3759_v1 = vpop.eup %3758  ;;  %2656 = vst.msk [vmem:[%s5792_s2 + $0x48] sm:$0xff] %vm2646_vm2, %v3757_v60  ;;  %v3458_v3 = vpop.f32.mrb[18].mxu1  ;;  %3784 = vtanh.f32 %v3330_v2  ;;  %3436 = vmatmul.mubr.msk.bf16.gmra.mrb[124].mxu0 %vm944_vm0, %v3710_v63  ;;  %3564 = vmatmul.mubr.msk.bf16.gmra.mrb[124].mxu1 %vm944_vm0, %v3711_v0 }
 0x10f   :  { %v3761_v4 = vpop.eup %3760  ;;  %2784 = vst.msk [vmem:[%s5792_s2 + $0x448] sm:$0xff] %vm2646_vm2, %v3759_v1  ;;  %v1434_v5 = vpop.f32.mrb[19].mxu0  ;;  %3786 = vtanh.f32 %v3458_v3 }
 0x110   :  { %v1946_v6 = vpop.f32.mrb[19].mxu1  ;;  %v3763_v7 = vpop.eup %3762  ;;  %2661 = vst.msk [vmem:[%s5792_s2 + $0x70] sm:$0xff] %vm2646_vm2, %v3761_v4  ;;  %3788 = vtanh.f32 %v1434_v5 }
 0x111   :  { %v3765_v8 = vpop.eup %3764  ;;  %2789 = vst.msk [vmem:[%s5792_s2 + $0x470] sm:$0xff] %vm2646_vm2, %v3763_v7  ;;  %3790 = vtanh.f32 %v1946_v6  ;;  %v3333_v12 = vpop.f32.mrb[20].mxu0 }
 0x112   :  { %v3767_v9 = vpop.eup %3766  ;;  %2659 = vst.msk [vmem:[%s5792_s2 + $0x60] sm:$0xff] %vm2646_vm2, %v3765_v8  ;;  %v3461_v13 = vpop.f32.mrb[20].mxu1  ;;  %3792 = vtanh.f32 %v3333_v12 }
 0x113   :  { %v3769_v10 = vpop.eup %3768  ;;  %2787 = vst.msk [vmem:[%s5792_s2 + $0x460] sm:$0xff] %vm2646_vm2, %v3767_v9  ;;  %v1447_v15 = vpop.f32.mrb[21].mxu0  ;;  %3794 = vtanh.f32 %v3461_v13 }
 0x114   :  { %v3771_v11 = vpop.eup %3770  ;;  %2662 = vst.msk [vmem:[%s5792_s2 + $0x78] sm:$0xff] %vm2646_vm2, %v3769_v10  ;;  %v1959_v16 = vpop.f32.mrb[21].mxu1  ;;  %3796 = vtanh.f32 %v1447_v15 }
 0x115   :  { %v3773_v14 = vpop.eup %3772  ;;  %2790 = vst.msk [vmem:[%s5792_s2 + $0x478] sm:$0xff] %vm2646_vm2, %v3771_v11  ;;  %v3334_v18 = vpop.f32.mrb[22].mxu0  ;;  %3798 = vtanh.f32 %v1959_v16 }
 0x116   :  { %v3775_v17 = vpop.eup %3774  ;;  %2660 = vst.msk [vmem:[%s5792_s2 + $0x68] sm:$0xff] %vm2646_vm2, %v3773_v14  ;;  %v3462_v19 = vpop.f32.mrb[22].mxu1  ;;  %3800 = vtanh.f32 %v3334_v18 }
 0x117   :  { %v3777_v20 = vpop.eup %3776  ;;  %2788 = vst.msk [vmem:[%s5792_s2 + $0x468] sm:$0xff] %vm2646_vm2, %v3775_v17  ;;  %v1450_v21 = vpop.f32.mrb[23].mxu0  ;;  %3802 = vtanh.f32 %v3462_v19 }
 0x118   :  { %v1962_v22 = vpop.f32.mrb[23].mxu1  ;;  %v3779_v23 = vpop.eup %3778  ;;  %2665 = vst.msk [vmem:[%s5792_s2 + $0x90] sm:$0xff] %vm2646_vm2, %v3777_v20  ;;  %3804 = vtanh.f32 %v1450_v21 }
 0x119   :  { %v3781_v24 = vpop.eup %3780  ;;  %2793 = vst.msk [vmem:[%s5792_s2 + $0x490] sm:$0xff] %vm2646_vm2, %v3779_v23  ;;  %3806 = vtanh.f32 %v1962_v22  ;;  %v3337_v28 = vpop.f32.mrb[24].mxu0 }
 0x11a   :  { %v3783_v25 = vpop.eup %3782  ;;  %2663 = vst.msk [vmem:[%s5792_s2 + $0x80] sm:$0xff] %vm2646_vm2, %v3781_v24  ;;  %v3465_v29 = vpop.f32.mrb[24].mxu1  ;;  %3808 = vtanh.f32 %v3337_v28 }
 0x11b   :  { %v3785_v26 = vpop.eup %3784  ;;  %2791 = vst.msk [vmem:[%s5792_s2 + $0x480] sm:$0xff] %vm2646_vm2, %v3783_v25  ;;  %v1463_v31 = vpop.f32.mrb[25].mxu0  ;;  %3810 = vtanh.f32 %v3465_v29 }
 0x11c   :  { %v3787_v27 = vpop.eup %3786  ;;  %2666 = vst.msk [vmem:[%s5792_s2 + $0x98] sm:$0xff] %vm2646_vm2, %v3785_v26  ;;  %v1975_v32 = vpop.f32.mrb[25].mxu1  ;;  %3812 = vtanh.f32 %v1463_v31 }
 0x11d   :  { %v3789_v30 = vpop.eup %3788  ;;  %2794 = vst.msk [vmem:[%s5792_s2 + $0x498] sm:$0xff] %vm2646_vm2, %v3787_v27  ;;  %v3338_v34 = vpop.f32.mrb[26].mxu0  ;;  %3814 = vtanh.f32 %v1975_v32 }
 0x11e   :  { %v3791_v33 = vpop.eup %3790  ;;  %2664 = vst.msk [vmem:[%s5792_s2 + $0x88] sm:$0xff] %vm2646_vm2, %v3789_v30  ;;  %v3466_v35 = vpop.f32.mrb[26].mxu1  ;;  %3816 = vtanh.f32 %v3338_v34 }
 0x11f   :  { %v3793_v36 = vpop.eup %3792  ;;  %2792 = vst.msk [vmem:[%s5792_s2 + $0x488] sm:$0xff] %vm2646_vm2, %v3791_v33  ;;  %v1466_v37 = vpop.f32.mrb[27].mxu0  ;;  %3818 = vtanh.f32 %v3466_v35 }
 0x120   :  { %v1978_v38 = vpop.f32.mrb[27].mxu1  ;;  %v3795_v39 = vpop.eup %3794  ;;  %2669 = vst.msk [vmem:[%s5792_s2 + $0xb0] sm:$0xff] %vm2646_vm2, %v3793_v36  ;;  %3820 = vtanh.f32 %v1466_v37 }
 0x121   :  { %v3797_v40 = vpop.eup %3796  ;;  %2797 = vst.msk [vmem:[%s5792_s2 + $0x4b0] sm:$0xff] %vm2646_vm2, %v3795_v39  ;;  %3822 = vtanh.f32 %v1978_v38  ;;  %v3341_v44 = vpop.f32.mrb[28].mxu0 }
 0x122   :  { %v3799_v41 = vpop.eup %3798  ;;  %2667 = vst.msk [vmem:[%s5792_s2 + $0xa0] sm:$0xff] %vm2646_vm2, %v3797_v40  ;;  %v3469_v45 = vpop.f32.mrb[28].mxu1  ;;  %3824 = vtanh.f32 %v3341_v44 }
 0x123   :  { %v3801_v42 = vpop.eup %3800  ;;  %2795 = vst.msk [vmem:[%s5792_s2 + $0x4a0] sm:$0xff] %vm2646_vm2, %v3799_v41  ;;  %v1479_v47 = vpop.f32.mrb[29].mxu0  ;;  %3826 = vtanh.f32 %v3469_v45 }
 0x124   :  { %v3803_v43 = vpop.eup %3802  ;;  %2670 = vst.msk [vmem:[%s5792_s2 + $0xb8] sm:$0xff] %vm2646_vm2, %v3801_v42  ;;  %v1991_v48 = vpop.f32.mrb[29].mxu1  ;;  %3828 = vtanh.f32 %v1479_v47 }
 0x125   :  { %v3805_v46 = vpop.eup %3804  ;;  %2798 = vst.msk [vmem:[%s5792_s2 + $0x4b8] sm:$0xff] %vm2646_vm2, %v3803_v43  ;;  %v3342_v50 = vpop.f32.mrb[30].mxu0  ;;  %3830 = vtanh.f32 %v1991_v48 }
 0x126   :  { %v3807_v49 = vpop.eup %3806  ;;  %2668 = vst.msk [vmem:[%s5792_s2 + $0xa8] sm:$0xff] %vm2646_vm2, %v3805_v46  ;;  %v3470_v51 = vpop.f32.mrb[30].mxu1  ;;  %3832 = vtanh.f32 %v3342_v50 }
 0x127   :  { %v3809_v52 = vpop.eup %3808  ;;  %2796 = vst.msk [vmem:[%s5792_s2 + $0x4a8] sm:$0xff] %vm2646_vm2, %v3807_v49  ;;  %v1482_v53 = vpop.f32.mrb[31].mxu0  ;;  %3834 = vtanh.f32 %v3470_v51 }
 0x128   :  { %v1994_v54 = vpop.f32.mrb[31].mxu1  ;;  %v3811_v55 = vpop.eup %3810  ;;  %2673 = vst.msk [vmem:[%s5792_s2 + $0xd0] sm:$0xff] %vm2646_vm2, %v3809_v52  ;;  %3836 = vtanh.f32 %v1482_v53 }
 0x129   :  { %v3813_v56 = vpop.eup %3812  ;;  %2801 = vst.msk [vmem:[%s5792_s2 + $0x4d0] sm:$0xff] %vm2646_vm2, %v3811_v55  ;;  %3838 = vtanh.f32 %v1994_v54  ;;  %v3345_v60 = vpop.f32.mrb[32].mxu0 }
 0x12a   :  { %v3815_v57 = vpop.eup %3814  ;;  %2671 = vst.msk [vmem:[%s5792_s2 + $0xc0] sm:$0xff] %vm2646_vm2, %v3813_v56  ;;  %v3473_v61 = vpop.f32.mrb[32].mxu1  ;;  %3840 = vtanh.f32 %v3345_v60 }
 0x12b   :  { %v3817_v58 = vpop.eup %3816  ;;  %2799 = vst.msk [vmem:[%s5792_s2 + $0x4c0] sm:$0xff] %vm2646_vm2, %v3815_v57  ;;  %v1495_v63 = vpop.f32.mrb[33].mxu0  ;;  %3842 = vtanh.f32 %v3473_v61 }
 0x12c   :  { %v3819_v59 = vpop.eup %3818  ;;  %2674 = vst.msk [vmem:[%s5792_s2 + $0xd8] sm:$0xff] %vm2646_vm2, %v3817_v58  ;;  %v2007_v0 = vpop.f32.mrb[33].mxu1  ;;  %3844 = vtanh.f32 %v1495_v63 }
 0x12d   :  { %v3821_v62 = vpop.eup %3820  ;;  %2802 = vst.msk [vmem:[%s5792_s2 + $0x4d8] sm:$0xff] %vm2646_vm2, %v3819_v59  ;;  %v3346_v2 = vpop.f32.mrb[34].mxu0  ;;  %3846 = vtanh.f32 %v2007_v0 }
 0x12e   :  { %v3823_v1 = vpop.eup %3822  ;;  %2672 = vst.msk [vmem:[%s5792_s2 + $0xc8] sm:$0xff] %vm2646_vm2, %v3821_v62  ;;  %v3474_v3 = vpop.f32.mrb[34].mxu1  ;;  %3848 = vtanh.f32 %v3346_v2 }
 0x12f   :  { %v3825_v4 = vpop.eup %3824  ;;  %2800 = vst.msk [vmem:[%s5792_s2 + $0x4c8] sm:$0xff] %vm2646_vm2, %v3823_v1  ;;  %v1498_v5 = vpop.f32.mrb[35].mxu0  ;;  %3850 = vtanh.f32 %v3474_v3 }
 0x130   :  { %v2010_v6 = vpop.f32.mrb[35].mxu1  ;;  %v3827_v7 = vpop.eup %3826  ;;  %2677 = vst.msk [vmem:[%s5792_s2 + $0xf0] sm:$0xff] %vm2646_vm2, %v3825_v4  ;;  %3852 = vtanh.f32 %v1498_v5 }
 0x131   :  { %v3829_v8 = vpop.eup %3828  ;;  %2805 = vst.msk [vmem:[%s5792_s2 + $0x4f0] sm:$0xff] %vm2646_vm2, %v3827_v7  ;;  %3854 = vtanh.f32 %v2010_v6  ;;  %v3349_v12 = vpop.f32.mrb[36].mxu0 }
 0x132   :  { %v3831_v9 = vpop.eup %3830  ;;  %2675 = vst.msk [vmem:[%s5792_s2 + $0xe0] sm:$0xff] %vm2646_vm2, %v3829_v8  ;;  %v3477_v13 = vpop.f32.mrb[36].mxu1  ;;  %3856 = vtanh.f32 %v3349_v12 }
 0x133   :  { %v3833_v10 = vpop.eup %3832  ;;  %2803 = vst.msk [vmem:[%s5792_s2 + $0x4e0] sm:$0xff] %vm2646_vm2, %v3831_v9  ;;  %v1511_v15 = vpop.f32.mrb[37].mxu0  ;;  %3858 = vtanh.f32 %v3477_v13 }
 0x134   :  { %v3835_v11 = vpop.eup %3834  ;;  %2678 = vst.msk [vmem:[%s5792_s2 + $0xf8] sm:$0xff] %vm2646_vm2, %v3833_v10  ;;  %v2023_v16 = vpop.f32.mrb[37].mxu1  ;;  %3860 = vtanh.f32 %v1511_v15 }
 0x135   :  { %v3837_v14 = vpop.eup %3836  ;;  %2806 = vst.msk [vmem:[%s5792_s2 + $0x4f8] sm:$0xff] %vm2646_vm2, %v3835_v11  ;;  %v3350_v18 = vpop.f32.mrb[38].mxu0  ;;  %3862 = vtanh.f32 %v2023_v16 }
 0x136   :  { %v3839_v17 = vpop.eup %3838  ;;  %2676 = vst.msk [vmem:[%s5792_s2 + $0xe8] sm:$0xff] %vm2646_vm2, %v3837_v14  ;;  %v3478_v19 = vpop.f32.mrb[38].mxu1  ;;  %3864 = vtanh.f32 %v3350_v18 }
 0x137   :  { %v3841_v20 = vpop.eup %3840  ;;  %2804 = vst.msk [vmem:[%s5792_s2 + $0x4e8] sm:$0xff] %vm2646_vm2, %v3839_v17  ;;  %v1514_v21 = vpop.f32.mrb[39].mxu0  ;;  %3866 = vtanh.f32 %v3478_v19 }
 0x138   :  { %v2026_v22 = vpop.f32.mrb[39].mxu1  ;;  %v3843_v23 = vpop.eup %3842  ;;  %2681 = vst.msk [vmem:[%s5792_s2 + $0x110] sm:$0xff] %vm2646_vm2, %v3841_v20  ;;  %3868 = vtanh.f32 %v1514_v21 }
 0x139   :  { %v3845_v24 = vpop.eup %3844  ;;  %2809 = vst.msk [vmem:[%s5792_s2 + $0x510] sm:$0xff] %vm2646_vm2, %v3843_v23  ;;  %3870 = vtanh.f32 %v2026_v22  ;;  %v3353_v28 = vpop.f32.mrb[40].mxu0 }
 0x13a   :  { %v3847_v25 = vpop.eup %3846  ;;  %2679 = vst.msk [vmem:[%s5792_s2 + $0x100] sm:$0xff] %vm2646_vm2, %v3845_v24  ;;  %v3481_v29 = vpop.f32.mrb[40].mxu1  ;;  %3872 = vtanh.f32 %v3353_v28 }
 0x13b   :  { %v3849_v26 = vpop.eup %3848  ;;  %2807 = vst.msk [vmem:[%s5792_s2 + $0x500] sm:$0xff] %vm2646_vm2, %v3847_v25  ;;  %v1527_v31 = vpop.f32.mrb[41].mxu0  ;;  %3874 = vtanh.f32 %v3481_v29 }
 0x13c   :  { %v3851_v27 = vpop.eup %3850  ;;  %2682 = vst.msk [vmem:[%s5792_s2 + $0x118] sm:$0xff] %vm2646_vm2, %v3849_v26  ;;  %v2039_v32 = vpop.f32.mrb[41].mxu1  ;;  %3876 = vtanh.f32 %v1527_v31 }
 0x13d   :  { %v3853_v30 = vpop.eup %3852  ;;  %2810 = vst.msk [vmem:[%s5792_s2 + $0x518] sm:$0xff] %vm2646_vm2, %v3851_v27  ;;  %v3354_v34 = vpop.f32.mrb[42].mxu0  ;;  %3878 = vtanh.f32 %v2039_v32 }
 0x13e   :  { %v3855_v33 = vpop.eup %3854  ;;  %2680 = vst.msk [vmem:[%s5792_s2 + $0x108] sm:$0xff] %vm2646_vm2, %v3853_v30  ;;  %v3482_v35 = vpop.f32.mrb[42].mxu1  ;;  %3880 = vtanh.f32 %v3354_v34 }
 0x13f   :  { %v3857_v36 = vpop.eup %3856  ;;  %2808 = vst.msk [vmem:[%s5792_s2 + $0x508] sm:$0xff] %vm2646_vm2, %v3855_v33  ;;  %v1530_v37 = vpop.f32.mrb[43].mxu0  ;;  %3882 = vtanh.f32 %v3482_v35 }
 0x140   :  { %v2042_v38 = vpop.f32.mrb[43].mxu1  ;;  %v3859_v39 = vpop.eup %3858  ;;  %2685 = vst.msk [vmem:[%s5792_s2 + $0x130] sm:$0xff] %vm2646_vm2, %v3857_v36  ;;  %3884 = vtanh.f32 %v1530_v37 }
 0x141   :  { %v3861_v40 = vpop.eup %3860  ;;  %2813 = vst.msk [vmem:[%s5792_s2 + $0x530] sm:$0xff] %vm2646_vm2, %v3859_v39  ;;  %3886 = vtanh.f32 %v2042_v38  ;;  %v3357_v44 = vpop.f32.mrb[44].mxu0 }
 0x142   :  { %v3863_v41 = vpop.eup %3862  ;;  %2683 = vst.msk [vmem:[%s5792_s2 + $0x120] sm:$0xff] %vm2646_vm2, %v3861_v40  ;;  %v3485_v45 = vpop.f32.mrb[44].mxu1  ;;  %3888 = vtanh.f32 %v3357_v44 }
 0x143   :  { %v3865_v42 = vpop.eup %3864  ;;  %2811 = vst.msk [vmem:[%s5792_s2 + $0x520] sm:$0xff] %vm2646_vm2, %v3863_v41  ;;  %v1543_v47 = vpop.f32.mrb[45].mxu0  ;;  %3890 = vtanh.f32 %v3485_v45 }
 0x144   :  { %v3867_v43 = vpop.eup %3866  ;;  %2686 = vst.msk [vmem:[%s5792_s2 + $0x138] sm:$0xff] %vm2646_vm2, %v3865_v42  ;;  %v2055_v48 = vpop.f32.mrb[45].mxu1  ;;  %3892 = vtanh.f32 %v1543_v47 }
 0x145   :  { %v3869_v46 = vpop.eup %3868  ;;  %2814 = vst.msk [vmem:[%s5792_s2 + $0x538] sm:$0xff] %vm2646_vm2, %v3867_v43  ;;  %v3358_v50 = vpop.f32.mrb[46].mxu0  ;;  %3894 = vtanh.f32 %v2055_v48 }
 0x146   :  { %v3871_v49 = vpop.eup %3870  ;;  %2684 = vst.msk [vmem:[%s5792_s2 + $0x128] sm:$0xff] %vm2646_vm2, %v3869_v46  ;;  %v3486_v51 = vpop.f32.mrb[46].mxu1  ;;  %3896 = vtanh.f32 %v3358_v50 }
 0x147   :  { %v3873_v52 = vpop.eup %3872  ;;  %2812 = vst.msk [vmem:[%s5792_s2 + $0x528] sm:$0xff] %vm2646_vm2, %v3871_v49  ;;  %v1546_v53 = vpop.f32.mrb[47].mxu0  ;;  %3898 = vtanh.f32 %v3486_v51 }
 0x148   :  { %v2058_v54 = vpop.f32.mrb[47].mxu1  ;;  %v3875_v55 = vpop.eup %3874  ;;  %2689 = vst.msk [vmem:[%s5792_s2 + $0x150] sm:$0xff] %vm2646_vm2, %v3873_v52  ;;  %3900 = vtanh.f32 %v1546_v53 }
 0x149   :  { %v3877_v56 = vpop.eup %3876  ;;  %2817 = vst.msk [vmem:[%s5792_s2 + $0x550] sm:$0xff] %vm2646_vm2, %v3875_v55  ;;  %3902 = vtanh.f32 %v2058_v54  ;;  %v3361_v60 = vpop.f32.mrb[48].mxu0 }
 0x14a   :  { %v3879_v57 = vpop.eup %3878  ;;  %2687 = vst.msk [vmem:[%s5792_s2 + $0x140] sm:$0xff] %vm2646_vm2, %v3877_v56  ;;  %v3489_v61 = vpop.f32.mrb[48].mxu1  ;;  %3904 = vtanh.f32 %v3361_v60 }
 0x14b   :  { %v3881_v58 = vpop.eup %3880  ;;  %2815 = vst.msk [vmem:[%s5792_s2 + $0x540] sm:$0xff] %vm2646_vm2, %v3879_v57  ;;  %v1559_v63 = vpop.f32.mrb[49].mxu0  ;;  %3906 = vtanh.f32 %v3489_v61 }
 0x14c   :  { %v3883_v59 = vpop.eup %3882  ;;  %2690 = vst.msk [vmem:[%s5792_s2 + $0x158] sm:$0xff] %vm2646_vm2, %v3881_v58  ;;  %v2071_v0 = vpop.f32.mrb[49].mxu1  ;;  %3908 = vtanh.f32 %v1559_v63 }
 0x14d   :  { %v3885_v62 = vpop.eup %3884  ;;  %2818 = vst.msk [vmem:[%s5792_s2 + $0x558] sm:$0xff] %vm2646_vm2, %v3883_v59  ;;  %v3362_v2 = vpop.f32.mrb[50].mxu0  ;;  %3910 = vtanh.f32 %v2071_v0 }
 0x14e   :  { %v3887_v1 = vpop.eup %3886  ;;  %2688 = vst.msk [vmem:[%s5792_s2 + $0x148] sm:$0xff] %vm2646_vm2, %v3885_v62  ;;  %v3490_v3 = vpop.f32.mrb[50].mxu1  ;;  %3912 = vtanh.f32 %v3362_v2 }
 0x14f   :  { %v3889_v4 = vpop.eup %3888  ;;  %2816 = vst.msk [vmem:[%s5792_s2 + $0x548] sm:$0xff] %vm2646_vm2, %v3887_v1  ;;  %v1562_v5 = vpop.f32.mrb[51].mxu0  ;;  %3914 = vtanh.f32 %v3490_v3 }
 0x150   :  { %v2074_v6 = vpop.f32.mrb[51].mxu1  ;;  %v3891_v7 = vpop.eup %3890  ;;  %2693 = vst.msk [vmem:[%s5792_s2 + $0x170] sm:$0xff] %vm2646_vm2, %v3889_v4  ;;  %3916 = vtanh.f32 %v1562_v5 }
 0x151   :  { %v3893_v8 = vpop.eup %3892  ;;  %2821 = vst.msk [vmem:[%s5792_s2 + $0x570] sm:$0xff] %vm2646_vm2, %v3891_v7  ;;  %3918 = vtanh.f32 %v2074_v6  ;;  %v3365_v12 = vpop.f32.mrb[52].mxu0 }
 0x152   :  { %v3895_v9 = vpop.eup %3894  ;;  %2691 = vst.msk [vmem:[%s5792_s2 + $0x160] sm:$0xff] %vm2646_vm2, %v3893_v8  ;;  %v3493_v13 = vpop.f32.mrb[52].mxu1  ;;  %3920 = vtanh.f32 %v3365_v12 }
 0x153   :  { %v3897_v10 = vpop.eup %3896  ;;  %2819 = vst.msk [vmem:[%s5792_s2 + $0x560] sm:$0xff] %vm2646_vm2, %v3895_v9  ;;  %v1575_v15 = vpop.f32.mrb[53].mxu0  ;;  %3922 = vtanh.f32 %v3493_v13 }
 0x154   :  { %v3899_v11 = vpop.eup %3898  ;;  %2694 = vst.msk [vmem:[%s5792_s2 + $0x178] sm:$0xff] %vm2646_vm2, %v3897_v10  ;;  %v2087_v16 = vpop.f32.mrb[53].mxu1  ;;  %3924 = vtanh.f32 %v1575_v15 }
 0x155   :  { %v3901_v14 = vpop.eup %3900  ;;  %2822 = vst.msk [vmem:[%s5792_s2 + $0x578] sm:$0xff] %vm2646_vm2, %v3899_v11  ;;  %v3366_v18 = vpop.f32.mrb[54].mxu0  ;;  %3926 = vtanh.f32 %v2087_v16 }
 0x156   :  { %v3903_v17 = vpop.eup %3902  ;;  %2692 = vst.msk [vmem:[%s5792_s2 + $0x168] sm:$0xff] %vm2646_vm2, %v3901_v14  ;;  %v3494_v19 = vpop.f32.mrb[54].mxu1  ;;  %3928 = vtanh.f32 %v3366_v18 }
 0x157   :  { %v3905_v20 = vpop.eup %3904  ;;  %2820 = vst.msk [vmem:[%s5792_s2 + $0x568] sm:$0xff] %vm2646_vm2, %v3903_v17  ;;  %v1578_v21 = vpop.f32.mrb[55].mxu0  ;;  %3930 = vtanh.f32 %v3494_v19 }
 0x158   :  { %v2090_v22 = vpop.f32.mrb[55].mxu1  ;;  %v3907_v23 = vpop.eup %3906  ;;  %2697 = vst.msk [vmem:[%s5792_s2 + $0x190] sm:$0xff] %vm2646_vm2, %v3905_v20  ;;  %3932 = vtanh.f32 %v1578_v21 }
 0x159   :  { %v3909_v24 = vpop.eup %3908  ;;  %2825 = vst.msk [vmem:[%s5792_s2 + $0x590] sm:$0xff] %vm2646_vm2, %v3907_v23  ;;  %3934 = vtanh.f32 %v2090_v22  ;;  %v3369_v28 = vpop.f32.mrb[56].mxu0 }
 0x15a   :  { %v3911_v25 = vpop.eup %3910  ;;  %2695 = vst.msk [vmem:[%s5792_s2 + $0x180] sm:$0xff] %vm2646_vm2, %v3909_v24  ;;  %v3497_v29 = vpop.f32.mrb[56].mxu1  ;;  %3936 = vtanh.f32 %v3369_v28 }
 0x15b   :  { %v3913_v26 = vpop.eup %3912  ;;  %2823 = vst.msk [vmem:[%s5792_s2 + $0x580] sm:$0xff] %vm2646_vm2, %v3911_v25  ;;  %v1591_v31 = vpop.f32.mrb[57].mxu0  ;;  %3938 = vtanh.f32 %v3497_v29 }
 0x15c   :  { %v3915_v27 = vpop.eup %3914  ;;  %2698 = vst.msk [vmem:[%s5792_s2 + $0x198] sm:$0xff] %vm2646_vm2, %v3913_v26  ;;  %v2103_v32 = vpop.f32.mrb[57].mxu1  ;;  %3940 = vtanh.f32 %v1591_v31 }
 0x15d   :  { %v3917_v30 = vpop.eup %3916  ;;  %2826 = vst.msk [vmem:[%s5792_s2 + $0x598] sm:$0xff] %vm2646_vm2, %v3915_v27  ;;  %v3370_v34 = vpop.f32.mrb[58].mxu0  ;;  %3942 = vtanh.f32 %v2103_v32 }
 0x15e   :  { %v3919_v33 = vpop.eup %3918  ;;  %2696 = vst.msk [vmem:[%s5792_s2 + $0x188] sm:$0xff] %vm2646_vm2, %v3917_v30  ;;  %v3498_v35 = vpop.f32.mrb[58].mxu1  ;;  %3944 = vtanh.f32 %v3370_v34 }
 0x15f   :  { %v3921_v36 = vpop.eup %3920  ;;  %2824 = vst.msk [vmem:[%s5792_s2 + $0x588] sm:$0xff] %vm2646_vm2, %v3919_v33  ;;  %v1594_v37 = vpop.f32.mrb[59].mxu0  ;;  %3946 = vtanh.f32 %v3498_v35 }
 0x160   :  { %v2106_v38 = vpop.f32.mrb[59].mxu1  ;;  %v3923_v39 = vpop.eup %3922  ;;  %2701 = vst.msk [vmem:[%s5792_s2 + $0x1b0] sm:$0xff] %vm2646_vm2, %v3921_v36  ;;  %3948 = vtanh.f32 %v1594_v37 }
 0x161   :  { %v3925_v40 = vpop.eup %3924  ;;  %2829 = vst.msk [vmem:[%s5792_s2 + $0x5b0] sm:$0xff] %vm2646_vm2, %v3923_v39  ;;  %3950 = vtanh.f32 %v2106_v38  ;;  %v3373_v44 = vpop.f32.mrb[60].mxu0 }
 0x162   :  { %v3927_v41 = vpop.eup %3926  ;;  %2699 = vst.msk [vmem:[%s5792_s2 + $0x1a0] sm:$0xff] %vm2646_vm2, %v3925_v40  ;;  %v3501_v45 = vpop.f32.mrb[60].mxu1  ;;  %3952 = vtanh.f32 %v3373_v44 }
 0x163   :  { %v3929_v42 = vpop.eup %3928  ;;  %2827 = vst.msk [vmem:[%s5792_s2 + $0x5a0] sm:$0xff] %vm2646_vm2, %v3927_v41  ;;  %v1607_v47 = vpop.f32.mrb[61].mxu0  ;;  %3954 = vtanh.f32 %v3501_v45 }
 0x164   :  { %v3931_v43 = vpop.eup %3930  ;;  %2702 = vst.msk [vmem:[%s5792_s2 + $0x1b8] sm:$0xff] %vm2646_vm2, %v3929_v42  ;;  %v2119_v48 = vpop.f32.mrb[61].mxu1  ;;  %3956 = vtanh.f32 %v1607_v47 }
 0x165   :  { %v3933_v46 = vpop.eup %3932  ;;  %2830 = vst.msk [vmem:[%s5792_s2 + $0x5b8] sm:$0xff] %vm2646_vm2, %v3931_v43  ;;  %v3374_v50 = vpop.f32.mrb[62].mxu0  ;;  %3958 = vtanh.f32 %v2119_v48 }
 0x166   :  { %v3935_v49 = vpop.eup %3934  ;;  %2700 = vst.msk [vmem:[%s5792_s2 + $0x1a8] sm:$0xff] %vm2646_vm2, %v3933_v46  ;;  %v3502_v51 = vpop.f32.mrb[62].mxu1  ;;  %3960 = vtanh.f32 %v3374_v50 }
 0x167   :  { %v3937_v52 = vpop.eup %3936  ;;  %2828 = vst.msk [vmem:[%s5792_s2 + $0x5a8] sm:$0xff] %vm2646_vm2, %v3935_v49  ;;  %v1610_v53 = vpop.f32.mrb[63].mxu0  ;;  %3962 = vtanh.f32 %v3502_v51 }
 0x168   :  { %v2122_v54 = vpop.f32.mrb[63].mxu1  ;;  %v3939_v55 = vpop.eup %3938  ;;  %2705 = vst.msk [vmem:[%s5792_s2 + $0x1d0] sm:$0xff] %vm2646_vm2, %v3937_v52  ;;  %3964 = vtanh.f32 %v1610_v53 }
 0x169   :  { %v3941_v56 = vpop.eup %3940  ;;  %2833 = vst.msk [vmem:[%s5792_s2 + $0x5d0] sm:$0xff] %vm2646_vm2, %v3939_v55  ;;  %3966 = vtanh.f32 %v2122_v54  ;;  %v3377_v60 = vpop.f32.mrb[64].mxu0 }
 0x16a   :  { %v3943_v57 = vpop.eup %3942  ;;  %2703 = vst.msk [vmem:[%s5792_s2 + $0x1c0] sm:$0xff] %vm2646_vm2, %v3941_v56  ;;  %v3505_v61 = vpop.f32.mrb[64].mxu1  ;;  %3968 = vtanh.f32 %v3377_v60 }
 0x16b   :  { %v3945_v58 = vpop.eup %3944  ;;  %2831 = vst.msk [vmem:[%s5792_s2 + $0x5c0] sm:$0xff] %vm2646_vm2, %v3943_v57  ;;  %v1623_v63 = vpop.f32.mrb[65].mxu0  ;;  %3970 = vtanh.f32 %v3505_v61 }
 0x16c   :  { %v3947_v59 = vpop.eup %3946  ;;  %2706 = vst.msk [vmem:[%s5792_s2 + $0x1d8] sm:$0xff] %vm2646_vm2, %v3945_v58  ;;  %v2135_v0 = vpop.f32.mrb[65].mxu1  ;;  %3972 = vtanh.f32 %v1623_v63 }
 0x16d   :  { %v3949_v62 = vpop.eup %3948  ;;  %2834 = vst.msk [vmem:[%s5792_s2 + $0x5d8] sm:$0xff] %vm2646_vm2, %v3947_v59  ;;  %v3378_v2 = vpop.f32.mrb[66].mxu0  ;;  %3974 = vtanh.f32 %v2135_v0 }
 0x16e   :  { %v3951_v1 = vpop.eup %3950  ;;  %2704 = vst.msk [vmem:[%s5792_s2 + $0x1c8] sm:$0xff] %vm2646_vm2, %v3949_v62  ;;  %v3506_v3 = vpop.f32.mrb[66].mxu1  ;;  %3976 = vtanh.f32 %v3378_v2 }
 0x16f   :  { %v3953_v4 = vpop.eup %3952  ;;  %2832 = vst.msk [vmem:[%s5792_s2 + $0x5c8] sm:$0xff] %vm2646_vm2, %v3951_v1  ;;  %v1626_v5 = vpop.f32.mrb[67].mxu0  ;;  %3978 = vtanh.f32 %v3506_v3 }
 0x170   :  { %v2138_v6 = vpop.f32.mrb[67].mxu1  ;;  %v3955_v7 = vpop.eup %3954  ;;  %2709 = vst.msk [vmem:[%s5792_s2 + $0x1f0] sm:$0xff] %vm2646_vm2, %v3953_v4  ;;  %3980 = vtanh.f32 %v1626_v5 }
 0x171   :  { %v3957_v8 = vpop.eup %3956  ;;  %2837 = vst.msk [vmem:[%s5792_s2 + $0x5f0] sm:$0xff] %vm2646_vm2, %v3955_v7  ;;  %3982 = vtanh.f32 %v2138_v6  ;;  %v3381_v12 = vpop.f32.mrb[68].mxu0 }
 0x172   :  { %v3959_v9 = vpop.eup %3958  ;;  %2707 = vst.msk [vmem:[%s5792_s2 + $0x1e0] sm:$0xff] %vm2646_vm2, %v3957_v8  ;;  %v3509_v13 = vpop.f32.mrb[68].mxu1  ;;  %3984 = vtanh.f32 %v3381_v12 }
 0x173   :  { %v3961_v10 = vpop.eup %3960  ;;  %2835 = vst.msk [vmem:[%s5792_s2 + $0x5e0] sm:$0xff] %vm2646_vm2, %v3959_v9  ;;  %v1639_v15 = vpop.f32.mrb[69].mxu0  ;;  %3986 = vtanh.f32 %v3509_v13 }
 0x174   :  { %v3963_v11 = vpop.eup %3962  ;;  %2710 = vst.msk [vmem:[%s5792_s2 + $0x1f8] sm:$0xff] %vm2646_vm2, %v3961_v10  ;;  %v2151_v16 = vpop.f32.mrb[69].mxu1  ;;  %3988 = vtanh.f32 %v1639_v15 }
 0x175   :  { %v3965_v14 = vpop.eup %3964  ;;  %2838 = vst.msk [vmem:[%s5792_s2 + $0x5f8] sm:$0xff] %vm2646_vm2, %v3963_v11  ;;  %v3382_v18 = vpop.f32.mrb[70].mxu0  ;;  %3990 = vtanh.f32 %v2151_v16 }
 0x176   :  { %v3967_v17 = vpop.eup %3966  ;;  %2708 = vst.msk [vmem:[%s5792_s2 + $0x1e8] sm:$0xff] %vm2646_vm2, %v3965_v14  ;;  %v3510_v19 = vpop.f32.mrb[70].mxu1  ;;  %3992 = vtanh.f32 %v3382_v18 }
 0x177   :  { %v3969_v20 = vpop.eup %3968  ;;  %2836 = vst.msk [vmem:[%s5792_s2 + $0x5e8] sm:$0xff] %vm2646_vm2, %v3967_v17  ;;  %v1642_v21 = vpop.f32.mrb[71].mxu0  ;;  %3994 = vtanh.f32 %v3510_v19 }
 0x178   :  { %v2154_v22 = vpop.f32.mrb[71].mxu1  ;;  %v3971_v23 = vpop.eup %3970  ;;  %2713 = vst.msk [vmem:[%s5792_s2 + $0x210] sm:$0xff] %vm2646_vm2, %v3969_v20  ;;  %3996 = vtanh.f32 %v1642_v21 }
 0x179   :  { %v3973_v24 = vpop.eup %3972  ;;  %2841 = vst.msk [vmem:[%s5792_s2 + $0x610] sm:$0xff] %vm2646_vm2, %v3971_v23  ;;  %3998 = vtanh.f32 %v2154_v22  ;;  %v3385_v28 = vpop.f32.mrb[72].mxu0 }
 0x17a   :  { %v3975_v25 = vpop.eup %3974  ;;  %2711 = vst.msk [vmem:[%s5792_s2 + $0x200] sm:$0xff] %vm2646_vm2, %v3973_v24  ;;  %v3513_v29 = vpop.f32.mrb[72].mxu1  ;;  %4000 = vtanh.f32 %v3385_v28 }
 0x17b   :  { %v3977_v26 = vpop.eup %3976  ;;  %2839 = vst.msk [vmem:[%s5792_s2 + $0x600] sm:$0xff] %vm2646_vm2, %v3975_v25  ;;  %v1655_v31 = vpop.f32.mrb[73].mxu0  ;;  %4002 = vtanh.f32 %v3513_v29 }
 0x17c   :  { %v3979_v27 = vpop.eup %3978  ;;  %2714 = vst.msk [vmem:[%s5792_s2 + $0x218] sm:$0xff] %vm2646_vm2, %v3977_v26  ;;  %v2167_v32 = vpop.f32.mrb[73].mxu1  ;;  %4004 = vtanh.f32 %v1655_v31 }
 0x17d   :  { %v3981_v30 = vpop.eup %3980  ;;  %2842 = vst.msk [vmem:[%s5792_s2 + $0x618] sm:$0xff] %vm2646_vm2, %v3979_v27  ;;  %v3386_v34 = vpop.f32.mrb[74].mxu0  ;;  %4006 = vtanh.f32 %v2167_v32 }
 0x17e   :  { %v3983_v33 = vpop.eup %3982  ;;  %2712 = vst.msk [vmem:[%s5792_s2 + $0x208] sm:$0xff] %vm2646_vm2, %v3981_v30  ;;  %v3514_v35 = vpop.f32.mrb[74].mxu1  ;;  %4008 = vtanh.f32 %v3386_v34 }
 0x17f   :  { %v3985_v36 = vpop.eup %3984  ;;  %2840 = vst.msk [vmem:[%s5792_s2 + $0x608] sm:$0xff] %vm2646_vm2, %v3983_v33  ;;  %v1658_v37 = vpop.f32.mrb[75].mxu0  ;;  %4010 = vtanh.f32 %v3514_v35 }
 0x180   :  { %v2170_v38 = vpop.f32.mrb[75].mxu1  ;;  %v3987_v39 = vpop.eup %3986  ;;  %2717 = vst.msk [vmem:[%s5792_s2 + $0x230] sm:$0xff] %vm2646_vm2, %v3985_v36  ;;  %4012 = vtanh.f32 %v1658_v37 }
 0x181   :  { %v3989_v40 = vpop.eup %3988  ;;  %2845 = vst.msk [vmem:[%s5792_s2 + $0x630] sm:$0xff] %vm2646_vm2, %v3987_v39  ;;  %4014 = vtanh.f32 %v2170_v38  ;;  %v3389_v44 = vpop.f32.mrb[76].mxu0 }
 0x182   :  { %v3991_v41 = vpop.eup %3990  ;;  %2715 = vst.msk [vmem:[%s5792_s2 + $0x220] sm:$0xff] %vm2646_vm2, %v3989_v40  ;;  %v3517_v45 = vpop.f32.mrb[76].mxu1  ;;  %4016 = vtanh.f32 %v3389_v44 }
 0x183   :  { %v3993_v42 = vpop.eup %3992  ;;  %2843 = vst.msk [vmem:[%s5792_s2 + $0x620] sm:$0xff] %vm2646_vm2, %v3991_v41  ;;  %v1671_v47 = vpop.f32.mrb[77].mxu0  ;;  %4018 = vtanh.f32 %v3517_v45 }
 0x184   :  { %v3995_v43 = vpop.eup %3994  ;;  %2718 = vst.msk [vmem:[%s5792_s2 + $0x238] sm:$0xff] %vm2646_vm2, %v3993_v42  ;;  %v2183_v48 = vpop.f32.mrb[77].mxu1  ;;  %4020 = vtanh.f32 %v1671_v47 }
 0x185   :  { %v3997_v46 = vpop.eup %3996  ;;  %2846 = vst.msk [vmem:[%s5792_s2 + $0x638] sm:$0xff] %vm2646_vm2, %v3995_v43  ;;  %v3390_v50 = vpop.f32.mrb[78].mxu0  ;;  %4022 = vtanh.f32 %v2183_v48 }
 0x186   :  { %v3999_v49 = vpop.eup %3998  ;;  %2716 = vst.msk [vmem:[%s5792_s2 + $0x228] sm:$0xff] %vm2646_vm2, %v3997_v46  ;;  %v3518_v51 = vpop.f32.mrb[78].mxu1  ;;  %4024 = vtanh.f32 %v3390_v50 }
 0x187   :  { %v4001_v52 = vpop.eup %4000  ;;  %2844 = vst.msk [vmem:[%s5792_s2 + $0x628] sm:$0xff] %vm2646_vm2, %v3999_v49  ;;  %v1674_v53 = vpop.f32.mrb[79].mxu0  ;;  %4026 = vtanh.f32 %v3518_v51 }
 0x188   :  { %v2186_v54 = vpop.f32.mrb[79].mxu1  ;;  %v4003_v55 = vpop.eup %4002  ;;  %2721 = vst.msk [vmem:[%s5792_s2 + $0x250] sm:$0xff] %vm2646_vm2, %v4001_v52  ;;  %4028 = vtanh.f32 %v1674_v53 }
 0x189   :  { %v4005_v56 = vpop.eup %4004  ;;  %2849 = vst.msk [vmem:[%s5792_s2 + $0x650] sm:$0xff] %vm2646_vm2, %v4003_v55  ;;  %4030 = vtanh.f32 %v2186_v54  ;;  %v3393_v60 = vpop.f32.mrb[80].mxu0 }
 0x18a   :  { %v4007_v57 = vpop.eup %4006  ;;  %2719 = vst.msk [vmem:[%s5792_s2 + $0x240] sm:$0xff] %vm2646_vm2, %v4005_v56  ;;  %v3521_v61 = vpop.f32.mrb[80].mxu1  ;;  %4032 = vtanh.f32 %v3393_v60 }
 0x18b   :  { %v4009_v58 = vpop.eup %4008  ;;  %2847 = vst.msk [vmem:[%s5792_s2 + $0x640] sm:$0xff] %vm2646_vm2, %v4007_v57  ;;  %v1687_v63 = vpop.f32.mrb[81].mxu0  ;;  %4034 = vtanh.f32 %v3521_v61 }
 0x18c   :  { %v4011_v59 = vpop.eup %4010  ;;  %2722 = vst.msk [vmem:[%s5792_s2 + $0x258] sm:$0xff] %vm2646_vm2, %v4009_v58  ;;  %v2199_v0 = vpop.f32.mrb[81].mxu1  ;;  %4036 = vtanh.f32 %v1687_v63 }
 0x18d   :  { %v4013_v62 = vpop.eup %4012  ;;  %2850 = vst.msk [vmem:[%s5792_s2 + $0x658] sm:$0xff] %vm2646_vm2, %v4011_v59  ;;  %v3394_v2 = vpop.f32.mrb[82].mxu0  ;;  %4038 = vtanh.f32 %v2199_v0 }
 0x18e   :  { %v4015_v1 = vpop.eup %4014  ;;  %2720 = vst.msk [vmem:[%s5792_s2 + $0x248] sm:$0xff] %vm2646_vm2, %v4013_v62  ;;  %v3522_v3 = vpop.f32.mrb[82].mxu1  ;;  %4040 = vtanh.f32 %v3394_v2 }
 0x18f   :  { %v4017_v4 = vpop.eup %4016  ;;  %2848 = vst.msk [vmem:[%s5792_s2 + $0x648] sm:$0xff] %vm2646_vm2, %v4015_v1  ;;  %v1690_v5 = vpop.f32.mrb[83].mxu0  ;;  %4042 = vtanh.f32 %v3522_v3 }
 0x190   :  { %v2202_v6 = vpop.f32.mrb[83].mxu1  ;;  %v4019_v7 = vpop.eup %4018  ;;  %2725 = vst.msk [vmem:[%s5792_s2 + $0x270] sm:$0xff] %vm2646_vm2, %v4017_v4  ;;  %4044 = vtanh.f32 %v1690_v5 }
 0x191   :  { %v4021_v8 = vpop.eup %4020  ;;  %2853 = vst.msk [vmem:[%s5792_s2 + $0x670] sm:$0xff] %vm2646_vm2, %v4019_v7  ;;  %4046 = vtanh.f32 %v2202_v6  ;;  %v3397_v12 = vpop.f32.mrb[84].mxu0 }
 0x192   :  { %v4023_v9 = vpop.eup %4022  ;;  %2723 = vst.msk [vmem:[%s5792_s2 + $0x260] sm:$0xff] %vm2646_vm2, %v4021_v8  ;;  %v3525_v13 = vpop.f32.mrb[84].mxu1  ;;  %4048 = vtanh.f32 %v3397_v12 }
 0x193   :  { %v4025_v10 = vpop.eup %4024  ;;  %2851 = vst.msk [vmem:[%s5792_s2 + $0x660] sm:$0xff] %vm2646_vm2, %v4023_v9  ;;  %v1703_v15 = vpop.f32.mrb[85].mxu0  ;;  %4050 = vtanh.f32 %v3525_v13 }
 0x194   :  { %v4027_v11 = vpop.eup %4026  ;;  %2726 = vst.msk [vmem:[%s5792_s2 + $0x278] sm:$0xff] %vm2646_vm2, %v4025_v10  ;;  %v2215_v16 = vpop.f32.mrb[85].mxu1  ;;  %4052 = vtanh.f32 %v1703_v15 }
 0x195   :  { %v4029_v14 = vpop.eup %4028  ;;  %2854 = vst.msk [vmem:[%s5792_s2 + $0x678] sm:$0xff] %vm2646_vm2, %v4027_v11  ;;  %v3398_v18 = vpop.f32.mrb[86].mxu0  ;;  %4054 = vtanh.f32 %v2215_v16 }
 0x196   :  { %v4031_v17 = vpop.eup %4030  ;;  %2724 = vst.msk [vmem:[%s5792_s2 + $0x268] sm:$0xff] %vm2646_vm2, %v4029_v14  ;;  %v3526_v19 = vpop.f32.mrb[86].mxu1  ;;  %4056 = vtanh.f32 %v3398_v18 }
 0x197   :  { %v4033_v20 = vpop.eup %4032  ;;  %2852 = vst.msk [vmem:[%s5792_s2 + $0x668] sm:$0xff] %vm2646_vm2, %v4031_v17  ;;  %v1706_v21 = vpop.f32.mrb[87].mxu0  ;;  %4058 = vtanh.f32 %v3526_v19 }
 0x198   :  { %v2218_v22 = vpop.f32.mrb[87].mxu1  ;;  %v4035_v23 = vpop.eup %4034  ;;  %2729 = vst.msk [vmem:[%s5792_s2 + $0x290] sm:$0xff] %vm2646_vm2, %v4033_v20  ;;  %4060 = vtanh.f32 %v1706_v21 }
 0x199   :  { %v4037_v24 = vpop.eup %4036  ;;  %2857 = vst.msk [vmem:[%s5792_s2 + $0x690] sm:$0xff] %vm2646_vm2, %v4035_v23  ;;  %4062 = vtanh.f32 %v2218_v22  ;;  %v3401_v28 = vpop.f32.mrb[88].mxu0 }
 0x19a   :  { %v4039_v25 = vpop.eup %4038  ;;  %2727 = vst.msk [vmem:[%s5792_s2 + $0x280] sm:$0xff] %vm2646_vm2, %v4037_v24  ;;  %v3529_v29 = vpop.f32.mrb[88].mxu1  ;;  %4064 = vtanh.f32 %v3401_v28 }
 0x19b   :  { %v4041_v26 = vpop.eup %4040  ;;  %2855 = vst.msk [vmem:[%s5792_s2 + $0x680] sm:$0xff] %vm2646_vm2, %v4039_v25  ;;  %v1719_v31 = vpop.f32.mrb[89].mxu0  ;;  %4066 = vtanh.f32 %v3529_v29 }
 0x19c   :  { %v4043_v27 = vpop.eup %4042  ;;  %2730 = vst.msk [vmem:[%s5792_s2 + $0x298] sm:$0xff] %vm2646_vm2, %v4041_v26  ;;  %v2231_v32 = vpop.f32.mrb[89].mxu1  ;;  %4068 = vtanh.f32 %v1719_v31 }
 0x19d   :  { %v4045_v30 = vpop.eup %4044  ;;  %2858 = vst.msk [vmem:[%s5792_s2 + $0x698] sm:$0xff] %vm2646_vm2, %v4043_v27  ;;  %v3402_v34 = vpop.f32.mrb[90].mxu0  ;;  %4070 = vtanh.f32 %v2231_v32 }
 0x19e   :  { %v4047_v33 = vpop.eup %4046  ;;  %2728 = vst.msk [vmem:[%s5792_s2 + $0x288] sm:$0xff] %vm2646_vm2, %v4045_v30  ;;  %v3530_v35 = vpop.f32.mrb[90].mxu1  ;;  %4072 = vtanh.f32 %v3402_v34 }
 0x19f   :  { %v4049_v36 = vpop.eup %4048  ;;  %2856 = vst.msk [vmem:[%s5792_s2 + $0x688] sm:$0xff] %vm2646_vm2, %v4047_v33  ;;  %v1722_v37 = vpop.f32.mrb[91].mxu0  ;;  %4074 = vtanh.f32 %v3530_v35 }
 0x1a0   :  { %v2234_v38 = vpop.f32.mrb[91].mxu1  ;;  %v4051_v39 = vpop.eup %4050  ;;  %2733 = vst.msk [vmem:[%s5792_s2 + $0x2b0] sm:$0xff] %vm2646_vm2, %v4049_v36  ;;  %4076 = vtanh.f32 %v1722_v37 }
 0x1a1   :  { %v4053_v40 = vpop.eup %4052  ;;  %2861 = vst.msk [vmem:[%s5792_s2 + $0x6b0] sm:$0xff] %vm2646_vm2, %v4051_v39  ;;  %4078 = vtanh.f32 %v2234_v38  ;;  %v3405_v44 = vpop.f32.mrb[92].mxu0 }
 0x1a2   :  { %v4055_v41 = vpop.eup %4054  ;;  %2731 = vst.msk [vmem:[%s5792_s2 + $0x2a0] sm:$0xff] %vm2646_vm2, %v4053_v40  ;;  %v3533_v45 = vpop.f32.mrb[92].mxu1  ;;  %4080 = vtanh.f32 %v3405_v44 }
 0x1a3   :  { %v4057_v42 = vpop.eup %4056  ;;  %2859 = vst.msk [vmem:[%s5792_s2 + $0x6a0] sm:$0xff] %vm2646_vm2, %v4055_v41  ;;  %v1735_v47 = vpop.f32.mrb[93].mxu0  ;;  %4082 = vtanh.f32 %v3533_v45 }
 0x1a4   :  { %v4059_v43 = vpop.eup %4058  ;;  %2734 = vst.msk [vmem:[%s5792_s2 + $0x2b8] sm:$0xff] %vm2646_vm2, %v4057_v42  ;;  %v2247_v48 = vpop.f32.mrb[93].mxu1  ;;  %4084 = vtanh.f32 %v1735_v47 }
 0x1a5   :  { %v4061_v46 = vpop.eup %4060  ;;  %2862 = vst.msk [vmem:[%s5792_s2 + $0x6b8] sm:$0xff] %vm2646_vm2, %v4059_v43  ;;  %v3406_v50 = vpop.f32.mrb[94].mxu0  ;;  %4086 = vtanh.f32 %v2247_v48 }
 0x1a6   :  { %v4063_v49 = vpop.eup %4062  ;;  %2732 = vst.msk [vmem:[%s5792_s2 + $0x2a8] sm:$0xff] %vm2646_vm2, %v4061_v46  ;;  %v3534_v51 = vpop.f32.mrb[94].mxu1  ;;  %4088 = vtanh.f32 %v3406_v50 }
 0x1a7   :  { %v4065_v52 = vpop.eup %4064  ;;  %2860 = vst.msk [vmem:[%s5792_s2 + $0x6a8] sm:$0xff] %vm2646_vm2, %v4063_v49  ;;  %v1738_v53 = vpop.f32.mrb[95].mxu0  ;;  %4090 = vtanh.f32 %v3534_v51 }
 0x1a8   :  { %v2250_v54 = vpop.f32.mrb[95].mxu1  ;;  %v4067_v55 = vpop.eup %4066  ;;  %2737 = vst.msk [vmem:[%s5792_s2 + $0x2d0] sm:$0xff] %vm2646_vm2, %v4065_v52  ;;  %4092 = vtanh.f32 %v1738_v53 }
 0x1a9   :  { %v4069_v56 = vpop.eup %4068  ;;  %2865 = vst.msk [vmem:[%s5792_s2 + $0x6d0] sm:$0xff] %vm2646_vm2, %v4067_v55  ;;  %4094 = vtanh.f32 %v2250_v54  ;;  %v3409_v60 = vpop.f32.mrb[96].mxu0 }
 0x1aa   :  { %v4071_v57 = vpop.eup %4070  ;;  %2735 = vst.msk [vmem:[%s5792_s2 + $0x2c0] sm:$0xff] %vm2646_vm2, %v4069_v56  ;;  %v3537_v61 = vpop.f32.mrb[96].mxu1  ;;  %4096 = vtanh.f32 %v3409_v60 }
 0x1ab   :  { %v4073_v58 = vpop.eup %4072  ;;  %2863 = vst.msk [vmem:[%s5792_s2 + $0x6c0] sm:$0xff] %vm2646_vm2, %v4071_v57  ;;  %v1751_v63 = vpop.f32.mrb[97].mxu0  ;;  %4098 = vtanh.f32 %v3537_v61 }
 0x1ac   :  { %v4075_v59 = vpop.eup %4074  ;;  %2738 = vst.msk [vmem:[%s5792_s2 + $0x2d8] sm:$0xff] %vm2646_vm2, %v4073_v58  ;;  %v2263_v0 = vpop.f32.mrb[97].mxu1  ;;  %4100 = vtanh.f32 %v1751_v63 }
 0x1ad   :  { %v4077_v62 = vpop.eup %4076  ;;  %2866 = vst.msk [vmem:[%s5792_s2 + $0x6d8] sm:$0xff] %vm2646_vm2, %v4075_v59  ;;  %v3410_v2 = vpop.f32.mrb[98].mxu0  ;;  %4102 = vtanh.f32 %v2263_v0 }
 0x1ae   :  { %v4079_v1 = vpop.eup %4078  ;;  %2736 = vst.msk [vmem:[%s5792_s2 + $0x2c8] sm:$0xff] %vm2646_vm2, %v4077_v62  ;;  %v3538_v3 = vpop.f32.mrb[98].mxu1  ;;  %4104 = vtanh.f32 %v3410_v2 }
 0x1af   :  { %v4081_v4 = vpop.eup %4080  ;;  %2864 = vst.msk [vmem:[%s5792_s2 + $0x6c8] sm:$0xff] %vm2646_vm2, %v4079_v1  ;;  %v1754_v5 = vpop.f32.mrb[99].mxu0  ;;  %4106 = vtanh.f32 %v3538_v3 }
 0x1b0   :  { %v2266_v6 = vpop.f32.mrb[99].mxu1  ;;  %v4083_v7 = vpop.eup %4082  ;;  %2741 = vst.msk [vmem:[%s5792_s2 + $0x2f0] sm:$0xff] %vm2646_vm2, %v4081_v4  ;;  %4108 = vtanh.f32 %v1754_v5 }
 0x1b1   :  { %v4085_v8 = vpop.eup %4084  ;;  %2869 = vst.msk [vmem:[%s5792_s2 + $0x6f0] sm:$0xff] %vm2646_vm2, %v4083_v7  ;;  %4110 = vtanh.f32 %v2266_v6  ;;  %v3413_v12 = vpop.f32.mrb[100].mxu0 }
 0x1b2   :  { %v4087_v9 = vpop.eup %4086  ;;  %2739 = vst.msk [vmem:[%s5792_s2 + $0x2e0] sm:$0xff] %vm2646_vm2, %v4085_v8  ;;  %v3541_v13 = vpop.f32.mrb[100].mxu1  ;;  %4112 = vtanh.f32 %v3413_v12 }
 0x1b3   :  { %v4089_v10 = vpop.eup %4088  ;;  %2867 = vst.msk [vmem:[%s5792_s2 + $0x6e0] sm:$0xff] %vm2646_vm2, %v4087_v9  ;;  %v1767_v15 = vpop.f32.mrb[101].mxu0  ;;  %4114 = vtanh.f32 %v3541_v13 }
 0x1b4   :  { %v4091_v11 = vpop.eup %4090  ;;  %2742 = vst.msk [vmem:[%s5792_s2 + $0x2f8] sm:$0xff] %vm2646_vm2, %v4089_v10  ;;  %v2279_v16 = vpop.f32.mrb[101].mxu1  ;;  %4116 = vtanh.f32 %v1767_v15 }
 0x1b5   :  { %v4093_v14 = vpop.eup %4092  ;;  %2870 = vst.msk [vmem:[%s5792_s2 + $0x6f8] sm:$0xff] %vm2646_vm2, %v4091_v11  ;;  %v3414_v18 = vpop.f32.mrb[102].mxu0  ;;  %4118 = vtanh.f32 %v2279_v16 }
 0x1b6   :  { %v4095_v17 = vpop.eup %4094  ;;  %2740 = vst.msk [vmem:[%s5792_s2 + $0x2e8] sm:$0xff] %vm2646_vm2, %v4093_v14  ;;  %v3542_v19 = vpop.f32.mrb[102].mxu1  ;;  %4120 = vtanh.f32 %v3414_v18 }
 0x1b7   :  { %v4097_v20 = vpop.eup %4096  ;;  %2868 = vst.msk [vmem:[%s5792_s2 + $0x6e8] sm:$0xff] %vm2646_vm2, %v4095_v17  ;;  %v1770_v21 = vpop.f32.mrb[103].mxu0  ;;  %4122 = vtanh.f32 %v3542_v19 }
 0x1b8   :  { %v2282_v22 = vpop.f32.mrb[103].mxu1  ;;  %v4099_v23 = vpop.eup %4098  ;;  %2745 = vst.msk [vmem:[%s5792_s2 + $0x310] sm:$0xff] %vm2646_vm2, %v4097_v20  ;;  %4124 = vtanh.f32 %v1770_v21 }
 0x1b9   :  { %v4101_v24 = vpop.eup %4100  ;;  %2873 = vst.msk [vmem:[%s5792_s2 + $0x710] sm:$0xff] %vm2646_vm2, %v4099_v23  ;;  %4126 = vtanh.f32 %v2282_v22  ;;  %v3417_v28 = vpop.f32.mrb[104].mxu0 }
 0x1ba   :  { %v4103_v25 = vpop.eup %4102  ;;  %2743 = vst.msk [vmem:[%s5792_s2 + $0x300] sm:$0xff] %vm2646_vm2, %v4101_v24  ;;  %v3545_v29 = vpop.f32.mrb[104].mxu1  ;;  %4128 = vtanh.f32 %v3417_v28 }
 0x1bb   :  { %v4105_v26 = vpop.eup %4104  ;;  %2871 = vst.msk [vmem:[%s5792_s2 + $0x700] sm:$0xff] %vm2646_vm2, %v4103_v25  ;;  %v1783_v31 = vpop.f32.mrb[105].mxu0  ;;  %4130 = vtanh.f32 %v3545_v29 }
 0x1bc   :  { %v4107_v27 = vpop.eup %4106  ;;  %2746 = vst.msk [vmem:[%s5792_s2 + $0x318] sm:$0xff] %vm2646_vm2, %v4105_v26  ;;  %v2295_v32 = vpop.f32.mrb[105].mxu1  ;;  %4132 = vtanh.f32 %v1783_v31 }
 0x1bd   :  { %v4109_v30 = vpop.eup %4108  ;;  %2874 = vst.msk [vmem:[%s5792_s2 + $0x718] sm:$0xff] %vm2646_vm2, %v4107_v27  ;;  %v3418_v34 = vpop.f32.mrb[106].mxu0  ;;  %4134 = vtanh.f32 %v2295_v32 }
 0x1be   :  { %v4111_v33 = vpop.eup %4110  ;;  %2744 = vst.msk [vmem:[%s5792_s2 + $0x308] sm:$0xff] %vm2646_vm2, %v4109_v30  ;;  %v3546_v35 = vpop.f32.mrb[106].mxu1  ;;  %4136 = vtanh.f32 %v3418_v34 }
 0x1bf   :  { %v4113_v36 = vpop.eup %4112  ;;  %2872 = vst.msk [vmem:[%s5792_s2 + $0x708] sm:$0xff] %vm2646_vm2, %v4111_v33  ;;  %v1786_v37 = vpop.f32.mrb[107].mxu0  ;;  %4138 = vtanh.f32 %v3546_v35 }
 0x1c0   :  { %v2298_v38 = vpop.f32.mrb[107].mxu1  ;;  %v4115_v39 = vpop.eup %4114  ;;  %2749 = vst.msk [vmem:[%s5792_s2 + $0x330] sm:$0xff] %vm2646_vm2, %v4113_v36  ;;  %4140 = vtanh.f32 %v1786_v37 }
 0x1c1   :  { %v4117_v40 = vpop.eup %4116  ;;  %2877 = vst.msk [vmem:[%s5792_s2 + $0x730] sm:$0xff] %vm2646_vm2, %v4115_v39  ;;  %4142 = vtanh.f32 %v2298_v38  ;;  %v3421_v44 = vpop.f32.mrb[108].mxu0 }
 0x1c2   :  { %v4119_v41 = vpop.eup %4118  ;;  %2747 = vst.msk [vmem:[%s5792_s2 + $0x320] sm:$0xff] %vm2646_vm2, %v4117_v40  ;;  %v3549_v45 = vpop.f32.mrb[108].mxu1  ;;  %4144 = vtanh.f32 %v3421_v44 }
 0x1c3   :  { %v4121_v42 = vpop.eup %4120  ;;  %2875 = vst.msk [vmem:[%s5792_s2 + $0x720] sm:$0xff] %vm2646_vm2, %v4119_v41  ;;  %v1799_v47 = vpop.f32.mrb[109].mxu0  ;;  %4146 = vtanh.f32 %v3549_v45 }
 0x1c4   :  { %v4123_v43 = vpop.eup %4122  ;;  %2750 = vst.msk [vmem:[%s5792_s2 + $0x338] sm:$0xff] %vm2646_vm2, %v4121_v42  ;;  %v2311_v48 = vpop.f32.mrb[109].mxu1  ;;  %4148 = vtanh.f32 %v1799_v47 }
 0x1c5   :  { %v4125_v46 = vpop.eup %4124  ;;  %2878 = vst.msk [vmem:[%s5792_s2 + $0x738] sm:$0xff] %vm2646_vm2, %v4123_v43  ;;  %v3422_v50 = vpop.f32.mrb[110].mxu0  ;;  %4150 = vtanh.f32 %v2311_v48 }
 0x1c6   :  { %v4127_v49 = vpop.eup %4126  ;;  %2748 = vst.msk [vmem:[%s5792_s2 + $0x328] sm:$0xff] %vm2646_vm2, %v4125_v46  ;;  %v3550_v51 = vpop.f32.mrb[110].mxu1  ;;  %4152 = vtanh.f32 %v3422_v50 }
 0x1c7   :  { %v4129_v52 = vpop.eup %4128  ;;  %2876 = vst.msk [vmem:[%s5792_s2 + $0x728] sm:$0xff] %vm2646_vm2, %v4127_v49  ;;  %v1802_v53 = vpop.f32.mrb[111].mxu0  ;;  %4154 = vtanh.f32 %v3550_v51 }
 0x1c8   :  { %v2314_v54 = vpop.f32.mrb[111].mxu1  ;;  %v4131_v55 = vpop.eup %4130  ;;  %2753 = vst.msk [vmem:[%s5792_s2 + $0x350] sm:$0xff] %vm2646_vm2, %v4129_v52  ;;  %4156 = vtanh.f32 %v1802_v53 }
 0x1c9   :  { %v4133_v56 = vpop.eup %4132  ;;  %2881 = vst.msk [vmem:[%s5792_s2 + $0x750] sm:$0xff] %vm2646_vm2, %v4131_v55  ;;  %4158 = vtanh.f32 %v2314_v54  ;;  %v3425_v60 = vpop.f32.mrb[112].mxu0 }
 0x1ca   :  { %v4135_v57 = vpop.eup %4134  ;;  %2751 = vst.msk [vmem:[%s5792_s2 + $0x340] sm:$0xff] %vm2646_vm2, %v4133_v56  ;;  %v3553_v61 = vpop.f32.mrb[112].mxu1  ;;  %4160 = vtanh.f32 %v3425_v60 }
 0x1cb   :  { %v4137_v58 = vpop.eup %4136  ;;  %2879 = vst.msk [vmem:[%s5792_s2 + $0x740] sm:$0xff] %vm2646_vm2, %v4135_v57  ;;  %v1815_v63 = vpop.f32.mrb[113].mxu0  ;;  %4162 = vtanh.f32 %v3553_v61 }
 0x1cc   :  { %v4139_v59 = vpop.eup %4138  ;;  %2754 = vst.msk [vmem:[%s5792_s2 + $0x358] sm:$0xff] %vm2646_vm2, %v4137_v58  ;;  %v2327_v0 = vpop.f32.mrb[113].mxu1  ;;  %4164 = vtanh.f32 %v1815_v63 }
 0x1cd   :  { %v4141_v62 = vpop.eup %4140  ;;  %2882 = vst.msk [vmem:[%s5792_s2 + $0x758] sm:$0xff] %vm2646_vm2, %v4139_v59  ;;  %v3426_v2 = vpop.f32.mrb[114].mxu0  ;;  %4166 = vtanh.f32 %v2327_v0 }
 0x1ce   :  { %v4143_v1 = vpop.eup %4142  ;;  %2752 = vst.msk [vmem:[%s5792_s2 + $0x348] sm:$0xff] %vm2646_vm2, %v4141_v62  ;;  %v3554_v3 = vpop.f32.mrb[114].mxu1  ;;  %4168 = vtanh.f32 %v3426_v2 }
 0x1cf   :  { %v4145_v4 = vpop.eup %4144  ;;  %2880 = vst.msk [vmem:[%s5792_s2 + $0x748] sm:$0xff] %vm2646_vm2, %v4143_v1  ;;  %v1818_v5 = vpop.f32.mrb[115].mxu0  ;;  %4170 = vtanh.f32 %v3554_v3 }
 0x1d0   :  { %v2330_v6 = vpop.f32.mrb[115].mxu1  ;;  %v4147_v7 = vpop.eup %4146  ;;  %2757 = vst.msk [vmem:[%s5792_s2 + $0x370] sm:$0xff] %vm2646_vm2, %v4145_v4  ;;  %4172 = vtanh.f32 %v1818_v5 }
 0x1d1   :  { %v4149_v8 = vpop.eup %4148  ;;  %2885 = vst.msk [vmem:[%s5792_s2 + $0x770] sm:$0xff] %vm2646_vm2, %v4147_v7  ;;  %4174 = vtanh.f32 %v2330_v6  ;;  %v3429_v12 = vpop.f32.mrb[116].mxu0 }
 0x1d2   :  { %v4151_v9 = vpop.eup %4150  ;;  %2755 = vst.msk [vmem:[%s5792_s2 + $0x360] sm:$0xff] %vm2646_vm2, %v4149_v8  ;;  %v3557_v13 = vpop.f32.mrb[116].mxu1  ;;  %4176 = vtanh.f32 %v3429_v12 }
 0x1d3   :  { %v4153_v10 = vpop.eup %4152  ;;  %2883 = vst.msk [vmem:[%s5792_s2 + $0x760] sm:$0xff] %vm2646_vm2, %v4151_v9  ;;  %v1831_v15 = vpop.f32.mrb[117].mxu0  ;;  %4178 = vtanh.f32 %v3557_v13 }
 0x1d4   :  { %v4155_v11 = vpop.eup %4154  ;;  %2758 = vst.msk [vmem:[%s5792_s2 + $0x378] sm:$0xff] %vm2646_vm2, %v4153_v10  ;;  %v2343_v16 = vpop.f32.mrb[117].mxu1  ;;  %4180 = vtanh.f32 %v1831_v15 }
 0x1d5   :  { %v4157_v14 = vpop.eup %4156  ;;  %2886 = vst.msk [vmem:[%s5792_s2 + $0x778] sm:$0xff] %vm2646_vm2, %v4155_v11  ;;  %v3430_v18 = vpop.f32.mrb[118].mxu0  ;;  %4182 = vtanh.f32 %v2343_v16 }
 0x1d6   :  { %v4159_v17 = vpop.eup %4158  ;;  %2756 = vst.msk [vmem:[%s5792_s2 + $0x368] sm:$0xff] %vm2646_vm2, %v4157_v14  ;;  %v3558_v19 = vpop.f32.mrb[118].mxu1  ;;  %4184 = vtanh.f32 %v3430_v18 }
 0x1d7   :  { %v4161_v20 = vpop.eup %4160  ;;  %2884 = vst.msk [vmem:[%s5792_s2 + $0x768] sm:$0xff] %vm2646_vm2, %v4159_v17  ;;  %v1834_v21 = vpop.f32.mrb[119].mxu0  ;;  %4186 = vtanh.f32 %v3558_v19 }
 0x1d8   :  { %v2346_v22 = vpop.f32.mrb[119].mxu1  ;;  %v4163_v23 = vpop.eup %4162  ;;  %2761 = vst.msk [vmem:[%s5792_s2 + $0x390] sm:$0xff] %vm2646_vm2, %v4161_v20  ;;  %4188 = vtanh.f32 %v1834_v21 }
 0x1d9   :  { %v4165_v24 = vpop.eup %4164  ;;  %2889 = vst.msk [vmem:[%s5792_s2 + $0x790] sm:$0xff] %vm2646_vm2, %v4163_v23  ;;  %4190 = vtanh.f32 %v2346_v22  ;;  %v3433_v28 = vpop.f32.mrb[120].mxu0 }
 0x1da   :  { %v4167_v25 = vpop.eup %4166  ;;  %2759 = vst.msk [vmem:[%s5792_s2 + $0x380] sm:$0xff] %vm2646_vm2, %v4165_v24  ;;  %v3561_v29 = vpop.f32.mrb[120].mxu1  ;;  %4192 = vtanh.f32 %v3433_v28 }
 0x1db   :  { %v4169_v26 = vpop.eup %4168  ;;  %2887 = vst.msk [vmem:[%s5792_s2 + $0x780] sm:$0xff] %vm2646_vm2, %v4167_v25  ;;  %v1847_v31 = vpop.f32.mrb[121].mxu0  ;;  %4194 = vtanh.f32 %v3561_v29 }
 0x1dc   :  { %v4171_v27 = vpop.eup %4170  ;;  %2762 = vst.msk [vmem:[%s5792_s2 + $0x398] sm:$0xff] %vm2646_vm2, %v4169_v26  ;;  %v2359_v32 = vpop.f32.mrb[121].mxu1  ;;  %4196 = vtanh.f32 %v1847_v31 }
 0x1dd   :  { %v4173_v30 = vpop.eup %4172  ;;  %2890 = vst.msk [vmem:[%s5792_s2 + $0x798] sm:$0xff] %vm2646_vm2, %v4171_v27  ;;  %v3434_v34 = vpop.f32.mrb[122].mxu0  ;;  %4198 = vtanh.f32 %v2359_v32 }
 0x1de   :  { %v4175_v33 = vpop.eup %4174  ;;  %2760 = vst.msk [vmem:[%s5792_s2 + $0x388] sm:$0xff] %vm2646_vm2, %v4173_v30  ;;  %v3562_v35 = vpop.f32.mrb[122].mxu1  ;;  %4200 = vtanh.f32 %v3434_v34 }
 0x1df   :  { %v4177_v36 = vpop.eup %4176  ;;  %2888 = vst.msk [vmem:[%s5792_s2 + $0x788] sm:$0xff] %vm2646_vm2, %v4175_v33  ;;  %v1850_v37 = vpop.f32.mrb[123].mxu0  ;;  %4202 = vtanh.f32 %v3562_v35 }
 0x1e0   :  { %v2362_v38 = vpop.f32.mrb[123].mxu1  ;;  %v4179_v39 = vpop.eup %4178  ;;  %2765 = vst.msk [vmem:[%s5792_s2 + $0x3b0] sm:$0xff] %vm2646_vm2, %v4177_v36  ;;  %4204 = vtanh.f32 %v1850_v37 }
 0x1e1   :  { %v4181_v40 = vpop.eup %4180  ;;  %2893 = vst.msk [vmem:[%s5792_s2 + $0x7b0] sm:$0xff] %vm2646_vm2, %v4179_v39  ;;  %4206 = vtanh.f32 %v2362_v38  ;;  %v3437_v44 = vpop.f32.mrb[124].mxu0 }
 0x1e2   :  { %v4183_v41 = vpop.eup %4182  ;;  %2763 = vst.msk [vmem:[%s5792_s2 + $0x3a0] sm:$0xff] %vm2646_vm2, %v4181_v40  ;;  %v3565_v45 = vpop.f32.mrb[124].mxu1  ;;  %4208 = vtanh.f32 %v3437_v44 }
 0x1e3   :  { %v4185_v42 = vpop.eup %4184  ;;  %2891 = vst.msk [vmem:[%s5792_s2 + $0x7a0] sm:$0xff] %vm2646_vm2, %v4183_v41  ;;  %v1863_v47 = vpop.f32.mrb[125].mxu0  ;;  %4210 = vtanh.f32 %v3565_v45 }
 0x1e4   :  { %v4187_v43 = vpop.eup %4186  ;;  %2766 = vst.msk [vmem:[%s5792_s2 + $0x3b8] sm:$0xff] %vm2646_vm2, %v4185_v42  ;;  %v2375_v48 = vpop.f32.mrb[125].mxu1  ;;  %4212 = vtanh.f32 %v1863_v47 }
 0x1e5   :  { %v4189_v46 = vpop.eup %4188  ;;  %2894 = vst.msk [vmem:[%s5792_s2 + $0x7b8] sm:$0xff] %vm2646_vm2, %v4187_v43  ;;  %v3438_v50 = vpop.f32.mrb[126].mxu0  ;;  %4214 = vtanh.f32 %v2375_v48 }
 0x1e6   :  { %v4191_v49 = vpop.eup %4190  ;;  %2764 = vst.msk [vmem:[%s5792_s2 + $0x3a8] sm:$0xff] %vm2646_vm2, %v4189_v46  ;;  %v3566_v51 = vpop.f32.mrb[126].mxu1  ;;  %4216 = vtanh.f32 %v3438_v50 }
 0x1e7   :  { %v4193_v52 = vpop.eup %4192  ;;  %2892 = vst.msk [vmem:[%s5792_s2 + $0x7a8] sm:$0xff] %vm2646_vm2, %v4191_v49  ;;  %v1866_v53 = vpop.f32.mrb[127].mxu0  ;;  %4218 = vtanh.f32 %v3566_v51 }
 0x1e8   :  { %v2378_v54 = vpop.f32.mrb[127].mxu1  ;;  %v4195_v55 = vpop.eup %4194  ;;  %2769 = vst.msk [vmem:[%s5792_s2 + $0x3d0] sm:$0xff] %vm2646_vm2, %v4193_v52  ;;  %4220 = vtanh.f32 %v1866_v53 }
 0x1e9   :  { %v4197_v56 = vpop.eup %4196  ;;  %2897 = vst.msk [vmem:[%s5792_s2 + $0x7d0] sm:$0xff] %vm2646_vm2, %v4195_v55  ;;  %4222 = vtanh.f32 %v2378_v54 }
 0x1ea   :  { %v4199_v57 = vpop.eup %4198  ;;  %2767 = vst.msk [vmem:[%s5792_s2 + $0x3c0] sm:$0xff] %vm2646_vm2, %v4197_v56 }
 0x1eb   :  { %v4201_v58 = vpop.eup %4200  ;;  %2895 = vst.msk [vmem:[%s5792_s2 + $0x7c0] sm:$0xff] %vm2646_vm2, %v4199_v57 }
 0x1ec   :  { %v4203_v59 = vpop.eup %4202  ;;  %2770 = vst.msk [vmem:[%s5792_s2 + $0x3d8] sm:$0xff] %vm2646_vm2, %v4201_v58 }
 0x1ed   :  { %v4205_v60 = vpop.eup %4204  ;;  %2898 = vst.msk [vmem:[%s5792_s2 + $0x7d8] sm:$0xff] %vm2646_vm2, %v4203_v59 }
 0x1ee   :  { %v4207_v61 = vpop.eup %4206  ;;  %2768 = vst.msk [vmem:[%s5792_s2 + $0x3c8] sm:$0xff] %vm2646_vm2, %v4205_v60 }
 0x1ef   :  { %v4209_v62 = vpop.eup %4208  ;;  %2896 = vst.msk [vmem:[%s5792_s2 + $0x7c8] sm:$0xff] %vm2646_vm2, %v4207_v61 }
 0x1f0   :  { %v4211_v63 = vpop.eup %4210  ;;  %2773 = vst.msk [vmem:[%s5792_s2 + $0x3f0] sm:$0xff] %vm2646_vm2, %v4209_v62 }
 0x1f1   :  { %v4213_v0 = vpop.eup %4212  ;;  %2901 = vst.msk [vmem:[%s5792_s2 + $0x7f0] sm:$0xff] %vm2646_vm2, %v4211_v63 }
 0x1f2   :  { %v4215_v1 = vpop.eup %4214  ;;  %2771 = vst.msk [vmem:[%s5792_s2 + $0x3e0] sm:$0xff] %vm2646_vm2, %v4213_v0 }
 0x1f3   :  { %v4217_v2 = vpop.eup %4216  ;;  %2899 = vst.msk [vmem:[%s5792_s2 + $0x7e0] sm:$0xff] %vm2646_vm2, %v4215_v1 }
 0x1f4   :  { %v4219_v3 = vpop.eup %4218  ;;  %2774 = vst.msk [vmem:[%s5792_s2 + $0x3f8] sm:$0xff] %vm2646_vm2, %v4217_v2 }
 0x1f5   :  { %v4221_v4 = vpop.eup %4220  ;;  %2902 = vst.msk [vmem:[%s5792_s2 + $0x7f8] sm:$0xff] %vm2646_vm2, %v4219_v3 }
 0x1f6   :  { %v4223_v5 = vpop.eup %4222  ;;  %2772 = vst.msk [vmem:[%s5792_s2 + $0x3e8] sm:$0xff] %vm2646_vm2, %v4221_v4 }
 0x1f7   :  { %2900 = vst.msk [vmem:[%s5792_s2 + $0x7e8] sm:$0xff] %vm2646_vm2, %v4223_v5 }

</bundles_post_ra>
